<compile_context>
chip_gen: v6e
topology: v6e:2x2x1
jax: 0.10.0
libtpu: 0.0.40
codegen_flags: <defaults>
</compile_context>

<pallas_src>
import numpy as np
import jax
import jax.numpy as jnp
from jax import lax
from jax.experimental import pallas as pl
from jax.experimental.pallas import tpu as pltpu

NUM_CLASSES = 6
NUM_BOX = 4
HEAD_OUT = NUM_BOX + NUM_CLASSES      # 10 real head channels
HEAD_PAD = 128                        # lane-dense padded head width
C_IN, C1, C2 = 3, 8, 16               # stem input / hidden channel widths


# ---------------------------------------------------------------------------
# Static conv geometry: per output row, per 3x3 tap, the source row index in
# the (flattened, channels-last) input feature map, or -1 for zero padding.
# ---------------------------------------------------------------------------
def _gather_indices(ho, wo, hi, wi, stride, pad):
    idx = np.full((ho * wo, 9), -1, np.int32)
    for m in range(ho * wo):
        oh, ow = divmod(m, wo)
        for kh in range(3):
            for kw in range(3):
                ih = oh * stride + kh - pad
                iw = ow * stride + kw - pad
                if 0 <= ih < hi and 0 <= iw < wi:
                    idx[m, kh * 3 + kw] = ih * wi + iw
    return idx


# ---------------------------------------------------------------------------
# Fused Pallas kernel: stem -> downsample -> residual bottleneck -> head
# ---------------------------------------------------------------------------
def _conv3x3_taps(h_bf, src_ref, w_ref, b_ref):
    """3x3 conv on a flattened channels-last activation (rows=(h,w), cols=C).

    im2col happens inside the kernel: for each tap a one-hot selection matrix
    (iota == static source-row index; padding rows -> all-zero) gathers the
    source rows on the MXU, so the conv is pure bf16 matmuls and the
    activation never leaves VMEM.
    """
    m_in = h_bf.shape[0]
    m_out = src_ref.shape[0]
    c_out = w_ref.shape[2]
    src = src_ref[...]                                                # (m_out, 9) i32
    col_ids = lax.broadcasted_iota(jnp.int32, (m_out, m_in), 1)
    acc = jnp.zeros((m_out, c_out), jnp.float32)
    for t in range(9):
        sel = jnp.where(col_ids == src[:, t:t + 1], 1.0, 0.0).astype(jnp.bfloat16)
        g = jnp.dot(sel, h_bf, preferred_element_type=jnp.float32)    # gathered rows
        acc = acc + jnp.dot(g.astype(jnp.bfloat16), w_ref[t],
                            preferred_element_type=jnp.float32)
    return acc + b_ref[...]


def _yolo_kernel(src2_ref, src3_ref, p1_ref,
                 w1_ref, b1_ref, w2_ref, b2_ref, w3_ref, b3_ref,
                 wh_ref, bh_ref, o_ref):
    # Stem: 3x3/s2 conv on pre-im2col'd patches (BN folded into bias) + SiLU.
    f1 = jnp.dot(p1_ref[0], w1_ref[...], preferred_element_type=jnp.float32)
    f1 = f1 + b1_ref[...]
    f1 = f1 * jax.nn.sigmoid(f1)                  # SiLU kept in f32 (v5e EUP path)

    # Downsample: 3x3/s2 conv with in-kernel im2col.
    f2 = _conv3x3_taps(f1.astype(jnp.bfloat16), src2_ref, w2_ref, b2_ref)
    f2 = f2 * jax.nn.sigmoid(f2)

    # Bottleneck: 3x3/s1 conv + shortcut; residual read straight from VMEM.
    f3 = _conv3x3_taps(f2.astype(jnp.bfloat16), src3_ref, w3_ref, b3_ref)
    f3 = f3 * jax.nn.sigmoid(f3) + f2

    # Detect head: 1x1 conv with lane-padded (128) output columns; raw box
    # channels, sigmoid class channels via an iota mask (no slice/concat).
    h = jnp.dot(f3.astype(jnp.bfloat16), wh_ref[...],
                preferred_element_type=jnp.float32) + bh_ref[...]
    col = lax.broadcasted_iota(jnp.int32, h.shape, 1)
    h = jnp.where(col < NUM_BOX, h, jax.nn.sigmoid(h))
    o_ref[0] = h.astype(o_ref.dtype)              # single lane-dense store


# ---------------------------------------------------------------------------
# Wrapper-side plumbing (tiny, one-shot XLA ops at the NCHW boundary)
# ---------------------------------------------------------------------------
def _im2col(x, k, s, p):
    """NCHW -> (B, Ho*Wo, C*k*k) patches, column order (c, kh, kw)."""
    if p > 0:
        x = jnp.pad(x, ((0, 0), (0, 0), (p, p), (p, p)))
    B, C, H, W = x.shape
    Ho = (H - k) // s + 1
    Wo = (W - k) // s + 1
    cols = [x[:, :, i:i + s * Ho:s, j:j + s * Wo:s]
            for i in range(k) for j in range(k)]
    patches = jnp.stack(cols, axis=2)              # (B, C, k*k, Ho, Wo)
    patches = patches.transpose(0, 3, 4, 1, 2)     # (B, Ho, Wo, C, k*k)
    return patches.reshape(B, Ho * Wo, C * k * k), Ho, Wo


def init_params(key, c_in=C_IN, c1=C1, c2=C2, num_classes=NUM_CLASSES):
    """Synthetic OIHW conv weights with BatchNorm already folded into (w, b)."""
    ks = jax.random.split(key, 8)

    def w(k, shape, scale=0.1):
        return jax.random.normal(k, shape, jnp.float32) * scale

    head_out = NUM_BOX + num_classes
    return {
        "w1": w(ks[0], (c1, c_in, 3, 3)), "b1": w(ks[1], (c1,), 0.01),
        "w2": w(ks[2], (c2, c1, 3, 3)),   "b2": w(ks[3], (c2,), 0.01),
        "w3": w(ks[4], (c2, c2, 3, 3)),   "b3": w(ks[5], (c2,), 0.01),
        "wh": w(ks[6], (head_out, c2, 1, 1)), "bh": w(ks[7], (head_out,), 0.01),
    }


def pack_params(raw):
    """OIHW weights -> kernel layout: bf16 MXU operands, f32 biases, head
    weight/bias zero-padded to a lane-dense 128 output channels."""
    c1, c_in = raw["w1"].shape[:2]
    c2 = raw["w2"].shape[0]
    head_out = raw["wh"].shape[0]
    w1 = raw["w1"].reshape(c1, c_in * 9).T                      # (Cin*9, C1)
    w2 = raw["w2"].transpose(2, 3, 1, 0).reshape(9, c1, c2)     # (tap, Cin, Cout)
    w3 = raw["w3"].transpose(2, 3, 1, 0).reshape(9, c2, c2)
    wh = raw["wh"].reshape(head_out, c2).T                      # (C2, head_out)
    wh = jnp.pad(wh, ((0, 0), (0, HEAD_PAD - head_out)))
    bh = jnp.pad(raw["bh"], (0, HEAD_PAD - head_out))
    return {
        "w1": w1.astype(jnp.bfloat16), "b1": raw["b1"].reshape(1, -1),
        "w2": w2.astype(jnp.bfloat16), "b2": raw["b2"].reshape(1, -1),
        "w3": w3.astype(jnp.bfloat16), "b3": raw["b3"].reshape(1, -1),
        "wh": wh.astype(jnp.bfloat16), "bh": bh.reshape(1, -1),
    }


@jax.jit
def yolo_forward(packed, x):
    """Inference branch of YOLOWrapper.forward (training/loss path omitted).

    x: (B, 3, H, W) or (3, H, W) NCHW float32.
    Returns (B, 4 + num_classes, num_anchors) raw head output (sigmoid classes).
    """
    if x.ndim == 3:                        # mirrors `if x.dim() == 3: unsqueeze`
        x = x[None]
    B = x.shape[0]

    patches, h1, w1 = _im2col(x, 3, 2, 1)              # (B, M1, Cin*9)
    m1, k1 = patches.shape[1], patches.shape[2]
    h2, w2 = (h1 + 2 - 3) // 2 + 1, (w1 + 2 - 3) // 2 + 1
    m2 = h2 * w2                                       # rows for layers 2/3/head

    src2 = jnp.asarray(_gather_indices(h2, w2, h1, w1, 2, 1))    # (m2, 9)
    src3 = jnp.asarray(_gather_indices(h2, w2, h2, w2, 1, 1))    # (m2, 9)

    def full(shape):
        return pl.BlockSpec(shape, lambda b, n=len(shape): (0,) * n)

    grid_spec = pltpu.PrefetchScalarGridSpec(
        num_scalar_prefetch=0,
        grid=(B,),
        in_specs=[
            full((m2, 9)),                                   # src2
            full((m2, 9)),                                   # src3
            pl.BlockSpec((1, m1, k1), lambda b: (b, 0, 0)),  # stem patches
            full((k1, C1)), full((1, C1)),                   # w1, b1
            full((9, C1, C2)), full((1, C2)),                # w2, b2
            full((9, C2, C2)), full((1, C2)),                # w3, b3
            full((C2, HEAD_PAD)), full((1, HEAD_PAD)),       # wh, bh
        ],
        out_specs=pl.BlockSpec((1, m2, HEAD_PAD), lambda b: (b, 0, 0)),
    )

    out = pl.pallas_call(
        _yolo_kernel,
        out_shape=jax.ShapeDtypeStruct((B, m2, HEAD_PAD), jnp.float32),
        grid_spec=grid_spec,
        compiler_params=pltpu.CompilerParams(
            dimension_semantics=("parallel",)),   # batch across TCs on v7x
    )(src2, src3, patches.astype(jnp.bfloat16),
      packed["w1"], packed["b1"], packed["w2"], packed["b2"],
      packed["w3"], packed["b3"], packed["wh"], packed["bh"])

    head = out[:, :, :HEAD_OUT]            # strip lane padding (tiny XLA slice)
    return head.transpose(0, 2, 1)         # (B, 4 + num_classes, num_anchors)


# ---------------------------------------------------------------------------
# Pure-JAX f32 reference (independent formulation) for a sanity check
# ---------------------------------------------------------------------------
def _reference_forward(raw, x):
    if x.ndim == 3:
        x = x[None]

    def conv(h, w, b, s, p):
        out = lax.conv_general_dilated(
            h, w, (s, s), [(p, p), (p, p)],
            dimension_numbers=("NCHW", "OIHW", "NCHW"))
        return out + b.reshape(1, -1, 1, 1)

    f1 = jax.nn.silu(conv(x, raw["w1"], raw["b1"], 2, 1))
    f2 = jax.nn.silu(conv(f1, raw["w2"], raw["b2"], 2, 1))
    f3 = jax.nn.silu(conv(f2, raw["w3"], raw["b3"], 1, 1)) + f2
    h = conv(f3, raw["wh"], raw["bh"], 1, 0)
    out = jnp.concatenate([h[:, :NUM_BOX], jax.nn.sigmoid(h[:, NUM_BOX:])], axis=1)
    B, C, H, W = out.shape
    return out.reshape(B, C, H * W)


if __name__ == "__main__":
    key = jax.random.PRNGKey(0)
    pkey, xkey = jax.random.split(key)
    raw = init_params(pkey)
    packed = pack_params(raw)
    x = jax.random.normal(xkey, (2, 3, 32, 32), jnp.float32)   # small NCHW batch

    out = jax.block_until_ready(yolo_forward(packed, x))
    assert out.shape == (2, HEAD_OUT, 8 * 8), out.shape
    assert bool(jnp.all(jnp.isfinite(out)))

    ref = jax.block_until_ready(_reference_forward(raw, x))
    max_err = float(jnp.max(jnp.abs(out - ref)))
    assert max_err < 5e-2, f"kernel/reference mismatch: {max_err}"

    print("KERNEL_OK")
</pallas_src>

<mosaic_0001>
module attributes {stable_mosaic.version = 11 : i64} {
  func.func @_yolo_kernel(%arg0: i32, %arg1: memref<64x9xi32, #tpu.memory_space<vmem>>, %arg2: memref<64x9xi32, #tpu.memory_space<vmem>>, %arg3: memref<1x256x27xbf16, #tpu.memory_space<vmem>>, %arg4: memref<27x8xbf16, #tpu.memory_space<vmem>>, %arg5: memref<1x8xf32, #tpu.memory_space<vmem>>, %arg6: memref<9x8x16xbf16, #tpu.memory_space<vmem>>, %arg7: memref<1x16xf32, #tpu.memory_space<vmem>>, %arg8: memref<9x16x16xbf16, #tpu.memory_space<vmem>>, %arg9: memref<1x16xf32, #tpu.memory_space<vmem>>, %arg10: memref<16x128xbf16, #tpu.memory_space<vmem>>, %arg11: memref<1x128xf32, #tpu.memory_space<vmem>>, %arg12: memref<1x64x128xf32, #tpu.memory_space<vmem>>) attributes {dimension_semantics = [#tpu.dimension_semantics<parallel>], iteration_bounds = array<i64: 2>, scalar_prefetch = 0 : i64, scratch_operands = 0 : i64, tpu.core_type = #tpu.core_type<tc>, window_params = [{pipeline_mode = #tpu.pipeline_mode<synchronous>, transform_indices = @transform_0, window_bounds = array<i64: 64, 9>}, {pipeline_mode = #tpu.pipeline_mode<synchronous>, transform_indices = @transform_1, window_bounds = array<i64: 64, 9>}, {transform_indices = @transform_2, window_bounds = array<i64: 1, 256, 27>}, {pipeline_mode = #tpu.pipeline_mode<synchronous>, transform_indices = @transform_3, window_bounds = array<i64: 27, 8>}, {pipeline_mode = #tpu.pipeline_mode<synchronous>, transform_indices = @transform_4, window_bounds = array<i64: 1, 8>}, {pipeline_mode = #tpu.pipeline_mode<synchronous>, transform_indices = @transform_5, window_bounds = array<i64: 9, 8, 16>}, {pipeline_mode = #tpu.pipeline_mode<synchronous>, transform_indices = @transform_6, window_bounds = array<i64: 1, 16>}, {pipeline_mode = #tpu.pipeline_mode<synchronous>, transform_indices = @transform_7, window_bounds = array<i64: 9, 16, 16>}, {pipeline_mode = #tpu.pipeline_mode<synchronous>, transform_indices = @transform_8, window_bounds = array<i64: 1, 16>}, {pipeline_mode = #tpu.pipeline_mode<synchronous>, transform_indices = @transform_9, window_bounds = array<i64: 16, 128>}, {pipeline_mode = #tpu.pipeline_mode<synchronous>, transform_indices = @transform_10, window_bounds = array<i64: 1, 128>}, {transform_indices = @transform_11, window_bounds = array<i64: 1, 64, 128>}]} {
    %c0 = arith.constant 0 : index
    %c0_0 = arith.constant 0 : index
    %c0_1 = arith.constant 0 : index
    %0 = vector.load %arg3[%c0, %c0_0, %c0_1] : memref<1x256x27xbf16, #tpu.memory_space<vmem>>, vector<1x256x27xbf16>
    %1 = vector.shape_cast %0 : vector<1x256x27xbf16> to vector<256x27xbf16>
    %c0_2 = arith.constant 0 : index
    %c0_3 = arith.constant 0 : index
    %2 = vector.load %arg4[%c0_2, %c0_3] : memref<27x8xbf16, #tpu.memory_space<vmem>>, vector<27x8xbf16>
    %cst = arith.constant dense<0.000000e+00> : vector<256x8xf32>
    %3 = tpu.matmul %1, %2, %cst {dimension_numbers = #tpu.dot_dimension_numbers<[1], [0], [0], [1], [0, 0, 1, 1], [], []>} : vector<256x27xbf16>, vector<27x8xbf16>, vector<256x8xf32> -> vector<256x8xf32>
    %c0_4 = arith.constant 0 : index
    %c0_5 = arith.constant 0 : index
    %4 = vector.load %arg5[%c0_4, %c0_5] : memref<1x8xf32, #tpu.memory_space<vmem>>, vector<1x8xf32>
    %5 = vector.broadcast %4 : vector<1x8xf32> to vector<256x8xf32>
    %6 = arith.addf %3, %5 : vector<256x8xf32>
    %7 = arith.negf %6 : vector<256x8xf32>
    %8 = math.exp %7 : vector<256x8xf32>
    %cst_6 = arith.constant 1.000000e+00 : f32
    %9 = vector.broadcast %cst_6 : f32 to vector<256x8xf32>
    %10 = arith.addf %9, %8 : vector<256x8xf32>
    %11 = arith.divf %9, %10 : vector<256x8xf32>
    %12 = arith.mulf %6, %11 : vector<256x8xf32>
    %13 = arith.truncf %12 : vector<256x8xf32> to vector<256x8xbf16>
    %c0_7 = arith.constant 0 : index
    %c0_8 = arith.constant 0 : index
    %14 = vector.load %arg1[%c0_7, %c0_8] : memref<64x9xi32, #tpu.memory_space<vmem>>, vector<64x9xi32>
    %15 = tpu.iota {dimensions = array<i32: 1>} : vector<64x256xi32>
    %cst_9 = arith.constant 0.000000e+00 : f32
    %16 = vector.broadcast %cst_9 : f32 to vector<64x16xf32>
    %17 = vector.extract_strided_slice %14 {offsets = [0, 0], sizes = [64, 1], strides = [1, 1]} : vector<64x9xi32> to vector<64x1xi32>
    %18 = vector.broadcast %17 : vector<64x1xi32> to vector<64x256xi32>
    %19 = arith.cmpi eq, %15, %18 : vector<64x256xi32>
    %cst_10 = arith.constant 1.000000e+00 : f32
    %cst_11 = arith.constant 0.000000e+00 : f32
    %20 = vector.broadcast %cst_10 : f32 to vector<64x256xf32>
    %21 = vector.broadcast %cst_11 : f32 to vector<64x256xf32>
    %22 = arith.select %19, %20, %21 : vector<64x256xi1>, vector<64x256xf32>
    %23 = arith.truncf %22 : vector<64x256xf32> to vector<64x256xbf16>
    %cst_12 = arith.constant dense<0.000000e+00> : vector<64x8xf32>
    %24 = tpu.matmul %23, %13, %cst_12 {dimension_numbers = #tpu.dot_dimension_numbers<[1], [0], [0], [1], [0, 0, 1, 1], [], []>} : vector<64x256xbf16>, vector<256x8xbf16>, vector<64x8xf32> -> vector<64x8xf32>
    %25 = arith.truncf %24 : vector<64x8xf32> to vector<64x8xbf16>
    %c0_13 = arith.constant 0 : index
    %c0_14 = arith.constant 0 : index
    %c0_15 = arith.constant 0 : index
    %26 = vector.load %arg6[%c0_13, %c0_14, %c0_15] : memref<9x8x16xbf16, #tpu.memory_space<vmem>>, vector<1x8x16xbf16>
    %27 = vector.shape_cast %26 : vector<1x8x16xbf16> to vector<8x16xbf16>
    %cst_16 = arith.constant dense<0.000000e+00> : vector<64x16xf32>
    %28 = tpu.matmul %25, %27, %cst_16 {dimension_numbers = #tpu.dot_dimension_numbers<[1], [0], [0], [1], [0, 0, 1, 1], [], []>} : vector<64x8xbf16>, vector<8x16xbf16>, vector<64x16xf32> -> vector<64x16xf32>
    %29 = arith.addf %16, %28 : vector<64x16xf32>
    %30 = vector.extract_strided_slice %14 {offsets = [0, 1], sizes = [64, 1], strides = [1, 1]} : vector<64x9xi32> to vector<64x1xi32>
    %31 = vector.broadcast %30 : vector<64x1xi32> to vector<64x256xi32>
    %32 = arith.cmpi eq, %15, %31 : vector<64x256xi32>
    %cst_17 = arith.constant 1.000000e+00 : f32
    %cst_18 = arith.constant 0.000000e+00 : f32
    %33 = vector.broadcast %cst_17 : f32 to vector<64x256xf32>
    %34 = vector.broadcast %cst_18 : f32 to vector<64x256xf32>
    %35 = arith.select %32, %33, %34 : vector<64x256xi1>, vector<64x256xf32>
    %36 = arith.truncf %35 : vector<64x256xf32> to vector<64x256xbf16>
    %cst_19 = arith.constant dense<0.000000e+00> : vector<64x8xf32>
    %37 = tpu.matmul %36, %13, %cst_19 {dimension_numbers = #tpu.dot_dimension_numbers<[1], [0], [0], [1], [0, 0, 1, 1], [], []>} : vector<64x256xbf16>, vector<256x8xbf16>, vector<64x8xf32> -> vector<64x8xf32>
    %38 = arith.truncf %37 : vector<64x8xf32> to vector<64x8xbf16>
    %c1 = arith.constant 1 : index
    %c0_20 = arith.constant 0 : index
    %c0_21 = arith.constant 0 : index
    %39 = vector.load %arg6[%c1, %c0_20, %c0_21] : memref<9x8x16xbf16, #tpu.memory_space<vmem>>, vector<1x8x16xbf16>
    %40 = vector.shape_cast %39 : vector<1x8x16xbf16> to vector<8x16xbf16>
    %cst_22 = arith.constant dense<0.000000e+00> : vector<64x16xf32>
    %41 = tpu.matmul %38, %40, %cst_22 {dimension_numbers = #tpu.dot_dimension_numbers<[1], [0], [0], [1], [0, 0, 1, 1], [], []>} : vector<64x8xbf16>, vector<8x16xbf16>, vector<64x16xf32> -> vector<64x16xf32>
    %42 = arith.addf %29, %41 : vector<64x16xf32>
    %43 = vector.extract_strided_slice %14 {offsets = [0, 2], sizes = [64, 1], strides = [1, 1]} : vector<64x9xi32> to vector<64x1xi32>
    %44 = vector.broadcast %43 : vector<64x1xi32> to vector<64x256xi32>
    %45 = arith.cmpi eq, %15, %44 : vector<64x256xi32>
    %cst_23 = arith.constant 1.000000e+00 : f32
    %cst_24 = arith.constant 0.000000e+00 : f32
    %46 = vector.broadcast %cst_23 : f32 to vector<64x256xf32>
    %47 = vector.broadcast %cst_24 : f32 to vector<64x256xf32>
    %48 = arith.select %45, %46, %47 : vector<64x256xi1>, vector<64x256xf32>
    %49 = arith.truncf %48 : vector<64x256xf32> to vector<64x256xbf16>
    %cst_25 = arith.constant dense<0.000000e+00> : vector<64x8xf32>
    %50 = tpu.matmul %49, %13, %cst_25 {dimension_numbers = #tpu.dot_dimension_numbers<[1], [0], [0], [1], [0, 0, 1, 1], [], []>} : vector<64x256xbf16>, vector<256x8xbf16>, vector<64x8xf32> -> vector<64x8xf32>
    %51 = arith.truncf %50 : vector<64x8xf32> to vector<64x8xbf16>
    %c2 = arith.constant 2 : index
    %c0_26 = arith.constant 0 : index
    %c0_27 = arith.constant 0 : index
    %52 = vector.load %arg6[%c2, %c0_26, %c0_27] : memref<9x8x16xbf16, #tpu.memory_space<vmem>>, vector<1x8x16xbf16>
    %53 = vector.shape_cast %52 : vector<1x8x16xbf16> to vector<8x16xbf16>
    %cst_28 = arith.constant dense<0.000000e+00> : vector<64x16xf32>
    %54 = tpu.matmul %51, %53, %cst_28 {dimension_numbers = #tpu.dot_dimension_numbers<[1], [0], [0], [1], [0, 0, 1, 1], [], []>} : vector<64x8xbf16>, vector<8x16xbf16>, vector<64x16xf32> -> vector<64x16xf32>
    %55 = arith.addf %42, %54 : vector<64x16xf32>
    %56 = vector.extract_strided_slice %14 {offsets = [0, 3], sizes = [64, 1], strides = [1, 1]} : vector<64x9xi32> to vector<64x1xi32>
    %57 = vector.broadcast %56 : vector<64x1xi32> to vector<64x256xi32>
    %58 = arith.cmpi eq, %15, %57 : vector<64x256xi32>
    %cst_29 = arith.constant 1.000000e+00 : f32
    %cst_30 = arith.constant 0.000000e+00 : f32
    %59 = vector.broadcast %cst_29 : f32 to vector<64x256xf32>
    %60 = vector.broadcast %cst_30 : f32 to vector<64x256xf32>
    %61 = arith.select %58, %59, %60 : vector<64x256xi1>, vector<64x256xf32>
    %62 = arith.truncf %61 : vector<64x256xf32> to vector<64x256xbf16>
    %cst_31 = arith.constant dense<0.000000e+00> : vector<64x8xf32>
    %63 = tpu.matmul %62, %13, %cst_31 {dimension_numbers = #tpu.dot_dimension_numbers<[1], [0], [0], [1], [0, 0, 1, 1], [], []>} : vector<64x256xbf16>, vector<256x8xbf16>, vector<64x8xf32> -> vector<64x8xf32>
    %64 = arith.truncf %63 : vector<64x8xf32> to vector<64x8xbf16>
    %c3 = arith.constant 3 : index
    %c0_32 = arith.constant 0 : index
    %c0_33 = arith.constant 0 : index
    %65 = vector.load %arg6[%c3, %c0_32, %c0_33] : memref<9x8x16xbf16, #tpu.memory_space<vmem>>, vector<1x8x16xbf16>
    %66 = vector.shape_cast %65 : vector<1x8x16xbf16> to vector<8x16xbf16>
    %cst_34 = arith.constant dense<0.000000e+00> : vector<64x16xf32>
    %67 = tpu.matmul %64, %66, %cst_34 {dimension_numbers = #tpu.dot_dimension_numbers<[1], [0], [0], [1], [0, 0, 1, 1], [], []>} : vector<64x8xbf16>, vector<8x16xbf16>, vector<64x16xf32> -> vector<64x16xf32>
    %68 = arith.addf %55, %67 : vector<64x16xf32>
    %69 = vector.extract_strided_slice %14 {offsets = [0, 4], sizes = [64, 1], strides = [1, 1]} : vector<64x9xi32> to vector<64x1xi32>
    %70 = vector.broadcast %69 : vector<64x1xi32> to vector<64x256xi32>
    %71 = arith.cmpi eq, %15, %70 : vector<64x256xi32>
    %cst_35 = arith.constant 1.000000e+00 : f32
    %cst_36 = arith.constant 0.000000e+00 : f32
    %72 = vector.broadcast %cst_35 : f32 to vector<64x256xf32>
    %73 = vector.broadcast %cst_36 : f32 to vector<64x256xf32>
    %74 = arith.select %71, %72, %73 : vector<64x256xi1>, vector<64x256xf32>
    %75 = arith.truncf %74 : vector<64x256xf32> to vector<64x256xbf16>
    %cst_37 = arith.constant dense<0.000000e+00> : vector<64x8xf32>
    %76 = tpu.matmul %75, %13, %cst_37 {dimension_numbers = #tpu.dot_dimension_numbers<[1], [0], [0], [1], [0, 0, 1, 1], [], []>} : vector<64x256xbf16>, vector<256x8xbf16>, vector<64x8xf32> -> vector<64x8xf32>
    %77 = arith.truncf %76 : vector<64x8xf32> to vector<64x8xbf16>
    %c4 = arith.constant 4 : index
    %c0_38 = arith.constant 0 : index
    %c0_39 = arith.constant 0 : index
    %78 = vector.load %arg6[%c4, %c0_38, %c0_39] : memref<9x8x16xbf16, #tpu.memory_space<vmem>>, vector<1x8x16xbf16>
    %79 = vector.shape_cast %78 : vector<1x8x16xbf16> to vector<8x16xbf16>
    %cst_40 = arith.constant dense<0.000000e+00> : vector<64x16xf32>
    %80 = tpu.matmul %77, %79, %cst_40 {dimension_numbers = #tpu.dot_dimension_numbers<[1], [0], [0], [1], [0, 0, 1, 1], [], []>} : vector<64x8xbf16>, vector<8x16xbf16>, vector<64x16xf32> -> vector<64x16xf32>
    %81 = arith.addf %68, %80 : vector<64x16xf32>
    %82 = vector.extract_strided_slice %14 {offsets = [0, 5], sizes = [64, 1], strides = [1, 1]} : vector<64x9xi32> to vector<64x1xi32>
    %83 = vector.broadcast %82 : vector<64x1xi32> to vector<64x256xi32>
    %84 = arith.cmpi eq, %15, %83 : vector<64x256xi32>
    %cst_41 = arith.constant 1.000000e+00 : f32
    %cst_42 = arith.constant 0.000000e+00 : f32
    %85 = vector.broadcast %cst_41 : f32 to vector<64x256xf32>
    %86 = vector.broadcast %cst_42 : f32 to vector<64x256xf32>
    %87 = arith.select %84, %85, %86 : vector<64x256xi1>, vector<64x256xf32>
    %88 = arith.truncf %87 : vector<64x256xf32> to vector<64x256xbf16>
    %cst_43 = arith.constant dense<0.000000e+00> : vector<64x8xf32>
    %89 = tpu.matmul %88, %13, %cst_43 {dimension_numbers = #tpu.dot_dimension_numbers<[1], [0], [0], [1], [0, 0, 1, 1], [], []>} : vector<64x256xbf16>, vector<256x8xbf16>, vector<64x8xf32> -> vector<64x8xf32>
    %90 = arith.truncf %89 : vector<64x8xf32> to vector<64x8xbf16>
    %c5 = arith.constant 5 : index
    %c0_44 = arith.constant 0 : index
    %c0_45 = arith.constant 0 : index
    %91 = vector.load %arg6[%c5, %c0_44, %c0_45] : memref<9x8x16xbf16, #tpu.memory_space<vmem>>, vector<1x8x16xbf16>
    %92 = vector.shape_cast %91 : vector<1x8x16xbf16> to vector<8x16xbf16>
    %cst_46 = arith.constant dense<0.000000e+00> : vector<64x16xf32>
    %93 = tpu.matmul %90, %92, %cst_46 {dimension_numbers = #tpu.dot_dimension_numbers<[1], [0], [0], [1], [0, 0, 1, 1], [], []>} : vector<64x8xbf16>, vector<8x16xbf16>, vector<64x16xf32> -> vector<64x16xf32>
    %94 = arith.addf %81, %93 : vector<64x16xf32>
    %95 = vector.extract_strided_slice %14 {offsets = [0, 6], sizes = [64, 1], strides = [1, 1]} : vector<64x9xi32> to vector<64x1xi32>
    %96 = vector.broadcast %95 : vector<64x1xi32> to vector<64x256xi32>
    %97 = arith.cmpi eq, %15, %96 : vector<64x256xi32>
    %cst_47 = arith.constant 1.000000e+00 : f32
    %cst_48 = arith.constant 0.000000e+00 : f32
    %98 = vector.broadcast %cst_47 : f32 to vector<64x256xf32>
    %99 = vector.broadcast %cst_48 : f32 to vector<64x256xf32>
    %100 = arith.select %97, %98, %99 : vector<64x256xi1>, vector<64x256xf32>
    %101 = arith.truncf %100 : vector<64x256xf32> to vector<64x256xbf16>
    %cst_49 = arith.constant dense<0.000000e+00> : vector<64x8xf32>
    %102 = tpu.matmul %101, %13, %cst_49 {dimension_numbers = #tpu.dot_dimension_numbers<[1], [0], [0], [1], [0, 0, 1, 1], [], []>} : vector<64x256xbf16>, vector<256x8xbf16>, vector<64x8xf32> -> vector<64x8xf32>
    %103 = arith.truncf %102 : vector<64x8xf32> to vector<64x8xbf16>
    %c6 = arith.constant 6 : index
    %c0_50 = arith.constant 0 : index
    %c0_51 = arith.constant 0 : index
    %104 = vector.load %arg6[%c6, %c0_50, %c0_51] : memref<9x8x16xbf16, #tpu.memory_space<vmem>>, vector<1x8x16xbf16>
    %105 = vector.shape_cast %104 : vector<1x8x16xbf16> to vector<8x16xbf16>
    %cst_52 = arith.constant dense<0.000000e+00> : vector<64x16xf32>
    %106 = tpu.matmul %103, %105, %cst_52 {dimension_numbers = #tpu.dot_dimension_numbers<[1], [0], [0], [1], [0, 0, 1, 1], [], []>} : vector<64x8xbf16>, vector<8x16xbf16>, vector<64x16xf32> -> vector<64x16xf32>
    %107 = arith.addf %94, %106 : vector<64x16xf32>
    %108 = vector.extract_strided_slice %14 {offsets = [0, 7], sizes = [64, 1], strides = [1, 1]} : vector<64x9xi32> to vector<64x1xi32>
    %109 = vector.broadcast %108 : vector<64x1xi32> to vector<64x256xi32>
    %110 = arith.cmpi eq, %15, %109 : vector<64x256xi32>
    %cst_53 = arith.constant 1.000000e+00 : f32
    %cst_54 = arith.constant 0.000000e+00 : f32
    %111 = vector.broadcast %cst_53 : f32 to vector<64x256xf32>
    %112 = vector.broadcast %cst_54 : f32 to vector<64x256xf32>
    %113 = arith.select %110, %111, %112 : vector<64x256xi1>, vector<64x256xf32>
    %114 = arith.truncf %113 : vector<64x256xf32> to vector<64x256xbf16>
    %cst_55 = arith.constant dense<0.000000e+00> : vector<64x8xf32>
    %115 = tpu.matmul %114, %13, %cst_55 {dimension_numbers = #tpu.dot_dimension_numbers<[1], [0], [0], [1], [0, 0, 1, 1], [], []>} : vector<64x256xbf16>, vector<256x8xbf16>, vector<64x8xf32> -> vector<64x8xf32>
    %116 = arith.truncf %115 : vector<64x8xf32> to vector<64x8xbf16>
    %c7 = arith.constant 7 : index
    %c0_56 = arith.constant 0 : index
    %c0_57 = arith.constant 0 : index
    %117 = vector.load %arg6[%c7, %c0_56, %c0_57] : memref<9x8x16xbf16, #tpu.memory_space<vmem>>, vector<1x8x16xbf16>
    %118 = vector.shape_cast %117 : vector<1x8x16xbf16> to vector<8x16xbf16>
    %cst_58 = arith.constant dense<0.000000e+00> : vector<64x16xf32>
    %119 = tpu.matmul %116, %118, %cst_58 {dimension_numbers = #tpu.dot_dimension_numbers<[1], [0], [0], [1], [0, 0, 1, 1], [], []>} : vector<64x8xbf16>, vector<8x16xbf16>, vector<64x16xf32> -> vector<64x16xf32>
    %120 = arith.addf %107, %119 : vector<64x16xf32>
    %121 = vector.extract_strided_slice %14 {offsets = [0, 8], sizes = [64, 1], strides = [1, 1]} : vector<64x9xi32> to vector<64x1xi32>
    %122 = vector.broadcast %121 : vector<64x1xi32> to vector<64x256xi32>
    %123 = arith.cmpi eq, %15, %122 : vector<64x256xi32>
    %cst_59 = arith.constant 1.000000e+00 : f32
    %cst_60 = arith.constant 0.000000e+00 : f32
    %124 = vector.broadcast %cst_59 : f32 to vector<64x256xf32>
    %125 = vector.broadcast %cst_60 : f32 to vector<64x256xf32>
    %126 = arith.select %123, %124, %125 : vector<64x256xi1>, vector<64x256xf32>
    %127 = arith.truncf %126 : vector<64x256xf32> to vector<64x256xbf16>
    %cst_61 = arith.constant dense<0.000000e+00> : vector<64x8xf32>
    %128 = tpu.matmul %127, %13, %cst_61 {dimension_numbers = #tpu.dot_dimension_numbers<[1], [0], [0], [1], [0, 0, 1, 1], [], []>} : vector<64x256xbf16>, vector<256x8xbf16>, vector<64x8xf32> -> vector<64x8xf32>
    %129 = arith.truncf %128 : vector<64x8xf32> to vector<64x8xbf16>
    %c8 = arith.constant 8 : index
    %c0_62 = arith.constant 0 : index
    %c0_63 = arith.constant 0 : index
    %130 = vector.load %arg6[%c8, %c0_62, %c0_63] : memref<9x8x16xbf16, #tpu.memory_space<vmem>>, vector<1x8x16xbf16>
    %131 = vector.shape_cast %130 : vector<1x8x16xbf16> to vector<8x16xbf16>
    %cst_64 = arith.constant dense<0.000000e+00> : vector<64x16xf32>
    %132 = tpu.matmul %129, %131, %cst_64 {dimension_numbers = #tpu.dot_dimension_numbers<[1], [0], [0], [1], [0, 0, 1, 1], [], []>} : vector<64x8xbf16>, vector<8x16xbf16>, vector<64x16xf32> -> vector<64x16xf32>
    %133 = arith.addf %120, %132 : vector<64x16xf32>
    %c0_65 = arith.constant 0 : index
    %c0_66 = arith.constant 0 : index
    %134 = vector.load %arg7[%c0_65, %c0_66] : memref<1x16xf32, #tpu.memory_space<vmem>>, vector<1x16xf32>
    %135 = vector.broadcast %134 : vector<1x16xf32> to vector<64x16xf32>
    %136 = arith.addf %133, %135 : vector<64x16xf32>
    %137 = arith.negf %136 : vector<64x16xf32>
    %138 = math.exp %137 : vector<64x16xf32>
    %cst_67 = arith.constant 1.000000e+00 : f32
    %139 = vector.broadcast %cst_67 : f32 to vector<64x16xf32>
    %140 = arith.addf %139, %138 : vector<64x16xf32>
    %141 = arith.divf %139, %140 : vector<64x16xf32>
    %142 = arith.mulf %136, %141 : vector<64x16xf32>
    %143 = arith.truncf %142 : vector<64x16xf32> to vector<64x16xbf16>
    %c0_68 = arith.constant 0 : index
    %c0_69 = arith.constant 0 : index
    %144 = vector.load %arg2[%c0_68, %c0_69] : memref<64x9xi32, #tpu.memory_space<vmem>>, vector<64x9xi32>
    %145 = tpu.iota {dimensions = array<i32: 1>} : vector<64x64xi32>
    %cst_70 = arith.constant 0.000000e+00 : f32
    %146 = vector.broadcast %cst_70 : f32 to vector<64x16xf32>
    %147 = vector.extract_strided_slice %144 {offsets = [0, 0], sizes = [64, 1], strides = [1, 1]} : vector<64x9xi32> to vector<64x1xi32>
    %148 = vector.broadcast %147 : vector<64x1xi32> to vector<64x64xi32>
    %149 = arith.cmpi eq, %145, %148 : vector<64x64xi32>
    %cst_71 = arith.constant 1.000000e+00 : f32
    %cst_72 = arith.constant 0.000000e+00 : f32
    %150 = vector.broadcast %cst_71 : f32 to vector<64x64xf32>
    %151 = vector.broadcast %cst_72 : f32 to vector<64x64xf32>
    %152 = arith.select %149, %150, %151 : vector<64x64xi1>, vector<64x64xf32>
    %153 = arith.truncf %152 : vector<64x64xf32> to vector<64x64xbf16>
    %cst_73 = arith.constant dense<0.000000e+00> : vector<64x16xf32>
    %154 = tpu.matmul %153, %143, %cst_73 {dimension_numbers = #tpu.dot_dimension_numbers<[1], [0], [0], [1], [0, 0, 1, 1], [], []>} : vector<64x64xbf16>, vector<64x16xbf16>, vector<64x16xf32> -> vector<64x16xf32>
    %155 = arith.truncf %154 : vector<64x16xf32> to vector<64x16xbf16>
    %c0_74 = arith.constant 0 : index
    %c0_75 = arith.constant 0 : index
    %c0_76 = arith.constant 0 : index
    %156 = vector.load %arg8[%c0_74, %c0_75, %c0_76] : memref<9x16x16xbf16, #tpu.memory_space<vmem>>, vector<1x16x16xbf16>
    %157 = vector.shape_cast %156 : vector<1x16x16xbf16> to vector<16x16xbf16>
    %cst_77 = arith.constant dense<0.000000e+00> : vector<64x16xf32>
    %158 = tpu.matmul %155, %157, %cst_77 {dimension_numbers = #tpu.dot_dimension_numbers<[1], [0], [0], [1], [0, 0, 1, 1], [], []>} : vector<64x16xbf16>, vector<16x16xbf16>, vector<64x16xf32> -> vector<64x16xf32>
    %159 = arith.addf %146, %158 : vector<64x16xf32>
    %160 = vector.extract_strided_slice %144 {offsets = [0, 1], sizes = [64, 1], strides = [1, 1]} : vector<64x9xi32> to vector<64x1xi32>
    %161 = vector.broadcast %160 : vector<64x1xi32> to vector<64x64xi32>
    %162 = arith.cmpi eq, %145, %161 : vector<64x64xi32>
    %cst_78 = arith.constant 1.000000e+00 : f32
    %cst_79 = arith.constant 0.000000e+00 : f32
    %163 = vector.broadcast %cst_78 : f32 to vector<64x64xf32>
    %164 = vector.broadcast %cst_79 : f32 to vector<64x64xf32>
    %165 = arith.select %162, %163, %164 : vector<64x64xi1>, vector<64x64xf32>
    %166 = arith.truncf %165 : vector<64x64xf32> to vector<64x64xbf16>
    %cst_80 = arith.constant dense<0.000000e+00> : vector<64x16xf32>
    %167 = tpu.matmul %166, %143, %cst_80 {dimension_numbers = #tpu.dot_dimension_numbers<[1], [0], [0], [1], [0, 0, 1, 1], [], []>} : vector<64x64xbf16>, vector<64x16xbf16>, vector<64x16xf32> -> vector<64x16xf32>
    %168 = arith.truncf %167 : vector<64x16xf32> to vector<64x16xbf16>
    %c1_81 = arith.constant 1 : index
    %c0_82 = arith.constant 0 : index
    %c0_83 = arith.constant 0 : index
    %169 = vector.load %arg8[%c1_81, %c0_82, %c0_83] : memref<9x16x16xbf16, #tpu.memory_space<vmem>>, vector<1x16x16xbf16>
    %170 = vector.shape_cast %169 : vector<1x16x16xbf16> to vector<16x16xbf16>
    %cst_84 = arith.constant dense<0.000000e+00> : vector<64x16xf32>
    %171 = tpu.matmul %168, %170, %cst_84 {dimension_numbers = #tpu.dot_dimension_numbers<[1], [0], [0], [1], [0, 0, 1, 1], [], []>} : vector<64x16xbf16>, vector<16x16xbf16>, vector<64x16xf32> -> vector<64x16xf32>
    %172 = arith.addf %159, %171 : vector<64x16xf32>
    %173 = vector.extract_strided_slice %144 {offsets = [0, 2], sizes = [64, 1], strides = [1, 1]} : vector<64x9xi32> to vector<64x1xi32>
    %174 = vector.broadcast %173 : vector<64x1xi32> to vector<64x64xi32>
    %175 = arith.cmpi eq, %145, %174 : vector<64x64xi32>
    %cst_85 = arith.constant 1.000000e+00 : f32
    %cst_86 = arith.constant 0.000000e+00 : f32
    %176 = vector.broadcast %cst_85 : f32 to vector<64x64xf32>
    %177 = vector.broadcast %cst_86 : f32 to vector<64x64xf32>
    %178 = arith.select %175, %176, %177 : vector<64x64xi1>, vector<64x64xf32>
    %179 = arith.truncf %178 : vector<64x64xf32> to vector<64x64xbf16>
    %cst_87 = arith.constant dense<0.000000e+00> : vector<64x16xf32>
    %180 = tpu.matmul %179, %143, %cst_87 {dimension_numbers = #tpu.dot_dimension_numbers<[1], [0], [0], [1], [0, 0, 1, 1], [], []>} : vector<64x64xbf16>, vector<64x16xbf16>, vector<64x16xf32> -> vector<64x16xf32>
    %181 = arith.truncf %180 : vector<64x16xf32> to vector<64x16xbf16>
    %c2_88 = arith.constant 2 : index
    %c0_89 = arith.constant 0 : index
    %c0_90 = arith.constant 0 : index
    %182 = vector.load %arg8[%c2_88, %c0_89, %c0_90] : memref<9x16x16xbf16, #tpu.memory_space<vmem>>, vector<1x16x16xbf16>
    %183 = vector.shape_cast %182 : vector<1x16x16xbf16> to vector<16x16xbf16>
    %cst_91 = arith.constant dense<0.000000e+00> : vector<64x16xf32>
    %184 = tpu.matmul %181, %183, %cst_91 {dimension_numbers = #tpu.dot_dimension_numbers<[1], [0], [0], [1], [0, 0, 1, 1], [], []>} : vector<64x16xbf16>, vector<16x16xbf16>, vector<64x16xf32> -> vector<64x16xf32>
    %185 = arith.addf %172, %184 : vector<64x16xf32>
    %186 = vector.extract_strided_slice %144 {offsets = [0, 3], sizes = [64, 1], strides = [1, 1]} : vector<64x9xi32> to vector<64x1xi32>
    %187 = vector.broadcast %186 : vector<64x1xi32> to vector<64x64xi32>
    %188 = arith.cmpi eq, %145, %187 : vector<64x64xi32>
    %cst_92 = arith.constant 1.000000e+00 : f32
    %cst_93 = arith.constant 0.000000e+00 : f32
    %189 = vector.broadcast %cst_92 : f32 to vector<64x64xf32>
    %190 = vector.broadcast %cst_93 : f32 to vector<64x64xf32>
    %191 = arith.select %188, %189, %190 : vector<64x64xi1>, vector<64x64xf32>
    %192 = arith.truncf %191 : vector<64x64xf32> to vector<64x64xbf16>
    %cst_94 = arith.constant dense<0.000000e+00> : vector<64x16xf32>
    %193 = tpu.matmul %192, %143, %cst_94 {dimension_numbers = #tpu.dot_dimension_numbers<[1], [0], [0], [1], [0, 0, 1, 1], [], []>} : vector<64x64xbf16>, vector<64x16xbf16>, vector<64x16xf32> -> vector<64x16xf32>
    %194 = arith.truncf %193 : vector<64x16xf32> to vector<64x16xbf16>
    %c3_95 = arith.constant 3 : index
    %c0_96 = arith.constant 0 : index
    %c0_97 = arith.constant 0 : index
    %195 = vector.load %arg8[%c3_95, %c0_96, %c0_97] : memref<9x16x16xbf16, #tpu.memory_space<vmem>>, vector<1x16x16xbf16>
    %196 = vector.shape_cast %195 : vector<1x16x16xbf16> to vector<16x16xbf16>
    %cst_98 = arith.constant dense<0.000000e+00> : vector<64x16xf32>
    %197 = tpu.matmul %194, %196, %cst_98 {dimension_numbers = #tpu.dot_dimension_numbers<[1], [0], [0], [1], [0, 0, 1, 1], [], []>} : vector<64x16xbf16>, vector<16x16xbf16>, vector<64x16xf32> -> vector<64x16xf32>
    %198 = arith.addf %185, %197 : vector<64x16xf32>
    %199 = vector.extract_strided_slice %144 {offsets = [0, 4], sizes = [64, 1], strides = [1, 1]} : vector<64x9xi32> to vector<64x1xi32>
    %200 = vector.broadcast %199 : vector<64x1xi32> to vector<64x64xi32>
    %201 = arith.cmpi eq, %145, %200 : vector<64x64xi32>
    %cst_99 = arith.constant 1.000000e+00 : f32
    %cst_100 = arith.constant 0.000000e+00 : f32
    %202 = vector.broadcast %cst_99 : f32 to vector<64x64xf32>
    %203 = vector.broadcast %cst_100 : f32 to vector<64x64xf32>
    %204 = arith.select %201, %202, %203 : vector<64x64xi1>, vector<64x64xf32>
    %205 = arith.truncf %204 : vector<64x64xf32> to vector<64x64xbf16>
    %cst_101 = arith.constant dense<0.000000e+00> : vector<64x16xf32>
    %206 = tpu.matmul %205, %143, %cst_101 {dimension_numbers = #tpu.dot_dimension_numbers<[1], [0], [0], [1], [0, 0, 1, 1], [], []>} : vector<64x64xbf16>, vector<64x16xbf16>, vector<64x16xf32> -> vector<64x16xf32>
    %207 = arith.truncf %206 : vector<64x16xf32> to vector<64x16xbf16>
    %c4_102 = arith.constant 4 : index
    %c0_103 = arith.constant 0 : index
    %c0_104 = arith.constant 0 : index
    %208 = vector.load %arg8[%c4_102, %c0_103, %c0_104] : memref<9x16x16xbf16, #tpu.memory_space<vmem>>, vector<1x16x16xbf16>
    %209 = vector.shape_cast %208 : vector<1x16x16xbf16> to vector<16x16xbf16>
    %cst_105 = arith.constant dense<0.000000e+00> : vector<64x16xf32>
    %210 = tpu.matmul %207, %209, %cst_105 {dimension_numbers = #tpu.dot_dimension_numbers<[1], [0], [0], [1], [0, 0, 1, 1], [], []>} : vector<64x16xbf16>, vector<16x16xbf16>, vector<64x16xf32> -> vector<64x16xf32>
    %211 = arith.addf %198, %210 : vector<64x16xf32>
    %212 = vector.extract_strided_slice %144 {offsets = [0, 5], sizes = [64, 1], strides = [1, 1]} : vector<64x9xi32> to vector<64x1xi32>
    %213 = vector.broadcast %212 : vector<64x1xi32> to vector<64x64xi32>
    %214 = arith.cmpi eq, %145, %213 : vector<64x64xi32>
    %cst_106 = arith.constant 1.000000e+00 : f32
    %cst_107 = arith.constant 0.000000e+00 : f32
    %215 = vector.broadcast %cst_106 : f32 to vector<64x64xf32>
    %216 = vector.broadcast %cst_107 : f32 to vector<64x64xf32>
    %217 = arith.select %214, %215, %216 : vector<64x64xi1>, vector<64x64xf32>
    %218 = arith.truncf %217 : vector<64x64xf32> to vector<64x64xbf16>
    %cst_108 = arith.constant dense<0.000000e+00> : vector<64x16xf32>
    %219 = tpu.matmul %218, %143, %cst_108 {dimension_numbers = #tpu.dot_dimension_numbers<[1], [0], [0], [1], [0, 0, 1, 1], [], []>} : vector<64x64xbf16>, vector<64x16xbf16>, vector<64x16xf32> -> vector<64x16xf32>
    %220 = arith.truncf %219 : vector<64x16xf32> to vector<64x16xbf16>
    %c5_109 = arith.constant 5 : index
    %c0_110 = arith.constant 0 : index
    %c0_111 = arith.constant 0 : index
    %221 = vector.load %arg8[%c5_109, %c0_110, %c0_111] : memref<9x16x16xbf16, #tpu.memory_space<vmem>>, vector<1x16x16xbf16>
    %222 = vector.shape_cast %221 : vector<1x16x16xbf16> to vector<16x16xbf16>
    %cst_112 = arith.constant dense<0.000000e+00> : vector<64x16xf32>
    %223 = tpu.matmul %220, %222, %cst_112 {dimension_numbers = #tpu.dot_dimension_numbers<[1], [0], [0], [1], [0, 0, 1, 1], [], []>} : vector<64x16xbf16>, vector<16x16xbf16>, vector<64x16xf32> -> vector<64x16xf32>
    %224 = arith.addf %211, %223 : vector<64x16xf32>
    %225 = vector.extract_strided_slice %144 {offsets = [0, 6], sizes = [64, 1], strides = [1, 1]} : vector<64x9xi32> to vector<64x1xi32>
    %226 = vector.broadcast %225 : vector<64x1xi32> to vector<64x64xi32>
    %227 = arith.cmpi eq, %145, %226 : vector<64x64xi32>
    %cst_113 = arith.constant 1.000000e+00 : f32
    %cst_114 = arith.constant 0.000000e+00 : f32
    %228 = vector.broadcast %cst_113 : f32 to vector<64x64xf32>
    %229 = vector.broadcast %cst_114 : f32 to vector<64x64xf32>
    %230 = arith.select %227, %228, %229 : vector<64x64xi1>, vector<64x64xf32>
    %231 = arith.truncf %230 : vector<64x64xf32> to vector<64x64xbf16>
    %cst_115 = arith.constant dense<0.000000e+00> : vector<64x16xf32>
    %232 = tpu.matmul %231, %143, %cst_115 {dimension_numbers = #tpu.dot_dimension_numbers<[1], [0], [0], [1], [0, 0, 1, 1], [], []>} : vector<64x64xbf16>, vector<64x16xbf16>, vector<64x16xf32> -> vector<64x16xf32>
    %233 = arith.truncf %232 : vector<64x16xf32> to vector<64x16xbf16>
    %c6_116 = arith.constant 6 : index
    %c0_117 = arith.constant 0 : index
    %c0_118 = arith.constant 0 : index
    %234 = vector.load %arg8[%c6_116, %c0_117, %c0_118] : memref<9x16x16xbf16, #tpu.memory_space<vmem>>, vector<1x16x16xbf16>
    %235 = vector.shape_cast %234 : vector<1x16x16xbf16> to vector<16x16xbf16>
    %cst_119 = arith.constant dense<0.000000e+00> : vector<64x16xf32>
    %236 = tpu.matmul %233, %235, %cst_119 {dimension_numbers = #tpu.dot_dimension_numbers<[1], [0], [0], [1], [0, 0, 1, 1], [], []>} : vector<64x16xbf16>, vector<16x16xbf16>, vector<64x16xf32> -> vector<64x16xf32>
    %237 = arith.addf %224, %236 : vector<64x16xf32>
    %238 = vector.extract_strided_slice %144 {offsets = [0, 7], sizes = [64, 1], strides = [1, 1]} : vector<64x9xi32> to vector<64x1xi32>
    %239 = vector.broadcast %238 : vector<64x1xi32> to vector<64x64xi32>
    %240 = arith.cmpi eq, %145, %239 : vector<64x64xi32>
    %cst_120 = arith.constant 1.000000e+00 : f32
    %cst_121 = arith.constant 0.000000e+00 : f32
    %241 = vector.broadcast %cst_120 : f32 to vector<64x64xf32>
    %242 = vector.broadcast %cst_121 : f32 to vector<64x64xf32>
    %243 = arith.select %240, %241, %242 : vector<64x64xi1>, vector<64x64xf32>
    %244 = arith.truncf %243 : vector<64x64xf32> to vector<64x64xbf16>
    %cst_122 = arith.constant dense<0.000000e+00> : vector<64x16xf32>
    %245 = tpu.matmul %244, %143, %cst_122 {dimension_numbers = #tpu.dot_dimension_numbers<[1], [0], [0], [1], [0, 0, 1, 1], [], []>} : vector<64x64xbf16>, vector<64x16xbf16>, vector<64x16xf32> -> vector<64x16xf32>
    %246 = arith.truncf %245 : vector<64x16xf32> to vector<64x16xbf16>
    %c7_123 = arith.constant 7 : index
    %c0_124 = arith.constant 0 : index
    %c0_125 = arith.constant 0 : index
    %247 = vector.load %arg8[%c7_123, %c0_124, %c0_125] : memref<9x16x16xbf16, #tpu.memory_space<vmem>>, vector<1x16x16xbf16>
    %248 = vector.shape_cast %247 : vector<1x16x16xbf16> to vector<16x16xbf16>
    %cst_126 = arith.constant dense<0.000000e+00> : vector<64x16xf32>
    %249 = tpu.matmul %246, %248, %cst_126 {dimension_numbers = #tpu.dot_dimension_numbers<[1], [0], [0], [1], [0, 0, 1, 1], [], []>} : vector<64x16xbf16>, vector<16x16xbf16>, vector<64x16xf32> -> vector<64x16xf32>
    %250 = arith.addf %237, %249 : vector<64x16xf32>
    %251 = vector.extract_strided_slice %144 {offsets = [0, 8], sizes = [64, 1], strides = [1, 1]} : vector<64x9xi32> to vector<64x1xi32>
    %252 = vector.broadcast %251 : vector<64x1xi32> to vector<64x64xi32>
    %253 = arith.cmpi eq, %145, %252 : vector<64x64xi32>
    %cst_127 = arith.constant 1.000000e+00 : f32
    %cst_128 = arith.constant 0.000000e+00 : f32
    %254 = vector.broadcast %cst_127 : f32 to vector<64x64xf32>
    %255 = vector.broadcast %cst_128 : f32 to vector<64x64xf32>
    %256 = arith.select %253, %254, %255 : vector<64x64xi1>, vector<64x64xf32>
    %257 = arith.truncf %256 : vector<64x64xf32> to vector<64x64xbf16>
    %cst_129 = arith.constant dense<0.000000e+00> : vector<64x16xf32>
    %258 = tpu.matmul %257, %143, %cst_129 {dimension_numbers = #tpu.dot_dimension_numbers<[1], [0], [0], [1], [0, 0, 1, 1], [], []>} : vector<64x64xbf16>, vector<64x16xbf16>, vector<64x16xf32> -> vector<64x16xf32>
    %259 = arith.truncf %258 : vector<64x16xf32> to vector<64x16xbf16>
    %c8_130 = arith.constant 8 : index
    %c0_131 = arith.constant 0 : index
    %c0_132 = arith.constant 0 : index
    %260 = vector.load %arg8[%c8_130, %c0_131, %c0_132] : memref<9x16x16xbf16, #tpu.memory_space<vmem>>, vector<1x16x16xbf16>
    %261 = vector.shape_cast %260 : vector<1x16x16xbf16> to vector<16x16xbf16>
    %cst_133 = arith.constant dense<0.000000e+00> : vector<64x16xf32>
    %262 = tpu.matmul %259, %261, %cst_133 {dimension_numbers = #tpu.dot_dimension_numbers<[1], [0], [0], [1], [0, 0, 1, 1], [], []>} : vector<64x16xbf16>, vector<16x16xbf16>, vector<64x16xf32> -> vector<64x16xf32>
    %263 = arith.addf %250, %262 : vector<64x16xf32>
    %c0_134 = arith.constant 0 : index
    %c0_135 = arith.constant 0 : index
    %264 = vector.load %arg9[%c0_134, %c0_135] : memref<1x16xf32, #tpu.memory_space<vmem>>, vector<1x16xf32>
    %265 = vector.broadcast %264 : vector<1x16xf32> to vector<64x16xf32>
    %266 = arith.addf %263, %265 : vector<64x16xf32>
    %267 = arith.negf %266 : vector<64x16xf32>
    %268 = math.exp %267 : vector<64x16xf32>
    %cst_136 = arith.constant 1.000000e+00 : f32
    %269 = vector.broadcast %cst_136 : f32 to vector<64x16xf32>
    %270 = arith.addf %269, %268 : vector<64x16xf32>
    %271 = arith.divf %269, %270 : vector<64x16xf32>
    %272 = arith.mulf %266, %271 : vector<64x16xf32>
    %273 = arith.addf %272, %142 : vector<64x16xf32>
    %274 = arith.truncf %273 : vector<64x16xf32> to vector<64x16xbf16>
    %c0_137 = arith.constant 0 : index
    %c0_138 = arith.constant 0 : index
    %275 = vector.load %arg10[%c0_137, %c0_138] : memref<16x128xbf16, #tpu.memory_space<vmem>>, vector<16x128xbf16>
    %cst_139 = arith.constant dense<0.000000e+00> : vector<64x128xf32>
    %276 = tpu.matmul %274, %275, %cst_139 {dimension_numbers = #tpu.dot_dimension_numbers<[1], [0], [0], [1], [0, 0, 1, 1], [], []>} : vector<64x16xbf16>, vector<16x128xbf16>, vector<64x128xf32> -> vector<64x128xf32>
    %c0_140 = arith.constant 0 : index
    %c0_141 = arith.constant 0 : index
    %277 = vector.load %arg11[%c0_140, %c0_141] : memref<1x128xf32, #tpu.memory_space<vmem>>, vector<1x128xf32>
    %278 = vector.broadcast %277 : vector<1x128xf32> to vector<64x128xf32>
    %279 = arith.addf %276, %278 : vector<64x128xf32>
    %280 = tpu.iota {dimensions = array<i32: 1>} : vector<64x128xi32>
    %c4_i32 = arith.constant 4 : i32
    %281 = vector.broadcast %c4_i32 : i32 to vector<64x128xi32>
    %282 = arith.cmpi slt, %280, %281 : vector<64x128xi32>
    %283 = arith.negf %279 : vector<64x128xf32>
    %284 = math.exp %283 : vector<64x128xf32>
    %cst_142 = arith.constant 1.000000e+00 : f32
    %285 = vector.broadcast %cst_142 : f32 to vector<64x128xf32>
    %286 = arith.addf %285, %284 : vector<64x128xf32>
    %287 = arith.divf %285, %286 : vector<64x128xf32>
    %288 = arith.select %282, %279, %287 : vector<64x128xi1>, vector<64x128xf32>
    %c0_143 = arith.constant 0 : index
    %c0_144 = arith.constant 0 : index
    %c0_145 = arith.constant 0 : index
    %289 = vector.load %arg12[%c0_143, %c0_144, %c0_145] : memref<1x64x128xf32, #tpu.memory_space<vmem>>, vector<1x64x128xf32>
    %290 = vector.shape_cast %289 : vector<1x64x128xf32> to vector<64x128xf32>
    %291 = vector.shape_cast %288 : vector<64x128xf32> to vector<1x64x128xf32>
    tpu.vector_store %arg12[%c0_143, %c0_144, %c0_145], %291 {strides = array<i32>} : memref<1x64x128xf32, #tpu.memory_space<vmem>>, vector<1x64x128xf32>,
    return
  }
  func.func @transform_0(%arg0: i32) -> (i32, i32) {
    %c0_i32 = arith.constant 0 : i32
    %c0_i32_0 = arith.constant 0 : i32
    %c0_i32_1 = arith.constant 0 : i32
    return %c0_i32, %c0_i32_0 : i32, i32
  }
  func.func @transform_1(%arg0: i32) -> (i32, i32) {
    %c0_i32 = arith.constant 0 : i32
    %c0_i32_0 = arith.constant 0 : i32
    %c0_i32_1 = arith.constant 0 : i32
    return %c0_i32, %c0_i32_0 : i32, i32
  }
  func.func @transform_2(%arg0: i32) -> (i32, i32, i32) {
    %c0_i32 = arith.constant 0 : i32
    %c0_i32_0 = arith.constant 0 : i32
    %c0_i32_1 = arith.constant 0 : i32
    return %arg0, %c0_i32, %c0_i32_0 : i32, i32, i32
  }
  func.func @transform_3(%arg0: i32) -> (i32, i32) {
    %c0_i32 = arith.constant 0 : i32
    %c0_i32_0 = arith.constant 0 : i32
    %c0_i32_1 = arith.constant 0 : i32
    return %c0_i32, %c0_i32_0 : i32, i32
  }
  func.func @transform_4(%arg0: i32) -> (i32, i32) {
    %c0_i32 = arith.constant 0 : i32
    %c0_i32_0 = arith.constant 0 : i32
    %c0_i32_1 = arith.constant 0 : i32
    return %c0_i32, %c0_i32_0 : i32, i32
  }
  func.func @transform_5(%arg0: i32) -> (i32, i32, i32) {
    %c0_i32 = arith.constant 0 : i32
    %c0_i32_0 = arith.constant 0 : i32
    %c0_i32_1 = arith.constant 0 : i32
    %c0_i32_2 = arith.constant 0 : i32
    return %c0_i32, %c0_i32_0, %c0_i32_1 : i32, i32, i32
  }
  func.func @transform_6(%arg0: i32) -> (i32, i32) {
    %c0_i32 = arith.constant 0 : i32
    %c0_i32_0 = arith.constant 0 : i32
    %c0_i32_1 = arith.constant 0 : i32
    return %c0_i32, %c0_i32_0 : i32, i32
  }
  func.func @transform_7(%arg0: i32) -> (i32, i32, i32) {
    %c0_i32 = arith.constant 0 : i32
    %c0_i32_0 = arith.constant 0 : i32
    %c0_i32_1 = arith.constant 0 : i32
    %c0_i32_2 = arith.constant 0 : i32
    return %c0_i32, %c0_i32_0, %c0_i32_1 : i32, i32, i32
  }
  func.func @transform_8(%arg0: i32) -> (i32, i32) {
    %c0_i32 = arith.constant 0 : i32
    %c0_i32_0 = arith.constant 0 : i32
    %c0_i32_1 = arith.constant 0 : i32
    return %c0_i32, %c0_i32_0 : i32, i32
  }
  func.func @transform_9(%arg0: i32) -> (i32, i32) {
    %c0_i32 = arith.constant 0 : i32
    %c0_i32_0 = arith.constant 0 : i32
    %c0_i32_1 = arith.constant 0 : i32
    return %c0_i32, %c0_i32_0 : i32, i32
  }
  func.func @transform_10(%arg0: i32) -> (i32, i32) {
    %c0_i32 = arith.constant 0 : i32
    %c0_i32_0 = arith.constant 0 : i32
    %c0_i32_1 = arith.constant 0 : i32
    return %c0_i32, %c0_i32_0 : i32, i32
  }
  func.func @transform_11(%arg0: i32) -> (i32, i32, i32) {
    %c0_i32 = arith.constant 0 : i32
    %c0_i32_0 = arith.constant 0 : i32
    %c0_i32_1 = arith.constant 0 : i32
    return %arg0, %c0_i32, %c0_i32_0 : i32, i32, i32
  }
}

</mosaic_0001>

<bundles_post_ra>
// kernel: yolo_forward.1
= control target key start
LH: loop header
LB: loop body
LE: loop exit
PB: predicated region body
PF: predicated region fallthrough
CT: control target
= control target key end

     0   :  { %s7041_s17 = smov 0   ;;  %s8732_s0 = inlined_call_operand.vmem [shape: s32[64,9], index: 0, kind: input, shape index: {}]   ;;  %s8733_s1 = inlined_call_operand.vmem [shape: s32[64,9], index: 1, kind: input, shape index: {}]   ;;  %s8734_s2 = inlined_call_operand.vmem [shape: bf16[2,256,27], index: 2, kind: input, shape index: {}]   ;;  %s8735_s3 = inlined_call_operand.vmem [shape: bf16[27,8], index: 3, kind: input, shape index: {}]   ;;  %s8736_s4 = inlined_call_operand.vmem [shape: f32[1,8], index: 4, kind: input, shape index: {}]   ;;  %s8737_s5 = inlined_call_operand.vmem [shape: bf16[9,8,16], index: 5, kind: input, shape index: {}]   ;;  %s8738_s6 = inlined_call_operand.vmem [shape: f32[1,16], index: 6, kind: input, shape index: {}]   ;;  %s8739_s7 = inlined_call_operand.vmem [shape: bf16[9,16,16], index: 7, kind: input, shape index: {}]   ;;  %s8740_s8 = inlined_call_operand.vmem [shape: f32[1,16], index: 8, kind: input, shape index: {}]   ;;  %s8741_s9 = inlined_call_operand.vmem [shape: bf16[16,128], index: 9, kind: input, shape index: {}]   ;;  %s8742_s10 = inlined_call_operand.vmem [shape: f32[1,128], index: 10, kind: input, shape index: {}]   ;;  %s8743_s11 = inlined_call_operand.vmem [shape: f32[2,64,128], index: 11, kind: output, shape index: {}]  }
   0x1 LB: > { %s5316_s18 = sadd.s32 4294967295, %s6967_s17   ;;  %p5320_p0 = scmp.ge.s32.totalorder %s6967_s17, 1  ;;  %s6967_s17 = sphi %s7041_s17, %s21_s17  }
   0x2   : > { %p337_p1 = scmp.lt.s32.totalorder %s6967_s17, 3 }
   0x4   : > { %p338_p2 = pnand %p5320_p0, %p337_p1 }
   0x5   : > { %p377_p3 = scmp.lt.s32.totalorder (!%p338_p2), %s5316_s18, 1 }
   0x6   : > { %341 = sbr.rel (%p338_p2) target bundleno = 2717 (0xa9d), region = 64 }
   0xb   : > { %v6693_v0 = vld [vmem:[%s8735_s3 + $0x8] sm:$0x3f]   ;;  %vm571_vm0 = vcmask 1044480   ;;  %vm572_vm1 = vcmask 1045504   ;;  %v6969_v1 = vmov 65535   ;;  %v8748_v4 = vmov 0  }
   0xc   : > { %v573_v2 = vsel %vm571_vm0, 4294967295, %v6969_v1  ;;  %6658 = vset.pattern.permute.xlu1 %v8748_v4  ;;  %6657 = vset.pattern.permute.xlu0 %v8748_v4  ;;  %v7057_v5 = vld [vmem:[%s8732_s0 + $0x10] sm:$0xff]  ;;  %v7062_v6 = vld [vmem:[%s8732_s0] sm:$0xff]  ;;  %s8760_s18 = smov (!%p377_p3, %s5316_s18), 1  ;;  %vm522_vm2 = vcmask 220160   ;;  %v7074_v9 = vld [vmem:[%s8732_s0 + $0x18] sm:$0xff]  ;;  %v987_v34 = vlaneseq }
   0xd   : > { %v574_v3 = vsel %vm572_vm1, %v573_v2, 0  ;;  %v6694_v8 = vld [vmem:[%s8735_s3] sm:$0xff]   ;;  %997 = vperm.xlu1 %6658, %v7057_v5   ;;  %991 = vperm.xlu0 %6657, %v7062_v6   ;;  %s5711_s29 = sshll.u32 %s8760_s18, 7  ;;  %v7080_v10 = vld [vmem:[%s8732_s0 + $0x8] sm:$0xff]  ;;  %v7108_v16 = vld [vmem:[%s8732_s0 + $0x38] sm:$0xff]  ;;  %v8750_v31 = vmov 1  }
   0xe   : > { %v576_v7 = vand.u32 %v6693_v0, %v574_v3  ;;  %s7085_s15 = scalar_lea.vmem %s8734_s2, %s5711_s29  ;;  %v7090_v11 = vld [vmem:[%s8732_s0 + $0x28] sm:$0xff]  ;;  %v7098_v13 = vld [vmem:[%s8732_s0 + $0x20] sm:$0xff]  ;;  %v985_v17 = vld [vmem:[%s8732_s0 + $0x30] sm:$0xff]  ;;  %v8746_v32 = vmov 2   ;;  %v8744_v33 = vmov 3   ;;  %v7169_v35 = vand.u32 127, %v987_v34 }
   0xf   : > { %v6695_v12 = vld [vmem:[%s7085_s15] sm:$0xff]   ;;  %v6696_v14 = vld [vmem:[%s7085_s15 + $0x8] sm:$0xff]   ;;  %v6697_v15 = vld [vmem:[%s7085_s15 + $0x10] sm:$0xff]   ;;  %v6974_v41 = vmov 1.0|1.0   ;;  %s5712_s16 = sshll.u32 %s8760_s18, 6 }
  0x10   : > { %6258 = vmatprep.subr.bf16.mxu0 %v576_v7  ;;  %6262 = vmatprep.mubr.msk.bf16.mxu0 %vm522_vm2, %v6695_v12  ;;  %v6698_v18 = vld [vmem:[%s7085_s15 + $0x18] sm:$0xff]   ;;  %v6699_v19 = vld [vmem:[%s7085_s15 + $0x20] sm:$0xff]   ;;  %v6700_v20 = vld [vmem:[%s7085_s15 + $0x28] sm:$0xff]   ;;  %v7174_v37 = vadd.s32 128, %v7169_v35  ;;  %s386_s21 = scalar_lea.vmem %s8743_s11, %s5712_s16 }
  0x11   : > { %6259 = vmatpush3.bf16.msra.mxu0 %v576_v7  ;;  %1000 = vperm.xlu1 %6658, %v7074_v9   ;;  %v6701_v21 = vld [vmem:[%s7085_s15 + $0x30] sm:$0xff]   ;;  %v6702_v22 = vld [vmem:[%s7085_s15 + $0x38] sm:$0xff]   ;;  %v6703_v23 = vld [vmem:[%s7085_s15 + $0x40] sm:$0xff]  }
  0x12   : > { %6260 = vmatprep.subr.bf16.mxu0 %v6694_v8  ;;  %994 = vperm.xlu0 %6657, %v7080_v10   ;;  %v6704_v24 = vld [vmem:[%s7085_s15 + $0x48] sm:$0xff]   ;;  %v6705_v25 = vld [vmem:[%s7085_s15 + $0x50] sm:$0xff]   ;;  %v6706_v26 = vld [vmem:[%s7085_s15 + $0x58] sm:$0xff]  }
  0x13   : > { %v6707_v27 = vld [vmem:[%s7085_s15 + $0x60] sm:$0xff]   ;;  %v6708_v28 = vld [vmem:[%s7085_s15 + $0x68] sm:$0xff]   ;;  %v6709_v29 = vld [vmem:[%s7085_s15 + $0x70] sm:$0xff]  }
  0x14   : > { %v6710_v30 = vld [vmem:[%s7085_s15 + $0x78] sm:$0xff]   ;;  %v7181_v39 = vld [vmem:[%s8736_s4] ss:$0 sm:$0xff] }
  0x15   : > { %6261 = vmatpush3.bf16.msra.mxu0 %v6694_v8  ;;  %1006 = vperm.xlu1 %6658, %v7090_v11  }
  0x16   : > { %1003 = vperm.xlu0 %6657, %v7098_v13  }
  0x18   : > { %6263 = vmatmul.mubr.msk.bf16.vlgmr.msra.gmra.mxu0 %vm522_vm2, %v6696_v14 }
  0x19   : > { %6266 = vmatprep.mubr.msk.bf16.mxu0 %vm522_vm2, %v6697_v15  ;;  %1012 = vperm.xlu1 %6658, %v7108_v16  }
  0x1a   : > { %1009 = vperm.xlu0 %6657, %v985_v17  }
  0x1d   : > { %6660 = vset.pattern.permute.xlu1 %v8750_v31 }
  0x1e   : > { %6659 = vset.pattern.permute.xlu0 %v8750_v31  ;;  %1128 = vperm.xlu1 %6660, %v7080_v10  }
  0x1f   : > { %1125 = vperm.xlu0 %6659, %v7062_v6  }
  0x20   : > { %6267 = vmatmul.mubr.msk.bf16.gmra.mxu0 %vm522_vm2, %v6698_v18 }
  0x21   : > { %6270 = vmatprep.mubr.msk.bf16.mxu0 %vm522_vm2, %v6699_v19 }
  0x22   : > { %1131 = vperm.xlu1 %6660, %v7057_v5  }
  0x23   : > { %1134 = vperm.xlu0 %6659, %v7074_v9  }
  0x26   : > { %1137 = vperm.xlu1 %6660, %v7098_v13  }
  0x27   : > { %1140 = vperm.xlu0 %6659, %v7090_v11  }
  0x28   : > { %6271 = vmatmul.mubr.msk.bf16.gmra.mxu0 %vm522_vm2, %v6700_v20 }
  0x29   : > { %6274 = vmatprep.mubr.msk.bf16.mxu0 %vm522_vm2, %v6701_v21 }
  0x2a   : > { %1143 = vperm.xlu1 %6660, %v985_v17  }
  0x2b   : > { %1146 = vperm.xlu0 %6659, %v7108_v16  }
  0x2e   : > { %6661 = vset.pattern.permute.xlu1 %v8746_v32 }
  0x2f   : > { %6662 = vset.pattern.permute.xlu0 %v8746_v32  ;;  %1422 = vperm.xlu1 %6661, %v7062_v6  }
  0x30   : > { %6275 = vmatmul.mubr.msk.bf16.gmra.mxu0 %vm522_vm2, %v6702_v22  ;;  %1425 = vperm.xlu0 %6662, %v7080_v10  }
  0x31   : > { %6278 = vmatprep.mubr.msk.bf16.mxu0 %vm522_vm2, %v6703_v23 }
  0x33   : > { %1428 = vperm.xlu1 %6661, %v7057_v5  }
  0x34   : > { %1434 = vperm.xlu0 %6662, %v7098_v13  }
  0x37   : > { %1431 = vperm.xlu1 %6661, %v7074_v9  }
  0x38   : > { %6279 = vmatmul.mubr.msk.bf16.gmra.mxu0 %vm522_vm2, %v6704_v24  ;;  %1440 = vperm.xlu0 %6662, %v985_v17  }
  0x39   : > { %6282 = vmatprep.mubr.msk.bf16.mxu0 %vm522_vm2, %v6705_v25 }
  0x3b   : > { %1437 = vperm.xlu1 %6661, %v7090_v11  }
  0x3c   : > { %6663 = vset.pattern.permute.xlu0 %v8744_v33 }
  0x3d   : > { %1645 = vperm.xlu0 %6663, %v7062_v6  }
  0x3f   : > { %1443 = vperm.xlu1 %6661, %v7108_v16  }
  0x40   : > { %6283 = vmatmul.mubr.msk.bf16.gmra.mxu0 %vm522_vm2, %v6706_v26 }
  0x41   : > { %6286 = vmatprep.mubr.msk.bf16.mxu0 %vm522_vm2, %v6707_v27  ;;  %1654 = vperm.xlu0 %6663, %v7074_v9  }
  0x43   : > { %6664 = vset.pattern.permute.xlu1 %v8744_v33 }
  0x44   : > { %1648 = vperm.xlu1 %6664, %v7080_v10  }
  0x45   : > { %1660 = vperm.xlu0 %6663, %v7090_v11  }
  0x48   : > { %6287 = vmatmul.mubr.msk.bf16.gmra.mxu0 %vm522_vm2, %v6708_v28  ;;  %1651 = vperm.xlu1 %6664, %v7057_v5  }
  0x49   : > { %6290 = vmatprep.mubr.msk.bf16.mxu0 %vm522_vm2, %v6709_v29  ;;  %1666 = vperm.xlu0 %6663, %v7108_v16  }
  0x4c   : > { %1657 = vperm.xlu1 %6664, %v7098_v13  }
  0x50   : > { %6291 = vmatmul.mubr.msk.bf16.gmra.mxu0 %vm522_vm2, %v6710_v30  ;;  %1663 = vperm.xlu1 %6664, %v985_v17  }
  0x88   : > { %v7171_v36 = vpop.permute.xlu0 %991 }
  0x89   : > { %vm1015_vm3 = vcmp.eq.s32.totalorder %v7174_v37, %v7171_v36  ;;  %vm1014_vm8 = vcmp.eq.s32.totalorder %v7169_v35, %v7171_v36 }
  0x8d   : > { %v7176_v38 = vpop.permute.xlu0 %994 }
  0x8e   : > { %vm1017_vm4 = vcmp.eq.s32.totalorder %v7174_v37, %v7176_v38  ;;  %vm1016_vm9 = vcmp.eq.s32.totalorder %v7169_v35, %v7176_v38 }
  0x8f   : > { %vm5392_vm5 = vmpackc.low %vm1017_vm4, %vm1015_vm3 }
  0x90   : > { %5393 = vmatprep.mubr.msk.bf16.mxu1 %vm5392_vm5, %v6974_v41  ;;  %vm5394_vm11 = vmpackc.low %vm1016_vm9, %vm1014_vm8 }
  0x91   : > { %v1004_v38 = vpop.permute.xlu0 %1003 }
  0x92   : > { %vm1023_vm15 = vcmp.eq.s32.totalorder %v7174_v37, %v1004_v38  ;;  %vm1022_vm3 = vcmp.eq.s32.totalorder %v7169_v35, %v1004_v38 }
  0xd8   : > { %v6264_v40 = vpop.f32.mrf.mxu0 }
  0xd9   : > { %v621_v42 = vadd.f32 %v6264_v40, %v7181_v39 }
  0xda   : > { %v612_v43 = vpop.f32.mrf.mxu0 }
  0xdb   : > { %v5362_v44 = vmul.f32 -1.442695, %v621_v42  ;;  %v7199_v18 = vadd.f32 %v7181_v39, %v612_v43 }
  0xdc   : > { %v6265_v45 = vpop.f32.mrf.mxu0 }
  0xdd   : > { %6721 = vpow2.f32 %v5362_v44  ;;  %v624_v46 = vadd.f32 %v6265_v45, %v7181_v39  ;;  %v5360_v26 = vmul.f32 -1.442695, %v7199_v18 }
  0xde   : > { %v615_v47 = vpop.f32.mrf.mxu0 }
  0xdf   : > { %v5363_v48 = vmul.f32 -1.442695, %v624_v46  ;;  %v7206_v21 = vadd.f32 %v7181_v39, %v615_v47 }
  0xe0   : > { %v6268_v49 = vpop.f32.mrf.mxu0 }
  0xe1   : > { %6723 = vpow2.f32 %v5363_v48  ;;  %v637_v50 = vadd.f32 %v6268_v49, %v7181_v39  ;;  %v5361_v29 = vmul.f32 -1.442695, %v7206_v21 }
  0xe2   : > { %v628_v51 = vpop.f32.mrf.mxu0 }
  0xe3   : > { %v5366_v52 = vmul.f32 -1.442695, %v637_v50  ;;  %v7209_v22 = vadd.f32 %v7181_v39, %v628_v51 }
  0xe4   : > { %v6269_v53 = vpop.f32.mrf.mxu0 }
  0xe5   : > { %6725 = vpow2.f32 %v5366_v52  ;;  %v640_v54 = vadd.f32 %v6269_v53, %v7181_v39  ;;  %v5364_v40 = vmul.f32 -1.442695, %v7209_v22 }
  0xe6   : > { %v631_v55 = vpop.f32.mrf.mxu0 }
  0xe7   : > { %v5367_v56 = vmul.f32 -1.442695, %v640_v54  ;;  %v7214_v24 = vadd.f32 %v7181_v39, %v631_v55 }
  0xe8   : > { %v6272_v57 = vpop.f32.mrf.mxu0 }
  0xe9   : > { %6727 = vpow2.f32 %v5367_v56  ;;  %v7218_v27 = vadd.f32 %v6272_v57, %v7181_v39 }
  0xea   : > { %v6722_v58 = vpop.eup %6721  ;;  %v644_v59 = vpop.f32.mrf.mxu0 }
  0xeb   : > { %v837_v60 = vadd.f32 1.0, %v6722_v58  ;;  %v7224_v30 = vadd.f32 %v7181_v39, %v644_v59  ;;  %v5370_v48 = vmul.f32 -1.442695, %v7218_v27 }
  0xec   : > { %v6273_v61 = vpop.f32.mrf.mxu0 }
  0xed   : > { %6729 = vrcp.f32 %v837_v60  ;;  %v5368_v53 = vmul.f32 -1.442695, %v7224_v30 }
  0xee   : > { %v6724_v62 = vpop.eup %6723  ;;  %v647_v63 = vpop.f32.mrf.mxu0 }
  0xef   : > { %v838_v0 = vadd.f32 1.0, %v6724_v62  ;;  %v7238_v49 = vadd.f32 %v7181_v39, %v647_v63 }
  0xf0   : > { %v6276_v1 = vpop.f32.mrf.mxu0 }
  0xf1   : > { %6731 = vrcp.f32 %v838_v0  ;;  %v7234_v47 = vadd.f32 %v6276_v1, %v7181_v39  ;;  %v5369_v58 = vmul.f32 -1.442695, %v7238_v49 }
  0xf2   : > { %v6726_v2 = vpop.eup %6725  ;;  %v660_v3 = vpop.f32.mrf.mxu0 }
  0xf3   : > { %v841_v5 = vadd.f32 1.0, %v6726_v2  ;;  %v5374_v57 = vmul.f32 -1.442695, %v7234_v47  ;;  %v7253_v59 = vadd.f32 %v7181_v39, %v660_v3 }
  0xf4   : > { %v6277_v6 = vpop.f32.mrf.mxu0 }
  0xf5   : > { %6733 = vrcp.f32 %v841_v5  ;;  %v5372_v2 = vmul.f32 -1.442695, %v7253_v59 }
  0xf6   : > { %v6728_v7 = vpop.eup %6727  ;;  %v663_v8 = vpop.f32.mrf.mxu0 }
  0xf7   : > { %v842_v9 = vadd.f32 1.0, %v6728_v7  ;;  %v7248_v55 = vadd.f32 %v7181_v39, %v663_v8 }
  0xf8   : > { %v6280_v10 = vpop.f32.mrf.mxu0 }
  0xf9   : > { %6735 = vrcp.f32 %v842_v9  ;;  %v7257_v62 = vadd.f32 %v6280_v10, %v7181_v39  ;;  %v5373_v63 = vmul.f32 -1.442695, %v7248_v55 }
  0xfa   : > { %v7192_v11 = vpop.f32.mrf.mxu0  ;;  %v6730_v12 = vpop.eup %6729  ;;  %6737 = vpow2.f32 %v5360_v26 }
  0xfb   : > { %v933_v16 = vmul.f32 %v6730_v12, %v621_v42  ;;  %v7228_v42 = vadd.f32 %v6273_v61, %v7181_v39  ;;  %6739 = vpow2.f32 %v5361_v29  ;;  %v5378_v5 = vmul.f32 -1.442695, %v7257_v62 }
  0xfc   : > { %v7194_v13 = vpop.f32.mrf.mxu0  ;;  %6741 = vpow2.f32 %v5364_v40 }
  0xfe   : > { %v6732_v14 = vpop.eup %6731  ;;  %v7196_v15 = vpop.f32.mrf.mxu0 }
  0xff   : > { %v934_v17 = vmul.f32 %v6732_v14, %v624_v46  ;;  %v5365_v46 = vmul.f32 -1.442695, %v7214_v24 }
 0x100   : > { %v7201_v19 = vpop.f32.mrf.mxu0 }
 0x101   : > { %v7203_v20 = vpack.c.bf16 %v934_v17, %v933_v16  ;;  %6743 = vpow2.f32 %v5365_v46  ;;  %v7281_v16 = vadd.f32 %v7181_v39, %v7192_v11 }
 0x102   : > { %v7211_v23 = vpop.f32.mrf.mxu0  ;;  %v6734_v25 = vpop.eup %6733  ;;  %6745 = vpow2.f32 %v5370_v48 }
 0x103   : > { %v937_v44 = vmul.f32 %v6734_v25, %v637_v50  ;;  %v7244_v50 = vadd.f32 %v6277_v6, %v7181_v39  ;;  %6747 = vpow2.f32 %v5368_v53 }
 0x104   : > { %v7220_v28 = vpop.f32.mrf.mxu0 }
 0x105   : > { %v5375_v61 = vmul.f32 -1.442695, %v7244_v50 }
 0x106   : > { %v6736_v34 = vpop.eup %6735  ;;  %v7230_v43 = vpop.f32.mrf.mxu0 }
 0x107   : > { %v938_v45 = vmul.f32 %v6736_v34, %v640_v54  ;;  %v5371_v54 = vmul.f32 -1.442695, %v7228_v42  ;;  %v7283_v25 = vpop.eup %6737 }
 0x108   : > { %v6288_v51 = vpop.f32.mrf.mxu0  ;;  %v7290_v40 = vpop.eup %6739 }
 0x109   : > { %v7240_v52 = vpack.c.bf16 %v938_v45, %v937_v44  ;;  %6749 = vpow2.f32 %v5371_v54  ;;  %v7266_v6 = vadd.f32 %v6288_v51, %v7181_v39  ;;  %v7294_v44 = vadd.f32 %v7194_v13, %v7181_v39  ;;  %v7299_v46 = vpop.eup %6741 }
 0x10a   : > { %v708_v56 = vpop.f32.mrf.mxu0  ;;  %6751 = vpow2.f32 %v5374_v57  ;;  %v7310_v13 = vadd.f32 %v7220_v28, %v7181_v39  ;;  %v5376_v57 = vmul.f32 -1.442695, %v7281_v16 }
 0x10b   : > { %6753 = vpow2.f32 %v5369_v58  ;;  %v5386_v26 = vmul.f32 -1.442695, %v7266_v6  ;;  %v7297_v11 = vadd.f32 %v7181_v39, %v708_v56  ;;  %v7317_v58 = vadd.f32 %v7181_v39, %v7196_v15 }
 0x10c   : > { %v6289_v60 = vpop.f32.mrf.mxu0  ;;  %6755 = vpow2.f32 %v5375_v61  ;;  %v5383_v15 = vmul.f32 -1.442695, %v7310_v13 }
 0x10d   : > { %v7261_v1 = vadd.f32 %v6289_v60, %v7181_v39  ;;  %6757 = vpow2.f32 %v5373_v63  ;;  %v7324_v63 = vadd.f32 %v7201_v19, %v7181_v39  ;;  %v5384_v28 = vmul.f32 -1.442695, %v7297_v11 }
 0x10e   : > { %v711_v0 = vpop.f32.mrf.mxu0  ;;  %6759 = vpow2.f32 %v5372_v2  ;;  %v7306_v54 = vpop.eup %6743  ;;  %v5379_v2 = vmul.f32 -1.442695, %v7294_v44  ;;  %v5377_v19 = vmul.f32 -1.442695, %v7317_v58 }
 0x10f   : > { %v5387_v9 = vmul.f32 -1.442695, %v7261_v1  ;;  %v7273_v10 = vadd.f32 %v7181_v39, %v711_v0  ;;  %6761 = vpow2.f32 %v5378_v5  ;;  %v7312_v56 = vpop.eup %6745  ;;  %v7331_v5 = vadd.f32 %v7181_v39, %v7230_v43 }
 0x110   : > { %v6292_v3 = vpop.f32.mrf.mxu0  ;;  %v7320_v61 = vpop.eup %6747 }
 0x111   : > { %v7269_v7 = vadd.f32 %v6292_v3, %v7181_v39  ;;  %v5385_v48 = vmul.f32 -1.442695, %v7273_v10  ;;  %v5381_v43 = vmul.f32 -1.442695, %v7331_v5 }
 0x112   : > { %v724_v8 = vpop.f32.mrf.mxu0 }
 0x113   : > { %v5390_v12 = vmul.f32 -1.442695, %v7269_v7  ;;  %v7277_v14 = vadd.f32 %v7181_v39, %v724_v8 }
 0x114   : > { %v6293_v17 = vpop.f32.mrf.mxu0 }
 0x115   : > { %v5388_v29 = vmul.f32 -1.442695, %v7277_v14  ;;  %v7288_v34 = vadd.f32 %v6293_v17, %v7181_v39  ;;  %6763 = vpow2.f32 %v5390_v12  ;;  %v5382_v17 = vmul.f32 -1.442695, %v7324_v63 }
 0x116   : > { %v727_v45 = vpop.f32.mrf.mxu0  ;;  %6765 = vpow2.f32 %v5387_v9  ;;  %v6750_v0 = vpop.eup %6749  ;;  %v7336_v9 = vadd.f32 %v7181_v39, %v7211_v23 }
 0x117   : > { %v5391_v51 = vmul.f32 -1.442695, %v7288_v34  ;;  %v7304_v53 = vadd.f32 %v7181_v39, %v727_v45  ;;  %6767 = vpow2.f32 %v5388_v29  ;;  %v6752_v3 = vpop.eup %6751 }
 0x118   : > { %6769 = vpow2.f32 %v5386_v26  ;;  %v6754_v8 = vpop.eup %6753  ;;  %v849_v29 = vadd.f32 1.0, %v6752_v3 }
 0x119   : > { %v5389_v60 = vmul.f32 -1.442695, %v7304_v53  ;;  %6771 = vpow2.f32 %v5391_v51  ;;  %v6756_v12 = vpop.eup %6755 }
 0x11a   : > { %6773 = vpow2.f32 %v5385_v48  ;;  %v6758_v26 = vpop.eup %6757  ;;  %v5380_v48 = vmul.f32 -1.442695, %v7336_v9 }
 0x11b   : > { %6775 = vpow2.f32 %v5389_v60  ;;  %v6760_v45 = vpop.eup %6759  ;;  %v848_v23 = vadd.f32 1.0, %v6758_v26 }
 0x11c   : > { %6777 = vpow2.f32 %v5376_v57  ;;  %v7341_v51 = vpop.eup %6761  ;;  %v850_v57 = vadd.f32 1.0, %v6756_v12  ;;  %v847_v12 = vadd.f32 1.0, %v6760_v45 }
 0x11d   : > { %6779 = vpow2.f32 %v5384_v28 }
 0x11e   : > { %6781 = vpow2.f32 %v5379_v2 }
 0x11f   : > { %6783 = vpow2.f32 %v5383_v15 }
 0x120   : > { %6785 = vpow2.f32 %v5377_v19 }
 0x121   : > { %6787 = vpow2.f32 %v5382_v17 }
 0x122   : > { %v6764_v39 = vpop.eup %6763  ;;  %6789 = vrcp.f32 %v849_v29 }
 0x123   : > { %v6766_v60 = vpop.eup %6765  ;;  %6791 = vpow2.f32 %v5381_v43  ;;  %v865_v28 = vadd.f32 1.0, %v6764_v39  ;;  %v846_v39 = vadd.f32 1.0, %v6750_v0 }
 0x124   : > { %v6768_v33 = vpop.eup %6767  ;;  %6793 = vpow2.f32 %v5380_v48  ;;  %v862_v19 = vadd.f32 1.0, %v6766_v60 }
 0x125   : > { %v6770_v2 = vpop.eup %6769  ;;  %6795 = vrcp.f32 %v850_v57  ;;  %v863_v3 = vadd.f32 1.0, %v6768_v33 }
 0x126   : > { %v6772_v15 = vpop.eup %6771  ;;  %6797 = vrcp.f32 %v848_v23  ;;  %v861_v26 = vadd.f32 1.0, %v6770_v2  ;;  %v845_v23 = vadd.f32 1.0, %v7312_v56 }
 0x127   : > { %v6774_v32 = vpop.eup %6773  ;;  %6799 = vrcp.f32 %v865_v28  ;;  %v866_v4 = vadd.f32 1.0, %v6772_v15 }
 0x128   : > { %v6776_v31 = vpop.eup %6775  ;;  %6801 = vrcp.f32 %v863_v3  ;;  %v860_v57 = vadd.f32 1.0, %v6774_v32  ;;  %v844_v3 = vadd.f32 1.0, %v6754_v8 }
 0x129   : > { %v7343_v17 = vpop.eup %6777  ;;  %6803 = vrcp.f32 %v866_v4  ;;  %v864_v29 = vadd.f32 1.0, %v6776_v31  ;;  %v843_v31 = vadd.f32 1.0, %v7320_v61 }
 0x12a   : > { %v6780_v43 = vpop.eup %6779  ;;  %6805 = vrcp.f32 %v862_v19 }
 0x12b   : > { %v6782_v48 = vpop.eup %6781  ;;  %6807 = vrcp.f32 %v864_v29  ;;  %v859_v28 = vadd.f32 1.0, %v6780_v43 }
 0x12c   : > { %v6784_v33 = vpop.eup %6783  ;;  %6809 = vrcp.f32 %v847_v12  ;;  %v854_v61 = vadd.f32 1.0, %v6782_v48 }
 0x12d   : > { %v6786_v60 = vpop.eup %6785  ;;  %6811 = vrcp.f32 %v861_v26  ;;  %v858_v2 = vadd.f32 1.0, %v6784_v33 }
 0x12e   : > { %v6788_v45 = vpop.eup %6787  ;;  %6813 = vrcp.f32 %v846_v39  ;;  %v840_v39 = vadd.f32 1.0, %v7306_v54 }
 0x12f   : > { %v6790_v15 = vpop.eup %6789  ;;  %6815 = vrcp.f32 %v860_v57  ;;  %v857_v32 = vadd.f32 1.0, %v6788_v45 }
 0x130   : > { %v6792_v4 = vpop.eup %6791  ;;  %6817 = vrcp.f32 %v845_v23 }
 0x131   : > { %v6794_v0 = vpop.eup %6793  ;;  %6819 = vrcp.f32 %v859_v28  ;;  %v856_v12 = vadd.f32 1.0, %v6792_v4  ;;  %v853_v4 = vadd.f32 1.0, %v7341_v51 }
 0x132   : > { %v6796_v19 = vpop.eup %6795  ;;  %6821 = vrcp.f32 %v844_v3  ;;  %v855_v8 = vadd.f32 1.0, %v6794_v0  ;;  %v839_v3 = vadd.f32 1.0, %v7299_v46  ;;  %v852_v46 = vadd.f32 1.0, %v6786_v60 }
 0x133   : > { %v6798_v56 = vpop.eup %6797  ;;  %6823 = vrcp.f32 %v858_v2  ;;  %v946_v57 = vmul.f32 %v6796_v19, %v7244_v50  ;;  %v945_v2 = vmul.f32 %v6790_v15, %v7234_v47  ;;  %v851_v19 = vadd.f32 1.0, %v7343_v17 }
 0x134   : > { %v6800_v26 = vpop.eup %6799  ;;  %6825 = vrcp.f32 %v843_v31  ;;  %v835_v17 = vadd.f32 1.0, %v7283_v25 }
 0x135   : > { %v6802_v29 = vpop.eup %6801  ;;  %6827 = vrcp.f32 %v857_v32  ;;  %v961_v23 = vmul.f32 %v6800_v26, %v7269_v7  ;;  %v7358_v7 = vpack.c.bf16 %v946_v57, %v945_v2 }
 0x136   : > { %v6804_v43 = vpop.eup %6803  ;;  %6829 = vrcp.f32 %v856_v12  ;;  %v959_v54 = vmul.f32 %v6802_v29, %v7277_v14 }
 0x137   : > { %v6806_v33 = vpop.eup %6805  ;;  %v962_v28 = vmul.f32 %v6804_v43, %v7288_v34  ;;  %6831 = vrcp.f32 %v855_v8  ;;  %v944_v34 = vmul.f32 %v6798_v56, %v7248_v55 }
 0x138   : > { %v6808_v45 = vpop.eup %6807  ;;  %6833 = vrcp.f32 %v840_v39  ;;  %v958_v47 = vmul.f32 %v6806_v33, %v7261_v1  ;;  %v836_v1 = vadd.f32 1.0, %v7290_v40 }
 0x139   : > { %v6810_v31 = vpop.eup %6809  ;;  %v7355_v0 = vpack.c.bf16 %v962_v28, %v961_v23  ;;  %v960_v50 = vmul.f32 %v6808_v45, %v7304_v53  ;;  %6835 = vrcp.f32 %v854_v61 }
 0x13a   : > { %v6812_v48 = vpop.eup %6811  ;;  %6837 = vrcp.f32 %v839_v3  ;;  %v943_v15 = vmul.f32 %v6810_v31, %v7253_v59 }
 0x13b   : > { %v6814_v32 = vpop.eup %6813  ;;  %v7362_v51 = vpack.c.bf16 %v960_v50, %v959_v54  ;;  %5731 = vmatprep.subr.bf16.mxu1 %v7355_v0  ;;  %6839 = vrcp.f32 %v853_v4  ;;  %v957_v55 = vmul.f32 %v6812_v48, %v7266_v6 }
 0x13c   : > { %v6816_v14 = vpop.eup %6815  ;;  %5732 = vmatpush3.bf16.msra.mxu1 %v7358_v7  ;;  %v942_v56 = vmul.f32 %v6814_v32, %v7228_v42  ;;  %v7372_v12 = vpack.c.bf16 %v944_v34, %v943_v15  ;;  %6841 = vrcp.f32 %v852_v46 }
 0x13d   : > { %v6818_v53 = vpop.eup %6817  ;;  %5733 = vmatprep.subr.bf16.mxu1 %v7362_v51  ;;  %v7374_v59 = vpack.c.bf16 %v958_v47, %v957_v55  ;;  %v956_v29 = vmul.f32 %v6816_v14, %v7273_v10  ;;  %6843 = vrcp.f32 %v851_v19 }
 0x13e   : > { %v6820_v60 = vpop.eup %6819  ;;  %v941_v6 = vmul.f32 %v6818_v53, %v7218_v27  ;;  %6845 = vrcp.f32 %v836_v1 }
 0x13f   : > { %v6822_v26 = vpop.eup %6821  ;;  %v955_v40 = vmul.f32 %v6820_v60, %v7297_v11  ;;  %6847 = vrcp.f32 %v835_v17 }
 0x140   : > { %v6824_v8 = vpop.eup %6823  ;;  %5734 = vmatpush3.bf16.msra.mxu1 %v7372_v12  ;;  %v7382_v39 = vpack.c.bf16 %v942_v56, %v941_v6  ;;  %v940_v57 = vmul.f32 %v6822_v26, %v7238_v49 }
 0x141   : > { %v6826_v43 = vpop.eup %6825  ;;  %5735 = vmatprep.subr.bf16.mxu1 %v7374_v59  ;;  %v954_v10 = vmul.f32 %v6824_v8, %v7310_v13  ;;  %v7386_v33 = vpack.c.bf16 %v956_v29, %v955_v40  ;;  %v7520_v40 = vld [vmem:[%s8732_s0] sm:$0xff] }
 0x142   : > { %v6828_v42 = vpop.eup %6827  ;;  %v939_v27 = vmul.f32 %v6826_v43, %v7224_v30  ;;  %v6975_v43 = vmov 4  }
 0x143   : > { %v6830_v25 = vpop.eup %6829  ;;  %v953_v11 = vmul.f32 %v6828_v42, %v7324_v63  ;;  %6665 = vset.pattern.permute.xlu1 %v6975_v43  ;;  %6666 = vset.pattern.permute.xlu0 %v6975_v43 }
 0x144   : > { %5736 = vmatpush3.bf16.msra.mxu1 %v7382_v39  ;;  %v6832_v61 = vpop.eup %6831  ;;  %v7392_v23 = vpack.c.bf16 %v940_v57, %v939_v27  ;;  %v952_v49 = vmul.f32 %v6830_v25, %v7331_v5  ;;  %1868 = vperm.xlu1 %6665, %v7520_v40   ;;  %v7539_v25 = vld [vmem:[%s8732_s0 + $0x10] sm:$0xff]  ;;  %v7546_v27 = vld [vmem:[%s8732_s0 + $0x20] sm:$0xff] }
 0x145   : > { %5737 = vmatprep.subr.bf16.mxu1 %v7386_v33  ;;  %v6834_v28 = vpop.eup %6833  ;;  %v7394_v45 = vpack.c.bf16 %v954_v10, %v953_v11  ;;  %v951_v30 = vmul.f32 %v6832_v61, %v7336_v9  ;;  %v7529_v10 = vld [vmem:[%s8732_s0 + $0x8] sm:$0xff] }
 0x146   : > { %v6836_v13 = vpop.eup %6835  ;;  %v936_v63 = vmul.f32 %v6834_v28, %v7214_v24  ;;  %1871 = vperm.xlu0 %6666, %v7529_v10   ;;  %v7555_v28 = vld [vmem:[%s8732_s0 + $0x18] sm:$0xff] }
 0x147   : > { %v6838_v3 = vpop.eup %6837  ;;  %v950_v4 = vmul.f32 %v6836_v13, %v7294_v44  ;;  %v7402_v31 = vpack.c.bf16 %v952_v49, %v951_v30  ;;  %v998_v44 = vpop.permute.xlu1 %997  ;;  %v7563_v49 = vld [vmem:[%s8732_s0 + $0x30] sm:$0xff]  ;;  %v7573_v13 = vld [vmem:[%s8732_s0 + $0x28] sm:$0xff] }
 0x148   : > { %5738 = vmatpush3.bf16.msra.mxu1 %v7392_v23  ;;  %v6840_v2 = vpop.eup %6839  ;;  %v935_v50 = vmul.f32 %v6838_v3, %v7209_v22  ;;  %vm1019_vm6 = vcmp.eq.s32.totalorder %v7174_v37, %v998_v44  ;;  %vm1018_vm12 = vcmp.eq.s32.totalorder %v7169_v35, %v998_v44  ;;  %1874 = vperm.xlu1 %6665, %v7539_v25  }
 0x149   : > { %5739 = vmatprep.subr.bf16.mxu1 %v7394_v45  ;;  %v6842_v54 = vpop.eup %6841  ;;  %v949_v5 = vmul.f32 %v6840_v2, %v7257_v62  ;;  %v7585_v2 = vld [vmem:[%s8732_s0 + $0x38] sm:$0xff] }
 0x14a   : > { %v6844_v48 = vpop.eup %6843  ;;  %v7408_v9 = vpack.c.bf16 %v936_v63, %v935_v50  ;;  %v948_v24 = vmul.f32 %v6842_v54, %v7317_v58  ;;  %1880 = vperm.xlu0 %6666, %v7546_v27   ;;  %v5424_v63 = vld [vmem:[%s8737_s5 + $0x4] sm:$0xf] }
 0x14b   : > { %v6846_v34 = vpop.eup %6845  ;;  %v7410_v32 = vpack.c.bf16 %v950_v4, %v949_v5  ;;  %v947_v22 = vmul.f32 %v6844_v48, %v7281_v16  ;;  %v1001_v15 = vpop.permute.xlu1 %1000 }
 0x14c   : > { %5740 = vmatpush3.bf16.msra.mxu1 %v7240_v52  ;;  %v6848_v46 = vpop.eup %6847  ;;  %v932_v62 = vmul.f32 %v6846_v34, %v7206_v21  ;;  %vm1021_vm7 = vcmp.eq.s32.totalorder %v7174_v37, %v1001_v15  ;;  %vm1020_vm13 = vcmp.eq.s32.totalorder %v7169_v35, %v1001_v15  ;;  %v1010_v21 = vpop.permute.xlu0 %1009  ;;  %1877 = vperm.xlu1 %6665, %v7555_v28   ;;  %v8752_v34 = vmov 5  }
 0x14d   : > { %5741 = vmatprep.subr.bf16.mxu1 %v7402_v31  ;;  %v7417_v47 = vpack.c.bf16 %v948_v24, %v947_v22  ;;  %v931_v14 = vmul.f32 %v6848_v46, %v7199_v18  ;;  %vm5396_vm10 = vmpackc.low %vm1021_vm7, %vm1019_vm6  ;;  %vm1027_vm5 = vcmp.eq.s32.totalorder %v7174_v37, %v1010_v21  ;;  %v1123_v46 = vld [vmem:[%s8737_s5] sm:$0xf] }
 0x14e   : > { %vm5398_vm0 = vmpackc.low %vm1020_vm13, %vm1018_vm12  ;;  %1886 = vperm.xlu0 %6666, %v7563_v49  }
 0x14f   : > { %v7422_v58 = vpack.c.bf16 %v932_v62, %v931_v14  ;;  %v1007_v36 = vpop.permute.xlu1 %1006 }
 0x150   : > { %5742 = vmatpush3.bf16.msra.mxu1 %v7408_v9  ;;  %vm1025_vm14 = vcmp.eq.s32.totalorder %v7174_v37, %v1007_v36  ;;  %vm1024_vm2 = vcmp.eq.s32.totalorder %v7169_v35, %v1007_v36  ;;  %v1126_v53 = vpop.permute.xlu0 %1125  ;;  %1883 = vperm.xlu1 %6665, %v7573_v13  }
 0x151   : > { %5743 = vmatprep.subr.bf16.mxu1 %v7410_v32  ;;  %vm5400_vm1 = vmpackc.low %vm1025_vm14, %vm1023_vm15  ;;  %vm1149_vm9 = vcmp.eq.s32.totalorder %v7174_v37, %v1126_v53  ;;  %vm1148_vm15 = vcmp.eq.s32.totalorder %v7169_v35, %v1126_v53 }
 0x152   : > { %vm5402_vm6 = vmpackc.low %vm1024_vm2, %vm1022_vm3  ;;  %6667 = vset.pattern.permute.xlu0 %v8752_v34 }
 0x153   : > { %v1013_v18 = vpop.permute.xlu1 %1012  ;;  %2091 = vperm.xlu0 %6667, %v7520_v40  }
 0x154   : > { %5744 = vmatpush3.bf16.msra.mxu1 %v7203_v20  ;;  %vm1029_vm4 = vcmp.eq.s32.totalorder %v7174_v37, %v1013_v18  ;;  %v1135_v55 = vpop.permute.xlu0 %1134  ;;  %1889 = vperm.xlu1 %6665, %v7585_v2  }
 0x155   : > { %5745 = vmatprep.subr.bf16.mxu1 %v7417_v47  ;;  %vm5404_vm7 = vmpackc.low %vm1029_vm4, %vm1027_vm5  ;;  %vm1155_vm2 = vcmp.eq.s32.totalorder %v7174_v37, %v1135_v55  ;;  %vm1154_vm5 = vcmp.eq.s32.totalorder %v7169_v35, %v1135_v55 }
 0x157   : > { %v1129_v16 = vpop.permute.xlu1 %1128  ;;  %2100 = vperm.xlu0 %6667, %v7555_v28  }
 0x158   : > { %5746 = vmatpush3.bf16.msra.mxu1 %v7422_v58  ;;  %vm1151_vm8 = vcmp.eq.s32.totalorder %v7174_v37, %v1129_v16  ;;  %vm1150_vm14 = vcmp.eq.s32.totalorder %v7169_v35, %v1129_v16  ;;  %v1141_v1 = vpop.permute.xlu0 %1140  ;;  %6668 = vset.pattern.permute.xlu1 %v8752_v34 }
 0x159   : > { %5771 = vmatprep.subr.bf16.mxu1 %v7355_v0  ;;  %vm5408_vm12 = vmpackc.low %vm1151_vm8, %vm1149_vm9  ;;  %2094 = vperm.xlu1 %6668, %v7529_v10  }
 0x15b   : > { %5395 = vmatmul.mubr.msk.bf16.vlgmr.msra.gmra.mxu1 %vm5394_vm11, %v6974_v41  ;;  %vm1026_vm11 = vcmp.eq.s32.totalorder %v7169_v35, %v1010_v21  ;;  %v1132_v19 = vpop.permute.xlu1 %1131  ;;  %2106 = vperm.xlu0 %6667, %v7573_v13  }
 0x15c   : > { %5772 = vmatpush3.bf16.msra.mxu1 %v7358_v7  ;;  %5397 = vmatprep.mubr.msk.bf16.mxu1 %vm5396_vm10, %v6974_v41  ;;  %vm1028_vm10 = vcmp.eq.s32.totalorder %v7169_v35, %v1013_v18  ;;  %vm1152_vm4 = vcmp.eq.s32.totalorder %v7169_v35, %v1132_v19  ;;  %v1147_v26 = vpop.permute.xlu0 %1146 }
 0x15d   : > { %5773 = vmatprep.subr.bf16.mxu1 %v7362_v51  ;;  %vm5406_vm13 = vmpackc.low %vm1028_vm10, %vm1026_vm11  ;;  %vm1158_vm11 = vcmp.eq.s32.totalorder %v7169_v35, %v1141_v1  ;;  %2097 = vperm.xlu1 %6668, %v7539_v25  }
 0x15e   : > { %vm5414_vm8 = vmpackc.low %vm1154_vm5, %vm1152_vm4 }
 0x15f   : > { %v1138_v60 = vpop.permute.xlu1 %1137  ;;  %2112 = vperm.xlu0 %6667, %v7585_v2  }
 0x160   : > { %5774 = vmatpush3.bf16.msra.mxu1 %v7372_v12  ;;  %vm1156_vm10 = vcmp.eq.s32.totalorder %v7169_v35, %v1138_v60  ;;  %v1426_v8 = vpop.permute.xlu0 %1425 }
 0x161   : > { %5775 = vmatprep.subr.bf16.mxu1 %v7374_v59  ;;  %2103 = vperm.xlu1 %6668, %v7546_v27  }
 0x163   : > { %5399 = vmatmul.mubr.msk.bf16.gmra.mxu1 %vm5398_vm0, %v6974_v41  ;;  %vm5410_vm0 = vmpackc.low %vm1150_vm14, %vm1148_vm15  ;;  %v1144_v56 = vpop.permute.xlu1 %1143 }
 0x164   : > { %5401 = vmatprep.mubr.msk.bf16.mxu1 %vm5400_vm1, %v6974_v41  ;;  %5776 = vmatpush3.bf16.msra.mxu1 %v7382_v39  ;;  %vm1153_vm1 = vcmp.eq.s32.totalorder %v7174_v37, %v1132_v19  ;;  %vm5418_vm14 = vmpackc.low %vm1158_vm11, %vm1156_vm10  ;;  %v1435_v57 = vpop.permute.xlu0 %1434 }
 0x165   : > { %5777 = vmatprep.subr.bf16.mxu1 %v7386_v33  ;;  %vm5412_vm3 = vmpackc.low %vm1155_vm2, %vm1153_vm1  ;;  %vm1448_vm1 = vcmp.eq.s32.totalorder %v7174_v37, %v1426_v8  ;;  %vm1160_vm2 = vcmp.eq.s32.totalorder %v7169_v35, %v1144_v56  ;;  %2109 = vperm.xlu1 %6668, %v7563_v49  }
 0x167   : > { %v1423_v29 = vpop.permute.xlu1 %1422 }
 0x168   : > { %5778 = vmatpush3.bf16.msra.mxu1 %v7392_v23  ;;  %v1441_v61 = vpop.permute.xlu0 %1440 }
 0x169   : > { %5779 = vmatprep.subr.bf16.mxu1 %v7394_v45 }
 0x16b   : > { %5403 = vmatmul.mubr.msk.bf16.gmra.mxu1 %vm5402_vm6, %v6974_v41  ;;  %vm1157_vm6 = vcmp.eq.s32.totalorder %v7174_v37, %v1138_v60  ;;  %v1429_v17 = vpop.permute.xlu1 %1428 }
 0x16c   : > { %5405 = vmatprep.mubr.msk.bf16.mxu1 %vm5404_vm7, %v6974_v41  ;;  %5780 = vmatpush3.bf16.msra.mxu1 %v7240_v52  ;;  %vm1159_vm7 = vcmp.eq.s32.totalorder %v7174_v37, %v1141_v1  ;;  %v1646_v30 = vpop.permute.xlu0 %1645 }
 0x16d   : > { %5781 = vmatprep.subr.bf16.mxu1 %v7402_v31  ;;  %vm5416_vm9 = vmpackc.low %vm1159_vm7, %vm1157_vm6  ;;  %vm1445_vm6 = vcmp.eq.s32.totalorder %v7169_v35, %v1423_v29  ;;  %vm1447_vm7 = vcmp.eq.s32.totalorder %v7169_v35, %v1426_v8 }
 0x16e   : > { %vm5435_vm10 = vmpackc.low %vm1447_vm7, %vm1445_vm6 }
 0x16f   : > { %v1432_v6 = vpop.permute.xlu1 %1431 }
 0x170   : > { %5782 = vmatpush3.bf16.msra.mxu1 %v7408_v9  ;;  %v1655_v50 = vpop.permute.xlu0 %1654 }
 0x171   : > { %5783 = vmatprep.subr.bf16.mxu1 %v7410_v32 }
 0x173   : > { %5407 = vmatmul.mubr.msk.bf16.gmra.mxu1 %vm5406_vm13, %v6974_v41  ;;  %vm1163_vm13 = vcmp.eq.s32.totalorder %v7174_v37, %v1147_v26  ;;  %v1438_v42 = vpop.permute.xlu1 %1437 }
 0x174   : > { %5784 = vmatpush3.bf16.msra.mxu1 %v7203_v20  ;;  %5409 = vmatprep.mubr.msk.bf16.mxu1 %vm5408_vm12, %v6974_v41  ;;  %vm1161_vm12 = vcmp.eq.s32.totalorder %v7174_v37, %v1144_v56  ;;  %v1661_v48 = vpop.permute.xlu0 %1660 }
 0x175   : > { %5785 = vmatprep.subr.bf16.mxu1 %v7417_v47  ;;  %vm5420_vm15 = vmpackc.low %vm1163_vm13, %vm1161_vm12  ;;  %vm1449_vm12 = vcmp.eq.s32.totalorder %v7169_v35, %v1429_v17  ;;  %vm1451_vm13 = vcmp.eq.s32.totalorder %v7169_v35, %v1432_v6 }
 0x177   : > { %v1444_v11 = vpop.permute.xlu1 %1443 }
 0x178   : > { %5786 = vmatpush3.bf16.msra.mxu1 %v7422_v58  ;;  %v1667_v44 = vpop.permute.xlu0 %1666 }
 0x179   : > { %5821 = vmatprep.subr.bf16.mxu1 %v7355_v0 }
 0x17b   : > { %5411 = vmatmul.mubr.msk.bf16.vlgmr.msra.gmra.mxu1 %vm5410_vm0, %v6974_v41  ;;  %vm1446_vm0 = vcmp.eq.s32.totalorder %v7174_v37, %v1423_v29  ;;  %v1649_v3 = vpop.permute.xlu1 %1648 }
 0x17c   : > { %5413 = vmatprep.mubr.msk.bf16.mxu1 %vm5412_vm3, %v6974_v41  ;;  %5822 = vmatpush3.bf16.msra.mxu1 %v7358_v7  ;;  %vm1162_vm3 = vcmp.eq.s32.totalorder %v7169_v35, %v1147_v26  ;;  %vm5433_vm4 = vmpackc.low %vm1448_vm1, %vm1446_vm0 }
 0x17d   : > { %5823 = vmatprep.subr.bf16.mxu1 %v7362_v51  ;;  %vm5422_vm5 = vmpackc.low %vm1162_vm3, %vm1160_vm2  ;;  %vm1455_vm2 = vcmp.eq.s32.totalorder %v7169_v35, %v1438_v42  ;;  %vm1453_vm3 = vcmp.eq.s32.totalorder %v7169_v35, %v1435_v57 }
 0x17e   : > { %vm5439_vm0 = vmpackc.low %vm1451_vm13, %vm1449_vm12  ;;  %vm1457_vm12 = vcmp.eq.s32.totalorder %v7169_v35, %v1441_v61 }
 0x17f   : > { %vm5443_vm6 = vmpackc.low %vm1455_vm2, %vm1453_vm3  ;;  %v1652_v54 = vpop.permute.xlu1 %1651  ;;  %vm1675_vm3 = vcmp.eq.s32.totalorder %v7174_v37, %v1655_v50 }
 0x180   : > { %5824 = vmatpush3.bf16.msra.mxu1 %v7372_v12  ;;  %vm1673_vm2 = vcmp.eq.s32.totalorder %v7174_v37, %v1652_v54 }
 0x181   : > { %5825 = vmatprep.subr.bf16.mxu1 %v7374_v59 }
 0x183   : > { %5415 = vmatmul.mubr.msk.bf16.gmra.mxu1 %vm5414_vm8, %v6974_v41  ;;  %vm1450_vm8 = vcmp.eq.s32.totalorder %v7174_v37, %v1429_v17  ;;  %v1658_v5 = vpop.permute.xlu1 %1657 }
 0x184   : > { %5417 = vmatprep.mubr.msk.bf16.mxu1 %vm5416_vm9, %v6974_v41  ;;  %5826 = vmatpush3.bf16.msra.mxu1 %v7382_v39  ;;  %vm1452_vm9 = vcmp.eq.s32.totalorder %v7174_v37, %v1432_v6 }
 0x185   : > { %5827 = vmatprep.subr.bf16.mxu1 %v7386_v33  ;;  %vm5437_vm11 = vmpackc.low %vm1452_vm9, %vm1450_vm8  ;;  %vm1671_vm8 = vcmp.eq.s32.totalorder %v7174_v37, %v1649_v3  ;;  %vm1669_vm9 = vcmp.eq.s32.totalorder %v7174_v37, %v1646_v30 }
 0x186   : > { %vm5454_vm13 = vmpackc.low %vm1671_vm8, %vm1669_vm9  ;;  %vm1679_vm8 = vcmp.eq.s32.totalorder %v7174_v37, %v1661_v48 }
 0x187   : > { %v1664_v24 = vpop.permute.xlu1 %1663 }
 0x188   : > { %5828 = vmatpush3.bf16.msra.mxu1 %v7392_v23 }
 0x189   : > { %5829 = vmatprep.subr.bf16.mxu1 %v7394_v45 }
 0x18b   : > { %5419 = vmatmul.mubr.msk.bf16.gmra.mxu1 %vm5418_vm14, %v6974_v41  ;;  %vm1456_vm14 = vcmp.eq.s32.totalorder %v7174_v37, %v1438_v42 }
 0x18c   : > { %5421 = vmatprep.mubr.msk.bf16.mxu1 %vm5420_vm15, %v6974_v41  ;;  %5830 = vmatpush3.bf16.msra.mxu1 %v7240_v52  ;;  %vm1454_vm15 = vcmp.eq.s32.totalorder %v7174_v37, %v1435_v57 }
 0x18d   : > { %5831 = vmatprep.subr.bf16.mxu1 %v7402_v31  ;;  %vm5441_vm1 = vmpackc.low %vm1456_vm14, %vm1454_vm15  ;;  %vm1670_vm15 = vcmp.eq.s32.totalorder %v7169_v35, %v1649_v3 }
 0x190   : > { %5832 = vmatpush3.bf16.msra.mxu1 %v7408_v9 }
 0x191   : > { %5833 = vmatprep.subr.bf16.mxu1 %v7410_v32 }
 0x193   : > { %5423 = vmatmul.mubr.msk.bf16.gmra.mxu1 %vm5422_vm5, %v6974_v41  ;;  %vm1458_vm5 = vcmp.eq.s32.totalorder %v7174_v37, %v1441_v61 }
 0x194   : > { %5834 = vmatpush3.bf16.msra.mxu1 %v7203_v20  ;;  %5434 = vmatprep.mubr.msk.bf16.mxu1 %vm5433_vm4, %v6974_v41  ;;  %vm1460_vm4 = vcmp.eq.s32.totalorder %v7174_v37, %v1444_v11 }
 0x195   : > { %5835 = vmatprep.subr.bf16.mxu1 %v7417_v47  ;;  %vm5445_vm7 = vmpackc.low %vm1460_vm4, %vm1458_vm5  ;;  %vm1672_vm5 = vcmp.eq.s32.totalorder %v7169_v35, %v1652_v54 }
 0x196   : > { %vm5458_vm4 = vmpackc.low %vm1675_vm3, %vm1673_vm2  ;;  %vm1680_vm2 = vcmp.eq.s32.totalorder %v7169_v35, %v1664_v24  ;;  %vm1682_vm3 = vcmp.eq.s32.totalorder %v7169_v35, %v1667_v44 }
 0x198   : > { %5836 = vmatpush3.bf16.msra.mxu1 %v7422_v58 }
 0x199   : > { %5866 = vmatprep.subr.bf16.mxu1 %v7355_v0 }
 0x19b   : > { %5436 = vmatmul.mubr.msk.bf16.vlgmr.msra.gmra.mxu1 %vm5435_vm10, %v6974_v41  ;;  %vm1272_vm10 = vcmask 1043456  }
 0x19c   : > { %5438 = vmatprep.mubr.msk.bf16.mxu1 %vm5437_vm11, %v6974_v41  ;;  %5867 = vmatpush3.bf16.msra.mxu1 %v7358_v7  ;;  %vm1459_vm11 = vcmp.eq.s32.totalorder %v7169_v35, %v1444_v11  ;;  %v1274_v4 = vsel %vm1272_vm10, %v5424_v63, 0 }
 0x19d   : > { %5868 = vmatprep.subr.bf16.mxu1 %v7362_v51  ;;  %6628 = vmatprep.subr.msk.bf16.mxu0 %vm1272_vm10, %v5424_v63  ;;  %vm5447_vm14 = vmpackc.low %vm1459_vm11, %vm1457_vm12  ;;  %vm1676_vm12 = vcmp.eq.s32.totalorder %v7169_v35, %v1658_v5 }
 0x19e   : > { %6295 = vmatpush3.bf16.msra.mxu0 %v1274_v4 }
 0x19f   : > { %6629 = vmatprep.subr.msk.bf16.mxu0 %vm1272_vm10, %v1123_v46 }
 0x1a0   : > { %5869 = vmatpush3.bf16.msra.mxu1 %v7372_v12 }
 0x1a1   : > { %5870 = vmatprep.subr.bf16.mxu1 %v7374_v59 }
 0x1a3   : > { %5440 = vmatmul.mubr.msk.bf16.gmra.mxu1 %vm5439_vm0, %v6974_v41  ;;  %vm1668_vm0 = vcmp.eq.s32.totalorder %v7169_v35, %v1646_v30 }
 0x1a4   : > { %5442 = vmatprep.mubr.msk.bf16.mxu1 %vm5441_vm1, %v6974_v41  ;;  %5871 = vmatpush3.bf16.msra.mxu1 %v7382_v39  ;;  %vm5456_vm1 = vmpackc.low %vm1670_vm15, %vm1668_vm0  ;;  %vm1683_vm15 = vcmp.eq.s32.totalorder %v7174_v37, %v1667_v44  ;;  %v5449_v44 = vld [vmem:[%s8737_s5 + $0x8] sm:$0xf] }
 0x1a5   : > { %5872 = vmatprep.subr.bf16.mxu1 %v7386_v33 }
 0x1a8   : > { %5873 = vmatpush3.bf16.msra.mxu1 %v7392_v23 }
 0x1a9   : > { %5874 = vmatprep.subr.bf16.mxu1 %v7394_v45 }
 0x1ab   : > { %5444 = vmatmul.mubr.msk.bf16.gmra.mxu1 %vm5443_vm6, %v6974_v41  ;;  %vm1674_vm6 = vcmp.eq.s32.totalorder %v7169_v35, %v1655_v50 }
 0x1ac   : > { %5446 = vmatprep.mubr.msk.bf16.mxu1 %vm5445_vm7, %v6974_v41  ;;  %5875 = vmatpush3.bf16.msra.mxu1 %v7240_v52  ;;  %vm1677_vm7 = vcmp.eq.s32.totalorder %v7174_v37, %v1658_v5  ;;  %vm5460_vm9 = vmpackc.low %vm1674_vm6, %vm1672_vm5  ;;  %vm1259_vm5 = vcmask 64512  }
 0x1ad   : > { %5876 = vmatprep.subr.bf16.mxu1 %v7402_v31  ;;  %vm5462_vm11 = vmpackc.low %vm1679_vm8, %vm1677_vm7 }
 0x1b0   : > { %5877 = vmatpush3.bf16.msra.mxu1 %v7408_v9 }
 0x1b1   : > { %5878 = vmatprep.subr.bf16.mxu1 %v7410_v32 }
 0x1b3   : > { %5448 = vmatmul.mubr.msk.bf16.gmra.mxu1 %vm5447_vm14, %v6974_v41  ;;  %vm1681_vm14 = vcmp.eq.s32.totalorder %v7174_v37, %v1664_v24 }
 0x1b4   : > { %5879 = vmatpush3.bf16.msra.mxu1 %v7203_v20  ;;  %5455 = vmatprep.mubr.msk.bf16.mxu1 %vm5454_vm13, %v6974_v41  ;;  %vm1678_vm13 = vcmp.eq.s32.totalorder %v7169_v35, %v1661_v48  ;;  %v1354_v48 = vsel %vm1272_vm10, %v1123_v46, 0 }
 0x1b5   : > { %5880 = vmatprep.subr.bf16.mxu1 %v7417_v47  ;;  %vm5464_vm0 = vmpackc.low %vm1678_vm13, %vm1676_vm12 }
 0x1b8   : > { %5881 = vmatpush3.bf16.msra.mxu1 %v7422_v58 }
 0x1bb   : > { %5457 = vmatmul.mubr.msk.bf16.vlgmr.msra.gmra.mxu1 %vm5456_vm1, %v6974_v41  ;;  %vm5466_vm1 = vmpackc.low %vm1683_vm15, %vm1681_vm14 }
 0x1bc   : > { %5459 = vmatprep.mubr.msk.bf16.mxu1 %vm5458_vm4, %v6974_v41  ;;  %vm5468_vm4 = vmpackc.low %vm1682_vm3, %vm1680_vm2 }
 0x1c3   : > { %5461 = vmatmul.mubr.msk.bf16.gmra.mxu1 %vm5460_vm9, %v6974_v41 }
 0x1c4   : > { %5463 = vmatprep.mubr.msk.bf16.mxu1 %vm5462_vm11, %v6974_v41 }
 0x1cb   : > { %5465 = vmatmul.mubr.msk.bf16.gmra.mxu1 %vm5464_vm0, %v6974_v41 }
 0x1cc   : > { %5467 = vmatprep.mubr.msk.bf16.mxu1 %vm5466_vm1, %v6974_v41 }
 0x1d3   : > { %5469 = vmatmul.mubr.msk.bf16.gmra.mxu1 %vm5468_vm4, %v6974_v41 }
 0x21b   : > { %v5747_v22 = vpop.f32.mrf.mxu1 }
 0x21d   : > { %v5748_v62 = vpop.f32.mrf.mxu1 }
 0x21f   : > { %v5750_v14 = vpop.f32.mrf.mxu1 }
 0x221   : > { %v5751_v15 = vpop.f32.mrf.mxu1 }
 0x223   : > { %v5753_v36 = vpop.f32.mrf.mxu1 }
 0x225   : > { %v5754_v38 = vpop.f32.mrf.mxu1 }
 0x227   : > { %v5756_v18 = vpop.f32.mrf.mxu1 }
 0x229   : > { %v5757_v21 = vpop.f32.mrf.mxu1 }
 0x22b   : > { %v5759_v16 = vpop.f32.mrf.mxu1 }
 0x22d   : > { %v5760_v53 = vpop.f32.mrf.mxu1 }
 0x22f   : > { %v5762_v19 = vpop.f32.mrf.mxu1 }
 0x231   : > { %v5763_v55 = vpop.f32.mrf.mxu1 }
 0x233   : > { %v7637_v60 = vpop.f32.mrf.mxu1 }
 0x235   : > { %v7639_v1 = vpop.f32.mrf.mxu1 }
 0x237   : > { %v5768_v56 = vpop.f32.mrf.mxu1 }
 0x239   : > { %v5769_v26 = vpop.f32.mrf.mxu1 }
 0x23b   : > { %v5787_v29 = vpop.f32.mrf.mxu1 }
 0x23d   : > { %v5788_v8 = vpop.f32.mrf.mxu1 }
 0x23e   : > { %v5789_v42 = vadd.f32 %v5788_v8, %v5787_v29 }
 0x23f   : > { %v5790_v17 = vpop.f32.mrf.mxu1 }
 0x241   : > { %v5791_v6 = vpop.f32.mrf.mxu1 }
 0x242   : > { %v5792_v57 = vadd.f32 %v5791_v6, %v5790_v17 }
 0x243   : > { %v5793_v11 = vpop.f32.mrf.mxu1 }
 0x244   : > { %v1253_v61 = vpack.c.bf16 %v5792_v57, %v5789_v42 }
 0x245   : > { %v5794_v3 = vpop.f32.mrf.mxu1 }
 0x246   : > { %6296 = vmatprep.mubr.msk.bf16.mxu0 %vm1259_vm5, %v1253_v61  ;;  %v5795_v4 = vadd.f32 %v5794_v3, %v5793_v11  ;;  %v5752_v61 = vadd.f32 %v5751_v15, %v5750_v14  ;;  %v1569_v15 = vsel %vm1272_vm10, %v5449_v44, 0 }
 0x247   : > { %v5796_v30 = vpop.f32.mrf.mxu1 }
 0x249   : > { %v5797_v63 = vpop.f32.mrf.mxu1 }
 0x24a   : > { %v5798_v54 = vadd.f32 %v5797_v63, %v5796_v30 }
 0x24b   : > { %v5799_v50 = vpop.f32.mrf.mxu1 }
 0x24c   : > { %v1254_v5 = vpack.c.bf16 %v5798_v54, %v5795_v4  ;;  %v5749_v4 = vadd.f32 %v5748_v62, %v5747_v22  ;;  %v5470_v62 = vld [vmem:[%s8737_s5 + $0xc] sm:$0xf] }
 0x24d   : > { %v5800_v24 = vpop.f32.mrf.mxu1 }
 0x24e   : > { %6297 = vmatmul.mubr.msk.bf16.vlgmr.msra.gmra.mxu0 %vm1259_vm5, %v1254_v5  ;;  %v5801_v17 = vadd.f32 %v5800_v24, %v5799_v50  ;;  %v1119_v34 = vpack.c.bf16 %v5752_v61, %v5749_v4  ;;  %v5758_v24 = vadd.f32 %v5757_v21, %v5756_v18  ;;  %v5770_v18 = vadd.f32 %v5769_v26, %v5768_v56 }
 0x24f   : > { %v5802_v29 = vpop.f32.mrf.mxu1  ;;  %6305 = vmatpush3.bf16.msra.mxu0 %v1354_v48  ;;  %v5767_v21 = vadd.f32 %v7639_v1, %v7637_v60  ;;  %v1792_v60 = vsel %vm1272_vm10, %v5470_v62, 0 }
 0x250   : > { %6630 = vmatprep.subr.msk.bf16.mxu0 %vm1272_vm10, %v5449_v44 }
 0x251   : > { %v5803_v8 = vpop.f32.mrf.mxu1 }
 0x252   : > { %v5804_v6 = vadd.f32 %v5803_v8, %v5802_v29  ;;  %v5764_v29 = vadd.f32 %v5763_v55, %v5762_v19  ;;  %v1122_v19 = vpack.c.bf16 %v5770_v18, %v5767_v21 }
 0x253   : > { %v5805_v42 = vpop.f32.mrf.mxu1 }
 0x254   : > { %v1255_v57 = vpack.c.bf16 %v5804_v6, %v5801_v17  ;;  %v5755_v17 = vadd.f32 %v5754_v38, %v5753_v36  ;;  %v5761_v6 = vadd.f32 %v5760_v53, %v5759_v16 }
 0x255   : > { %v5806_v11 = vpop.f32.mrf.mxu1 }
 0x256   : > { %6300 = vmatprep.mubr.msk.bf16.mxu0 %vm1259_vm5, %v1255_v57  ;;  %v5807_v30 = vadd.f32 %v5806_v11, %v5805_v42  ;;  %v1120_v14 = vpack.c.bf16 %v5758_v24, %v5755_v17  ;;  %v1121_v42 = vpack.c.bf16 %v5764_v29, %v5761_v6 }
 0x257   : > { %v5808_v46 = vpop.f32.mrf.mxu1 }
 0x259   : > { %v5809_v3 = vpop.f32.mrf.mxu1 }
 0x25a   : > { %v5810_v63 = vadd.f32 %v5809_v3, %v5808_v46 }
 0x25b   : > { %v5837_v54 = vpop.f32.mrf.mxu1 }
 0x25c   : > { %v1256_v5 = vpack.c.bf16 %v5810_v63, %v5807_v30 }
 0x25d   : > { %v5838_v48 = vpop.f32.mrf.mxu1 }
 0x25e   : > { %6301 = vmatmul.mubr.msk.bf16.gmra.mxu0 %vm1259_vm5, %v1256_v5  ;;  %v5839_v16 = vadd.f32 %v5838_v48, %v5837_v54 }
 0x25f   : > { %6306 = vmatprep.mubr.msk.bf16.mxu0 %vm1259_vm5, %v1119_v34  ;;  %v5840_v50 = vpop.f32.mrf.mxu1 }
 0x261   : > { %v5841_v8 = vpop.f32.mrf.mxu1 }
 0x262   : > { %v5842_v36 = vadd.f32 %v5841_v8, %v5840_v50 }
 0x263   : > { %v5843_v57 = vpop.f32.mrf.mxu1 }
 0x264   : > { %v1550_v55 = vpack.c.bf16 %v5842_v36, %v5839_v16 }
 0x265   : > { %v5844_v22 = vpop.f32.mrf.mxu1 }
 0x266   : > { %6307 = vmatmul.mubr.msk.bf16.vlgmr.msra.gmra.mxu0 %vm1259_vm5, %v1120_v14  ;;  %v5845_v56 = vadd.f32 %v5844_v22, %v5843_v57 }
 0x267   : > { %6310 = vmatprep.mubr.msk.bf16.mxu0 %vm1259_vm5, %v1121_v42  ;;  %v5846_v34 = vpop.f32.mrf.mxu1  ;;  %6315 = vmatpush3.bf16.msra.mxu0 %v1569_v15 }
 0x268   : > { %6631 = vmatprep.subr.msk.bf16.mxu0 %vm1272_vm10, %v5470_v62 }
 0x269   : > { %v5847_v38 = vpop.f32.mrf.mxu1 }
 0x26a   : > { %v5848_v46 = vadd.f32 %v5847_v38, %v5846_v34 }
 0x26b   : > { %v5849_v53 = vpop.f32.mrf.mxu1 }
 0x26c   : > { %v1551_v63 = vpack.c.bf16 %v5848_v46, %v5845_v56 }
 0x26d   : > { %v5850_v44 = vpop.f32.mrf.mxu1 }
 0x26e   : > { %6311 = vmatmul.mubr.msk.bf16.gmra.mxu0 %vm1259_vm5, %v1122_v19  ;;  %v5851_v26 = vadd.f32 %v5850_v44, %v5849_v53 }
 0x26f   : > { %v5852_v11 = vpop.f32.mrf.mxu1  ;;  %6316 = vmatprep.mubr.msk.bf16.mxu0 %vm1259_vm5, %v1550_v55 }
 0x271   : > { %v5853_v61 = vpop.f32.mrf.mxu1 }
 0x272   : > { %v5854_v3 = vadd.f32 %v5853_v61, %v5852_v11 }
 0x273   : > { %v5855_v30 = vpop.f32.mrf.mxu1 }
 0x274   : > { %v1552_v4 = vpack.c.bf16 %v5854_v3, %v5851_v26  ;;  %v1869_v26 = vpop.permute.xlu1 %1868  ;;  %v1872_v3 = vpop.permute.xlu0 %1871 }
 0x275   : > { %v5856_v1 = vpop.f32.mrf.mxu1  ;;  %vm1892_vm6 = vcmp.eq.s32.totalorder %v7174_v37, %v1869_v26  ;;  %vm1894_vm7 = vcmp.eq.s32.totalorder %v7174_v37, %v1872_v3  ;;  %vm1891_vm9 = vcmp.eq.s32.totalorder %v7169_v35, %v1869_v26  ;;  %vm1893_vm11 = vcmp.eq.s32.totalorder %v7169_v35, %v1872_v3 }
 0x276   : > { %6317 = vmatmul.mubr.msk.bf16.vlgmr.msra.gmra.mxu0 %vm1259_vm5, %v1551_v63  ;;  %v5857_v48 = vadd.f32 %v5856_v1, %v5855_v30  ;;  %vm5475_vm8 = vmpackc.low %vm1894_vm7, %vm1892_vm6 }
 0x277   : > { %6325 = vmatpush3.bf16.msra.mxu0 %v1792_v60  ;;  %v5858_v54 = vpop.f32.mrf.mxu1  ;;  %6320 = vmatprep.mubr.msk.bf16.mxu0 %vm1259_vm5, %v1552_v4  ;;  %vm5477_vm14 = vmpackc.low %vm1893_vm11, %vm1891_vm9 }
 0x278   : > { %5911 = vmatprep.subr.bf16.mxu0 %v7355_v0  ;;  %v1875_v1 = vpop.permute.xlu1 %1874 }
 0x279   : > { %v5859_v5 = vpop.f32.mrf.mxu1  ;;  %vm1896_vm12 = vcmp.eq.s32.totalorder %v7174_v37, %v1875_v1  ;;  %vm1895_vm0 = vcmp.eq.s32.totalorder %v7169_v35, %v1875_v1 }
 0x27a   : > { %v5860_v50 = vadd.f32 %v5859_v5, %v5858_v54  ;;  %v6977_v5 = vmov 6  }
 0x27b   : > { %v5882_v24 = vpop.f32.mrf.mxu1  ;;  %6669 = vset.pattern.permute.xlu1 %v6977_v5  ;;  %6670 = vset.pattern.permute.xlu0 %v6977_v5 }
 0x27c   : > { %v1553_v29 = vpack.c.bf16 %v5860_v50, %v5857_v48  ;;  %v1878_v54 = vpop.permute.xlu1 %1877  ;;  %2314 = vperm.xlu1 %6669, %v7520_v40   ;;  %v1881_v50 = vpop.permute.xlu0 %1880  ;;  %2317 = vperm.xlu0 %6670, %v7529_v10  }
 0x27d   : > { %v5883_v8 = vpop.f32.mrf.mxu1  ;;  %vm1898_vm13 = vcmp.eq.s32.totalorder %v7174_v37, %v1878_v54  ;;  %vm1897_vm1 = vcmp.eq.s32.totalorder %v7169_v35, %v1878_v54  ;;  %vm1900_vm3 = vcmp.eq.s32.totalorder %v7174_v37, %v1881_v50 }
 0x27e   : > { %6321 = vmatmul.mubr.msk.bf16.gmra.mxu0 %vm1259_vm5, %v1553_v29  ;;  %v5884_v57 = vadd.f32 %v5883_v8, %v5882_v24  ;;  %vm5479_vm15 = vmpackc.low %vm1898_vm13, %vm1896_vm12 }
 0x27f   : > { %v5885_v17 = vpop.f32.mrf.mxu1  ;;  %vm5481_vm4 = vmpackc.low %vm1897_vm1, %vm1895_vm0 }
 0x280   : > { %v1884_v48 = vpop.permute.xlu1 %1883  ;;  %2320 = vperm.xlu1 %6669, %v7539_v25   ;;  %2326 = vperm.xlu0 %6670, %v7546_v27   ;;  %v1887_v29 = vpop.permute.xlu0 %1886 }
 0x281   : > { %v5886_v6 = vpop.f32.mrf.mxu1  ;;  %vm1902_vm2 = vcmp.eq.s32.totalorder %v7174_v37, %v1884_v48  ;;  %vm1901_vm7 = vcmp.eq.s32.totalorder %v7169_v35, %v1884_v48  ;;  %vm1904_vm11 = vcmp.eq.s32.totalorder %v7174_v37, %v1887_v29  ;;  %vm1903_vm1 = vcmp.eq.s32.totalorder %v7169_v35, %v1887_v29 }
 0x282   : > { %v5887_v14 = vadd.f32 %v5886_v6, %v5885_v17  ;;  %vm5483_vm6 = vmpackc.low %vm1902_vm2, %vm1900_vm3 }
 0x283   : > { %v5888_v15 = vpop.f32.mrf.mxu1 }
 0x284   : > { %v1773_v42 = vpack.c.bf16 %v5887_v14, %v5884_v57  ;;  %v1890_v24 = vpop.permute.xlu1 %1889  ;;  %2323 = vperm.xlu1 %6669, %v7555_v28   ;;  %2332 = vperm.xlu0 %6670, %v7563_v49   ;;  %v2092_v17 = vpop.permute.xlu0 %2091 }
 0x285   : > { %v5889_v22 = vpop.f32.mrf.mxu1  ;;  %vm1906_vm9 = vcmp.eq.s32.totalorder %v7174_v37, %v1890_v24  ;;  %vm1905_vm0 = vcmp.eq.s32.totalorder %v7169_v35, %v1890_v24 }
 0x286   : > { %6326 = vmatprep.mubr.msk.bf16.mxu0 %vm1259_vm5, %v1773_v42  ;;  %v5890_v18 = vadd.f32 %v5889_v22, %v5888_v15  ;;  %vm5487_vm13 = vmpackc.low %vm1906_vm9, %vm1904_vm11  ;;  %v6978_v42 = vmov 7  }
 0x287   : > { %v5891_v62 = vpop.f32.mrf.mxu1  ;;  %vm5489_vm3 = vmpackc.low %vm1905_vm0, %vm1903_vm1 }
 0x288   : > { %2329 = vperm.xlu1 %6669, %v7573_v13   ;;  %v2095_v8 = vpop.permute.xlu1 %2094  ;;  %v2101_v57 = vpop.permute.xlu0 %2100  ;;  %6671 = vset.pattern.permute.xlu0 %v6978_v42 }
 0x289   : > { %v5892_v34 = vpop.f32.mrf.mxu1  ;;  %vm2121_vm9 = vcmp.eq.s32.totalorder %v7174_v37, %v2101_v57  ;;  %2537 = vperm.xlu0 %6671, %v7520_v40   ;;  %v5491_v40 = vld [vmem:[%s8737_s5 + $0x10] sm:$0xf] }
 0x28a   : > { %v5893_v36 = vadd.f32 %v5892_v34, %v5891_v62  ;;  %6632 = vmatprep.subr.msk.bf16.mxu1 %vm1272_vm10, %v5491_v40 }
 0x28b   : > { %v5894_v38 = vpop.f32.mrf.mxu1 }
 0x28c   : > { %v1774_v21 = vpack.c.bf16 %v5893_v36, %v5890_v18  ;;  %2335 = vperm.xlu1 %6669, %v7585_v2   ;;  %v2098_v6 = vpop.permute.xlu1 %2097  ;;  %v2107_v15 = vpop.permute.xlu0 %2106 }
 0x28d   : > { %v5895_v16 = vpop.f32.mrf.mxu1  ;;  %2546 = vperm.xlu0 %6671, %v7555_v28  }
 0x28e   : > { %6327 = vmatmul.mubr.msk.bf16.vlgmr.msra.gmra.mxu0 %vm1259_vm5, %v1774_v21  ;;  %v5896_v55 = vadd.f32 %v5895_v16, %v5894_v38 }
 0x28f   : > { %5912 = vmatpush3.bf16.msra.mxu0 %v7358_v7  ;;  %v5897_v53 = vpop.f32.mrf.mxu1 }
 0x290   : > { %5913 = vmatprep.subr.bf16.mxu0 %v7362_v51  ;;  %v2104_v14 = vpop.permute.xlu1 %2103  ;;  %6672 = vset.pattern.permute.xlu1 %v6978_v42  ;;  %v2113_v62 = vpop.permute.xlu0 %2112 }
 0x291   : > { %v5898_v19 = vpop.f32.mrf.mxu1  ;;  %2540 = vperm.xlu1 %6672, %v7529_v10   ;;  %2552 = vperm.xlu0 %6671, %v7573_v13   ;;  %v2015_v10 = vsel %vm1272_vm10, %v5491_v40, 0 }
 0x292   : > { %v5899_v44 = vadd.f32 %v5898_v19, %v5897_v53  ;;  %6335 = vmatpush3.bf16.msra.mxu1 %v2015_v10 }
 0x293   : > { %5914 = vmatpush3.bf16.msra.mxu0 %v7372_v12  ;;  %v5900_v11 = vpop.f32.mrf.mxu1 }
 0x294   : > { %v1775_v46 = vpack.c.bf16 %v5899_v44, %v5896_v55  ;;  %5915 = vmatprep.subr.bf16.mxu0 %v7374_v59  ;;  %v2110_v22 = vpop.permute.xlu1 %2109 }
 0x295   : > { %v5901_v61 = vpop.f32.mrf.mxu1  ;;  %2543 = vperm.xlu1 %6672, %v7539_v25   ;;  %2558 = vperm.xlu0 %6671, %v7585_v2   ;;  %v7778_v25 = vld [vmem:[%s8737_s5 + $0x14] sm:$0xf] }
 0x296   : > { %6330 = vmatprep.mubr.msk.bf16.mxu0 %vm1259_vm5, %v1775_v46  ;;  %v5902_v63 = vadd.f32 %v5901_v61, %v5900_v11  ;;  %6633 = vmatprep.subr.msk.bf16.mxu1 %vm1272_vm10, %v7778_v25 }
 0x297   : > { %5916 = vmatpush3.bf16.msra.mxu0 %v7382_v39  ;;  %v5903_v56 = vpop.f32.mrf.mxu1 }
 0x298   : > { %5917 = vmatprep.subr.bf16.mxu0 %v7386_v33 }
 0x299   : > { %v5904_v30 = vpop.f32.mrf.mxu1  ;;  %2549 = vperm.xlu1 %6672, %v7546_v27  }
 0x29a   : > { %v5905_v4 = vadd.f32 %v5904_v30, %v5903_v56 }
 0x29b   : > { %5918 = vmatpush3.bf16.msra.mxu0 %v7392_v23 }
 0x29c   : > { %v1776_v60 = vpack.c.bf16 %v5905_v4, %v5902_v63  ;;  %5919 = vmatprep.subr.bf16.mxu0 %v7394_v45 }
 0x29d   : > { %2555 = vperm.xlu1 %6672, %v7563_v49  }
 0x29e   : > { %6331 = vmatmul.mubr.msk.bf16.gmra.mxu0 %vm1259_vm5, %v1776_v60 }
 0x29f   : > { %5920 = vmatpush3.bf16.msra.mxu0 %v7240_v52  ;;  %5476 = vmatprep.mubr.msk.bf16.mxu0 %vm5475_vm8, %v6974_v41  ;;  %vm1899_vm8 = vcmp.eq.s32.totalorder %v7169_v35, %v1881_v50 }
 0x2a0   : > { %5921 = vmatprep.subr.bf16.mxu0 %v7402_v31  ;;  %vm5485_vm12 = vmpackc.low %vm1901_vm7, %vm1899_vm8  ;;  %vm2119_vm8 = vcmp.eq.s32.totalorder %v7174_v37, %v2098_v6 }
 0x2a1   : > { %vm5500_vm11 = vmpackc.low %vm2121_vm9, %vm2119_vm8  ;;  %vm2126_vm9 = vcmp.eq.s32.totalorder %v7169_v35, %v2110_v22 }
 0x2a3   : > { %5922 = vmatpush3.bf16.msra.mxu0 %v7408_v9 }
 0x2a4   : > { %5923 = vmatprep.subr.bf16.mxu0 %v7410_v32 }
 0x2a7   : > { %5924 = vmatpush3.bf16.msra.mxu0 %v7203_v20 }
 0x2a8   : > { %5925 = vmatprep.subr.bf16.mxu0 %v7417_v47 }
 0x2ab   : > { %5926 = vmatpush3.bf16.msra.mxu0 %v7422_v58 }
 0x2ac   : > { %5956 = vmatprep.subr.bf16.mxu0 %v7355_v0 }
 0x2ae   : > { %5478 = vmatmul.mubr.msk.bf16.vlgmr.msra.gmra.mxu0 %vm5477_vm14, %v6974_v41  ;;  %vm2117_vm14 = vcmp.eq.s32.totalorder %v7174_v37, %v2095_v8 }
 0x2af   : > { %5480 = vmatprep.mubr.msk.bf16.mxu0 %vm5479_vm15, %v6974_v41  ;;  %5957 = vmatpush3.bf16.msra.mxu0 %v7358_v7  ;;  %vm2115_vm15 = vcmp.eq.s32.totalorder %v7174_v37, %v2092_v17 }
 0x2b0   : > { %5958 = vmatprep.subr.bf16.mxu0 %v7362_v51  ;;  %vm5496_vm2 = vmpackc.low %vm2117_vm14, %vm2115_vm15  ;;  %vm2123_vm14 = vcmp.eq.s32.totalorder %v7174_v37, %v2104_v14  ;;  %vm2125_vm15 = vcmp.eq.s32.totalorder %v7174_v37, %v2107_v15 }
 0x2b1   : > { %vm5504_vm1 = vmpackc.low %vm2125_vm15, %vm2123_vm14 }
 0x2b3   : > { %5959 = vmatpush3.bf16.msra.mxu0 %v7372_v12 }
 0x2b4   : > { %5960 = vmatprep.subr.bf16.mxu0 %v7374_v59 }
 0x2b6   : > { %5482 = vmatmul.mubr.msk.bf16.gmra.mxu0 %vm5481_vm4, %v6974_v41  ;;  %vm2116_vm4 = vcmp.eq.s32.totalorder %v7169_v35, %v2095_v8 }
 0x2b7   : > { %5484 = vmatprep.mubr.msk.bf16.mxu0 %vm5483_vm6, %v6974_v41  ;;  %5961 = vmatpush3.bf16.msra.mxu0 %v7382_v39  ;;  %vm2114_vm6 = vcmp.eq.s32.totalorder %v7169_v35, %v2092_v17 }
 0x2b8   : > { %5962 = vmatprep.subr.bf16.mxu0 %v7386_v33  ;;  %vm5498_vm7 = vmpackc.low %vm2116_vm4, %vm2114_vm6  ;;  %vm2127_vm4 = vcmp.eq.s32.totalorder %v7174_v37, %v2110_v22  ;;  %vm2129_vm6 = vcmp.eq.s32.totalorder %v7174_v37, %v2113_v62 }
 0x2b9   : > { %vm5508_vm8 = vmpackc.low %vm2129_vm6, %vm2127_vm4 }
 0x2bb   : > { %5963 = vmatpush3.bf16.msra.mxu0 %v7392_v23 }
 0x2bc   : > { %5964 = vmatprep.subr.bf16.mxu0 %v7394_v45 }
 0x2be   : > { %5486 = vmatmul.mubr.msk.bf16.gmra.mxu0 %vm5485_vm12, %v6974_v41  ;;  %vm2118_vm12 = vcmp.eq.s32.totalorder %v7169_v35, %v2098_v6 }
 0x2bf   : > { %5488 = vmatprep.mubr.msk.bf16.mxu0 %vm5487_vm13, %v6974_v41  ;;  %5965 = vmatpush3.bf16.msra.mxu0 %v7240_v52  ;;  %vm2120_vm13 = vcmp.eq.s32.totalorder %v7169_v35, %v2101_v57 }
 0x2c0   : > { %5966 = vmatprep.subr.bf16.mxu0 %v7402_v31  ;;  %vm5502_vm0 = vmpackc.low %vm2120_vm13, %vm2118_vm12 }
 0x2c3   : > { %5967 = vmatpush3.bf16.msra.mxu0 %v7408_v9 }
 0x2c4   : > { %5968 = vmatprep.subr.bf16.mxu0 %v7410_v32 }
 0x2c6   : > { %5490 = vmatmul.mubr.msk.bf16.gmra.mxu0 %vm5489_vm3, %v6974_v41  ;;  %vm2124_vm3 = vcmp.eq.s32.totalorder %v7169_v35, %v2107_v15 }
 0x2c7   : > { %5969 = vmatpush3.bf16.msra.mxu0 %v7203_v20  ;;  %5497 = vmatprep.mubr.msk.bf16.mxu0 %vm5496_vm2, %v6974_v41  ;;  %vm2122_vm2 = vcmp.eq.s32.totalorder %v7169_v35, %v2104_v14 }
 0x2c8   : > { %5970 = vmatprep.subr.bf16.mxu0 %v7417_v47 }
 0x2cb   : > { %5971 = vmatpush3.bf16.msra.mxu0 %v7422_v58 }
 0x2ce   : > { %5499 = vmatmul.mubr.msk.bf16.vlgmr.msra.gmra.mxu0 %vm5498_vm7, %v6974_v41  ;;  %vm5506_vm7 = vmpackc.low %vm2124_vm3, %vm2122_vm2 }
 0x2cf   : > { %5501 = vmatprep.mubr.msk.bf16.mxu0 %vm5500_vm11, %v6974_v41  ;;  %vm2128_vm11 = vcmp.eq.s32.totalorder %v7169_v35, %v2113_v62 }
 0x2d0   : > { %vm5510_vm12 = vmpackc.low %vm2128_vm11, %vm2126_vm9 }
 0x2d6   : > { %5503 = vmatmul.mubr.msk.bf16.gmra.mxu0 %vm5502_vm0, %v6974_v41 }
 0x2d7   : > { %5505 = vmatprep.mubr.msk.bf16.mxu0 %vm5504_vm1, %v6974_v41 }
 0x2de   : > { %5507 = vmatmul.mubr.msk.bf16.gmra.mxu0 %vm5506_vm7, %v6974_v41 }
 0x2df   : > { %5509 = vmatprep.mubr.msk.bf16.mxu0 %vm5508_vm8, %v6974_v41 }
 0x2e6   : > { %5511 = vmatmul.mubr.msk.bf16.gmra.mxu0 %vm5510_vm12, %v6974_v41 }
 0x30e   : > { %v6298_v27 = vpop.f32.mrf.mxu0 }
 0x310   : > { %v1310_v28 = vpop.f32.mrf.mxu0 }
 0x312   : > { %v6299_v49 = vpop.f32.mrf.mxu0 }
 0x314   : > { %v7782_v13 = vpop.f32.mrf.mxu0 }
 0x31e   : > { %v6302_v2 = vpop.f32.mrf.mxu0 }
 0x320   : > { %v1326_v34 = vpop.f32.mrf.mxu0 }
 0x322   : > { %v6303_v18 = vpop.f32.mrf.mxu0 }
 0x324   : > { %v7784_v36 = vpop.f32.mrf.mxu0 }
 0x326   : > { %v6308_v38 = vpop.f32.mrf.mxu0 }
 0x327   : > { %v1399_v21 = vadd.f32 %v6308_v38, %v6298_v27 }
 0x328   : > { %v1390_v16 = vpop.f32.mrf.mxu0 }
 0x329   : > { %v1391_v53 = vadd.f32 %v1390_v16, %v1310_v28 }
 0x32a   : > { %v6309_v19 = vpop.f32.mrf.mxu0 }
 0x32b   : > { %v1402_v55 = vadd.f32 %v6309_v19, %v6299_v49 }
 0x32c   : > { %v7786_v44 = vpop.f32.mrf.mxu0 }
 0x32e   : > { %v6312_v11 = vpop.f32.mrf.mxu0 }
 0x32f   : > { %v1415_v46 = vadd.f32 %v6312_v11, %v6302_v2 }
 0x330   : > { %v1406_v61 = vpop.f32.mrf.mxu0 }
 0x331   : > { %v1407_v56 = vadd.f32 %v1406_v61, %v1326_v34 }
 0x332   : > { %v6313_v26 = vpop.f32.mrf.mxu0 }
 0x333   : > { %v1418_v3 = vadd.f32 %v6313_v26, %v6303_v18 }
 0x334   : > { %v7788_v30 = vpop.f32.mrf.mxu0 }
 0x336   : > { %v6318_v63 = vpop.f32.mrf.mxu0 }
 0x337   : > { %v1638_v4 = vadd.f32 %v6318_v63, %v1399_v21 }
 0x338   : > { %v1605_v60 = vpop.f32.mrf.mxu0 }
 0x339   : > { %v1636_v1 = vadd.f32 %v1605_v60, %v1391_v53 }
 0x33a   : > { %v6319_v54 = vpop.f32.mrf.mxu0 }
 0x33b   : > { %v1639_v48 = vadd.f32 %v6319_v54, %v1402_v55 }
 0x33c   : > { %v7790_v50 = vpop.f32.mrf.mxu0 }
 0x33e   : > { %v6322_v24 = vpop.f32.mrf.mxu0 }
 0x33f   : > { %v1642_v29 = vadd.f32 %v6322_v24, %v1415_v46  ;;  %v2238_v24 = vsel %vm1272_vm10, %v7778_v25, 0 }
 0x340   : > { %v1621_v8 = vpop.f32.mrf.mxu0 }
 0x341   : > { %v1640_v17 = vadd.f32 %v1621_v8, %v1407_v56 }
 0x342   : > { %v6323_v6 = vpop.f32.mrf.mxu0 }
 0x343   : > { %v1643_v57 = vadd.f32 %v6323_v6, %v1418_v3 }
 0x344   : > { %v7792_v14 = vpop.f32.mrf.mxu0 }
 0x34e   : > { %v6328_v15 = vpop.f32.mrf.mxu0 }
 0x34f   : > { %v7794_v22 = vadd.f32 %v6328_v15, %v1638_v4 }
 0x350   : > { %v1828_v62 = vpop.f32.mrf.mxu0 }
 0x351   : > { %v7796_v40 = vadd.f32 %v1828_v62, %v1636_v1 }
 0x352   : > { %v6329_v10 = vpop.f32.mrf.mxu0 }
 0x353   : > { %v7798_v27 = vadd.f32 %v6329_v10, %v1639_v48 }
 0x354   : > { %v7800_v28 = vpop.f32.mrf.mxu0 }
 0x35e   : > { %v6332_v49 = vpop.f32.mrf.mxu0 }
 0x35f   : > { %v7802_v2 = vadd.f32 %v6332_v49, %v1642_v29 }
 0x360   : > { %v1844_v34 = vpop.f32.mrf.mxu0 }
 0x361   : > { %v7804_v18 = vadd.f32 %v1844_v34, %v1640_v17 }
 0x362   : > { %v6333_v38 = vpop.f32.mrf.mxu0 }
 0x363   : > { %v7806_v21 = vadd.f32 %v6333_v38, %v1643_v57 }
 0x364   : > { %v7808_v16 = vpop.f32.mrf.mxu0 }
 0x36e   : > { %v5927_v53 = vpop.f32.mrf.mxu0 }
 0x370   : > { %v5928_v19 = vpop.f32.mrf.mxu0 }
 0x371   : > { %v5929_v46 = vadd.f32 %v5928_v19, %v5927_v53 }
 0x372   : > { %v5930_v55 = vpop.f32.mrf.mxu0 }
 0x374   : > { %v5931_v11 = vpop.f32.mrf.mxu0 }
 0x375   : > { %v5932_v61 = vadd.f32 %v5931_v11, %v5930_v55 }
 0x376   : > { %v5933_v56 = vpop.f32.mrf.mxu0 }
 0x377   : > { %v1996_v26 = vpack.c.bf16 %v5932_v61, %v5929_v46 }
 0x378   : > { %v5934_v3 = vpop.f32.mrf.mxu0 }
 0x379   : > { %6336 = vmatprep.mubr.msk.bf16.mxu1 %vm1259_vm5, %v1996_v26  ;;  %v5935_v60 = vadd.f32 %v5934_v3, %v5933_v56 }
 0x37a   : > { %v5936_v63 = vpop.f32.mrf.mxu0 }
 0x37c   : > { %v5937_v4 = vpop.f32.mrf.mxu0 }
 0x37d   : > { %v5938_v1 = vadd.f32 %v5937_v4, %v5936_v63 }
 0x37e   : > { %v5939_v54 = vpop.f32.mrf.mxu0 }
 0x37f   : > { %v1997_v48 = vpack.c.bf16 %v5938_v1, %v5935_v60 }
 0x380   : > { %v5940_v29 = vpop.f32.mrf.mxu0 }
 0x381   : > { %6337 = vmatmul.mubr.msk.bf16.vlgmr.msra.gmra.mxu1 %vm1259_vm5, %v1997_v48  ;;  %v5941_v6 = vadd.f32 %v5940_v29, %v5939_v54 }
 0x382   : > { %6345 = vmatpush3.bf16.msra.mxu1 %v2238_v24  ;;  %v5942_v8 = vpop.f32.mrf.mxu0 }
 0x383   : > { %6001 = vmatprep.subr.bf16.mxu1 %v7355_v0 }
 0x384   : > { %v5943_v17 = vpop.f32.mrf.mxu0 }
 0x385   : > { %v5944_v57 = vadd.f32 %v5943_v17, %v5942_v8 }
 0x386   : > { %v5945_v15 = vpop.f32.mrf.mxu0 }
 0x387   : > { %v1998_v62 = vpack.c.bf16 %v5944_v57, %v5941_v6 }
 0x388   : > { %v5946_v10 = vpop.f32.mrf.mxu0 }
 0x389   : > { %6340 = vmatprep.mubr.msk.bf16.mxu1 %vm1259_vm5, %v1998_v62  ;;  %v5947_v38 = vadd.f32 %v5946_v10, %v5945_v15 }
 0x38a   : > { %v5948_v49 = vpop.f32.mrf.mxu0 }
 0x38c   : > { %v5949_v34 = vpop.f32.mrf.mxu0 }
 0x38d   : > { %v5950_v53 = vadd.f32 %v5949_v34, %v5948_v49  ;;  %v2315_v34 = vpop.permute.xlu1 %2314 }
 0x38e   : > { %v5972_v25 = vpop.f32.mrf.mxu0  ;;  %vm2338_vm13 = vcmp.eq.s32.totalorder %v7174_v37, %v2315_v34  ;;  %vm2337_vm0 = vcmp.eq.s32.totalorder %v7169_v35, %v2315_v34 }
 0x38f   : > { %v1999_v19 = vpack.c.bf16 %v5950_v53, %v5947_v38  ;;  %v2318_v38 = vpop.permute.xlu0 %2317 }
 0x390   : > { %v5973_v55 = vpop.f32.mrf.mxu0  ;;  %vm2340_vm14 = vcmp.eq.s32.totalorder %v7174_v37, %v2318_v38  ;;  %vm2339_vm1 = vcmp.eq.s32.totalorder %v7169_v35, %v2318_v38 }
 0x391   : > { %6341 = vmatmul.mubr.msk.bf16.gmra.mxu1 %vm1259_vm5, %v1999_v19  ;;  %v5974_v61 = vadd.f32 %v5973_v55, %v5972_v25  ;;  %vm5517_vm15 = vmpackc.low %vm2340_vm14, %vm2338_vm13 }
 0x392   : > { %v5975_v11 = vpop.f32.mrf.mxu0  ;;  %vm5519_vm4 = vmpackc.low %vm2339_vm1, %vm2337_vm0 }
 0x394   : > { %v5976_v46 = vpop.f32.mrf.mxu0 }
 0x395   : > { %v5977_v56 = vadd.f32 %v5976_v46, %v5975_v11  ;;  %v2321_v11 = vpop.permute.xlu1 %2320 }
 0x396   : > { %v5978_v26 = vpop.f32.mrf.mxu0  ;;  %vm2342_vm2 = vcmp.eq.s32.totalorder %v7174_v37, %v2321_v11  ;;  %vm2341_vm7 = vcmp.eq.s32.totalorder %v7169_v35, %v2321_v11 }
 0x397   : > { %v2219_v3 = vpack.c.bf16 %v5977_v56, %v5974_v61  ;;  %v6979_v61 = vmov 8   ;;  %v6953_v56 = vld [vmem:[%s8732_s0] sm:$0xff] }
 0x398   : > { %v5979_v63 = vpop.f32.mrf.mxu0  ;;  %6673 = vset.pattern.permute.xlu1 %v6979_v61  ;;  %6674 = vset.pattern.permute.xlu0 %v6979_v61 }
 0x399   : > { %6346 = vmatprep.mubr.msk.bf16.mxu1 %vm1259_vm5, %v2219_v3  ;;  %v5980_v1 = vadd.f32 %v5979_v63, %v5978_v26  ;;  %v2324_v46 = vpop.permute.xlu1 %2323  ;;  %2760 = vperm.xlu1 %6673, %v6953_v56   ;;  %v2327_v3 = vpop.permute.xlu0 %2326  ;;  %v6954_v63 = vld [vmem:[%s8732_s0 + $0x8] sm:$0xff] }
 0x39a   : > { %v5981_v4 = vpop.f32.mrf.mxu0  ;;  %vm2344_vm3 = vcmp.eq.s32.totalorder %v7174_v37, %v2324_v46  ;;  %vm2343_vm8 = vcmp.eq.s32.totalorder %v7169_v35, %v2324_v46  ;;  %2763 = vperm.xlu0 %6674, %v6954_v63   ;;  %vm2346_vm11 = vcmp.eq.s32.totalorder %v7174_v37, %v2327_v3 }
 0x39b   : > { %vm5521_vm6 = vmpackc.low %vm2344_vm3, %vm2342_vm2 }
 0x39c   : > { %v5982_v60 = vpop.f32.mrf.mxu0  ;;  %vm5523_vm12 = vmpackc.low %vm2343_vm8, %vm2341_vm7 }
 0x39d   : > { %v5983_v54 = vadd.f32 %v5982_v60, %v5981_v4  ;;  %v2330_v26 = vpop.permute.xlu1 %2329  ;;  %v6955_v4 = vld [vmem:[%s8732_s0 + $0x10] sm:$0xff]  ;;  %v6956_v60 = vld [vmem:[%s8732_s0 + $0x20] sm:$0xff] }
 0x39e   : > { %v5984_v48 = vpop.f32.mrf.mxu0  ;;  %vm2348_vm9 = vcmp.eq.s32.totalorder %v7174_v37, %v2330_v26  ;;  %2766 = vperm.xlu1 %6673, %v6955_v4   ;;  %2772 = vperm.xlu0 %6674, %v6956_v60   ;;  %vm2347_vm14 = vcmp.eq.s32.totalorder %v7169_v35, %v2330_v26 }
 0x39f   : > { %v2220_v24 = vpack.c.bf16 %v5983_v54, %v5980_v1  ;;  %vm5525_vm13 = vmpackc.low %vm2348_vm9, %vm2346_vm11  ;;  %v2333_v54 = vpop.permute.xlu0 %2332 }
 0x3a0   : > { %v5985_v29 = vpop.f32.mrf.mxu0  ;;  %vm2350_vm1 = vcmp.eq.s32.totalorder %v7174_v37, %v2333_v54  ;;  %vm2349_vm8 = vcmp.eq.s32.totalorder %v7169_v35, %v2333_v54 }
 0x3a1   : > { %6347 = vmatmul.mubr.msk.bf16.vlgmr.msra.gmra.mxu1 %vm1259_vm5, %v2220_v24  ;;  %v5986_v6 = vadd.f32 %v5985_v29, %v5984_v48  ;;  %v2336_v1 = vpop.permute.xlu1 %2335  ;;  %v6957_v48 = vld [vmem:[%s8732_s0 + $0x18] sm:$0xff]  ;;  %v6958_v24 = vld [vmem:[%s8732_s0 + $0x30] sm:$0xff]  ;;  %v6959_v29 = vld [vmem:[%s8732_s0 + $0x28] sm:$0xff] }
 0x3a2   : > { %6002 = vmatpush3.bf16.msra.mxu1 %v7358_v7  ;;  %v5987_v8 = vpop.f32.mrf.mxu0  ;;  %2769 = vperm.xlu1 %6673, %v6957_v48   ;;  %vm2352_vm0 = vcmp.eq.s32.totalorder %v7174_v37, %v2336_v1  ;;  %vm2351_vm7 = vcmp.eq.s32.totalorder %v7169_v35, %v2336_v1 }
 0x3a3   : > { %6003 = vmatprep.subr.bf16.mxu1 %v7362_v51  ;;  %2778 = vperm.xlu0 %6674, %v6958_v24   ;;  %vm5529_vm3 = vmpackc.low %vm2352_vm0, %vm2350_vm1 }
 0x3a4   : > { %v5988_v17 = vpop.f32.mrf.mxu0  ;;  %vm5531_vm11 = vmpackc.low %vm2351_vm7, %vm2349_vm8 }
 0x3a5   : > { %v5989_v57 = vadd.f32 %v5988_v17, %v5987_v8  ;;  %v8754_v8 = vmov 1   ;;  %v2541_v17 = vpop.permute.xlu1 %2540 }
 0x3a6   : > { %6004 = vmatpush3.bf16.msra.mxu1 %v7372_v12  ;;  %v5990_v15 = vpop.f32.mrf.mxu0  ;;  %2775 = vperm.xlu1 %6673, %v6959_v29  }
 0x3a7   : > { %v2221_v62 = vpack.c.bf16 %v5989_v57, %v5986_v6  ;;  %6005 = vmatprep.subr.bf16.mxu1 %v7374_v59  ;;  %6675 = vset.pattern.permute.xlu0 %v8754_v8  ;;  %v2538_v6 = vpop.permute.xlu0 %2537  ;;  %v6960_v57 = vld [vmem:[%s8732_s0 + $0x38] sm:$0xff] }
 0x3a8   : > { %v5991_v10 = vpop.f32.mrf.mxu0 }
 0x3a9   : > { %6350 = vmatprep.mubr.msk.bf16.mxu1 %vm1259_vm5, %v2221_v62  ;;  %v5992_v25 = vadd.f32 %v5991_v10, %v5990_v15  ;;  %v2544_v15 = vpop.permute.xlu1 %2543 }
 0x3aa   : > { %6006 = vmatpush3.bf16.msra.mxu1 %v7382_v39  ;;  %v5993_v49 = vpop.f32.mrf.mxu0  ;;  %2781 = vperm.xlu1 %6673, %v6960_v57  }
 0x3ab   : > { %6007 = vmatprep.subr.bf16.mxu1 %v7386_v33  ;;  %v2547_v62 = vpop.permute.xlu0 %2546 }
 0x3ac   : > { %v5994_v53 = vpop.f32.mrf.mxu0  ;;  %vm2567_vm0 = vcmp.eq.s32.totalorder %v7174_v37, %v2547_v62 }
 0x3ad   : > { %v5995_v19 = vadd.f32 %v5994_v53, %v5993_v49  ;;  %v2550_v10 = vpop.permute.xlu1 %2549  ;;  %v5533_v53 = vld [vmem:[%s8737_s5 + $0x18] sm:$0xf] }
 0x3ae   : > { %6008 = vmatpush3.bf16.msra.mxu1 %v7392_v23  ;;  %6676 = vset.pattern.permute.xlu1 %v8754_v8 }
 0x3af   : > { %v2222_v55 = vpack.c.bf16 %v5995_v19, %v5992_v25  ;;  %6009 = vmatprep.subr.bf16.mxu1 %v7394_v45  ;;  %v2553_v49 = vpop.permute.xlu0 %2552  ;;  %6634 = vmatprep.subr.msk.bf16.mxu0 %vm1272_vm10, %v5533_v53  ;;  %v2461_v25 = vsel %vm1272_vm10, %v5533_v53, 0  ;;  %v5554_v19 = vld [vmem:[%s8737_s5 + $0x1c] sm:$0xf] }
 0x3b0   : > { %6355 = vmatpush3.bf16.msra.mxu0 %v2461_v25 }
 0x3b1   : > { %6351 = vmatmul.mubr.msk.bf16.gmra.mxu1 %vm1259_vm5, %v2222_v55  ;;  %v2556_v34 = vpop.permute.xlu1 %2555  ;;  %6635 = vmatprep.subr.msk.bf16.mxu0 %vm1272_vm10, %v5554_v19 }
 0x3b2   : > { %6010 = vmatpush3.bf16.msra.mxu1 %v7240_v52  ;;  %5518 = vmatprep.mubr.msk.bf16.mxu1 %vm5517_vm15, %v6974_v41  ;;  %vm2345_vm15 = vcmp.eq.s32.totalorder %v7169_v35, %v2327_v3 }
 0x3b3   : > { %6011 = vmatprep.subr.bf16.mxu1 %v7402_v31  ;;  %vm5527_vm2 = vmpackc.low %vm2347_vm14, %vm2345_vm15  ;;  %vm2565_vm15 = vcmp.eq.s32.totalorder %v7174_v37, %v2544_v15  ;;  %v2559_v38 = vpop.permute.xlu0 %2558 }
 0x3b4   : > { %vm5542_vm1 = vmpackc.low %vm2567_vm0, %vm2565_vm15  ;;  %vm2572_vm0 = vcmp.eq.s32.totalorder %v7169_v35, %v2556_v34 }
 0x3b6   : > { %6012 = vmatpush3.bf16.msra.mxu1 %v7408_v9 }
 0x3b7   : > { %6013 = vmatprep.subr.bf16.mxu1 %v7410_v32 }
 0x3ba   : > { %6014 = vmatpush3.bf16.msra.mxu1 %v7203_v20 }
 0x3bb   : > { %6015 = vmatprep.subr.bf16.mxu1 %v7417_v47 }
 0x3be   : > { %6016 = vmatpush3.bf16.msra.mxu1 %v7422_v58 }
 0x3bf   : > { %6046 = vmatprep.subr.bf16.mxu1 %v7355_v0 }
 0x3c1   : > { %5520 = vmatmul.mubr.msk.bf16.vlgmr.msra.gmra.mxu1 %vm5519_vm4, %v6974_v41  ;;  %vm2563_vm4 = vcmp.eq.s32.totalorder %v7174_v37, %v2541_v17 }
 0x3c2   : > { %5522 = vmatprep.mubr.msk.bf16.mxu1 %vm5521_vm6, %v6974_v41  ;;  %6047 = vmatpush3.bf16.msra.mxu1 %v7358_v7  ;;  %vm2561_vm6 = vcmp.eq.s32.totalorder %v7174_v37, %v2538_v6 }
 0x3c3   : > { %6048 = vmatprep.subr.bf16.mxu1 %v7362_v51  ;;  %vm5538_vm9 = vmpackc.low %vm2563_vm4, %vm2561_vm6  ;;  %vm2569_vm4 = vcmp.eq.s32.totalorder %v7174_v37, %v2550_v10  ;;  %vm2571_vm6 = vcmp.eq.s32.totalorder %v7174_v37, %v2553_v49 }
 0x3c4   : > { %vm5546_vm8 = vmpackc.low %vm2571_vm6, %vm2569_vm4 }
 0x3c6   : > { %6049 = vmatpush3.bf16.msra.mxu1 %v7372_v12 }
 0x3c7   : > { %6050 = vmatprep.subr.bf16.mxu1 %v7374_v59 }
 0x3c9   : > { %5524 = vmatmul.mubr.msk.bf16.gmra.mxu1 %vm5523_vm12, %v6974_v41  ;;  %vm2562_vm12 = vcmp.eq.s32.totalorder %v7169_v35, %v2541_v17 }
 0x3ca   : > { %5526 = vmatprep.mubr.msk.bf16.mxu1 %vm5525_vm13, %v6974_v41  ;;  %6051 = vmatpush3.bf16.msra.mxu1 %v7382_v39  ;;  %vm2560_vm13 = vcmp.eq.s32.totalorder %v7169_v35, %v2538_v6 }
 0x3cb   : > { %6052 = vmatprep.subr.bf16.mxu1 %v7386_v33  ;;  %vm5540_vm14 = vmpackc.low %vm2562_vm12, %vm2560_vm13  ;;  %vm2573_vm12 = vcmp.eq.s32.totalorder %v7174_v37, %v2556_v34  ;;  %vm2575_vm13 = vcmp.eq.s32.totalorder %v7174_v37, %v2559_v38 }
 0x3cc   : > { %vm5550_vm15 = vmpackc.low %vm2575_vm13, %vm2573_vm12 }
 0x3ce   : > { %6053 = vmatpush3.bf16.msra.mxu1 %v7392_v23 }
 0x3cf   : > { %6054 = vmatprep.subr.bf16.mxu1 %v7394_v45 }
 0x3d1   : > { %5528 = vmatmul.mubr.msk.bf16.gmra.mxu1 %vm5527_vm2, %v6974_v41  ;;  %vm2564_vm2 = vcmp.eq.s32.totalorder %v7169_v35, %v2544_v15 }
 0x3d2   : > { %5530 = vmatprep.mubr.msk.bf16.mxu1 %vm5529_vm3, %v6974_v41  ;;  %6055 = vmatpush3.bf16.msra.mxu1 %v7240_v52  ;;  %vm2566_vm3 = vcmp.eq.s32.totalorder %v7169_v35, %v2547_v62 }
 0x3d3   : > { %6056 = vmatprep.subr.bf16.mxu1 %v7402_v31  ;;  %vm5544_vm7 = vmpackc.low %vm2566_vm3, %vm2564_vm2 }
 0x3d6   : > { %6057 = vmatpush3.bf16.msra.mxu1 %v7408_v9 }
 0x3d7   : > { %6058 = vmatprep.subr.bf16.mxu1 %v7410_v32 }
 0x3d9   : > { %5532 = vmatmul.mubr.msk.bf16.gmra.mxu1 %vm5531_vm11, %v6974_v41  ;;  %vm2570_vm11 = vcmp.eq.s32.totalorder %v7169_v35, %v2553_v49 }
 0x3da   : > { %6059 = vmatpush3.bf16.msra.mxu1 %v7203_v20  ;;  %5539 = vmatprep.mubr.msk.bf16.mxu1 %vm5538_vm9, %v6974_v41  ;;  %vm2568_vm9 = vcmp.eq.s32.totalorder %v7169_v35, %v2550_v10 }
 0x3db   : > { %6060 = vmatprep.subr.bf16.mxu1 %v7417_v47 }
 0x3de   : > { %6061 = vmatpush3.bf16.msra.mxu1 %v7422_v58 }
 0x3e1   : > { %5541 = vmatmul.mubr.msk.bf16.vlgmr.msra.gmra.mxu1 %vm5540_vm14, %v6974_v41  ;;  %vm5548_vm14 = vmpackc.low %vm2570_vm11, %vm2568_vm9 }
 0x3e2   : > { %5543 = vmatprep.mubr.msk.bf16.mxu1 %vm5542_vm1, %v6974_v41  ;;  %vm2574_vm1 = vcmp.eq.s32.totalorder %v7169_v35, %v2559_v38 }
 0x3e3   : > { %vm5552_vm2 = vmpackc.low %vm2574_vm1, %vm2572_vm0 }
 0x3e9   : > { %5545 = vmatmul.mubr.msk.bf16.gmra.mxu1 %vm5544_vm7, %v6974_v41 }
 0x3ea   : > { %5547 = vmatprep.mubr.msk.bf16.mxu1 %vm5546_vm8, %v6974_v41 }
 0x3f1   : > { %5549 = vmatmul.mubr.msk.bf16.gmra.mxu1 %vm5548_vm14, %v6974_v41 }
 0x3f2   : > { %5551 = vmatprep.mubr.msk.bf16.mxu1 %vm5550_vm15, %v6974_v41 }
 0x3f9   : > { %5553 = vmatmul.mubr.msk.bf16.gmra.mxu1 %vm5552_vm2, %v6974_v41 }
 0x441   : > { %v6338_v55 = vpop.f32.mrf.mxu1 }
 0x442   : > { %v2084_v11 = vadd.f32 %v6338_v55, %v7794_v22 }
 0x443   : > { %v2051_v46 = vpop.f32.mrf.mxu1 }
 0x444   : > { %v2082_v56 = vadd.f32 %v2051_v46, %v7796_v40 }
 0x445   : > { %v6339_v26 = vpop.f32.mrf.mxu1 }
 0x446   : > { %v2085_v3 = vadd.f32 %v6339_v26, %v7798_v27 }
 0x447   : > { %v7940_v63 = vpop.f32.mrf.mxu1 }
 0x451   : > { %v6342_v4 = vpop.f32.mrf.mxu1 }
 0x452   : > { %v2088_v60 = vadd.f32 %v6342_v4, %v7802_v2 }
 0x453   : > { %v2067_v1 = vpop.f32.mrf.mxu1 }
 0x454   : > { %v2086_v54 = vadd.f32 %v2067_v1, %v7804_v18 }
 0x455   : > { %v6343_v48 = vpop.f32.mrf.mxu1 }
 0x456   : > { %v2089_v24 = vadd.f32 %v6343_v48, %v7806_v21 }
 0x457   : > { %v7945_v29 = vpop.f32.mrf.mxu1 }
 0x461   : > { %v6348_v22 = vpop.f32.mrf.mxu1 }
 0x462   : > { %v7947_v8 = vadd.f32 %v6348_v22, %v2084_v11 }
 0x463   : > { %v2274_v40 = vpop.f32.mrf.mxu1 }
 0x464   : > { %v7949_v17 = vadd.f32 %v2274_v40, %v2082_v56 }
 0x465   : > { %v6349_v27 = vpop.f32.mrf.mxu1 }
 0x466   : > { %v7951_v6 = vadd.f32 %v6349_v27, %v2085_v3 }
 0x467   : > { %v7953_v57 = vpop.f32.mrf.mxu1 }
 0x471   : > { %v6352_v2 = vpop.f32.mrf.mxu1 }
 0x472   : > { %v7955_v15 = vadd.f32 %v6352_v2, %v2088_v60 }
 0x473   : > { %v2290_v18 = vpop.f32.mrf.mxu1 }
 0x474   : > { %v7957_v62 = vadd.f32 %v2290_v18, %v2086_v54 }
 0x475   : > { %v6353_v21 = vpop.f32.mrf.mxu1 }
 0x476   : > { %v7959_v10 = vadd.f32 %v6353_v21, %v2089_v24  ;;  %v2684_v24 = vsel %vm1272_vm10, %v5554_v19, 0 }
 0x477   : > { %v7961_v49 = vpop.f32.mrf.mxu1 }
 0x481   : > { %v6017_v34 = vpop.f32.mrf.mxu1 }
 0x483   : > { %v6018_v38 = vpop.f32.mrf.mxu1 }
 0x484   : > { %v6019_v55 = vadd.f32 %v6018_v38, %v6017_v34 }
 0x485   : > { %v6020_v53 = vpop.f32.mrf.mxu1 }
 0x487   : > { %v6021_v25 = vpop.f32.mrf.mxu1 }
 0x488   : > { %v6022_v11 = vadd.f32 %v6021_v25, %v6020_v53 }
 0x489   : > { %v6023_v46 = vpop.f32.mrf.mxu1 }
 0x48a   : > { %v2442_v56 = vpack.c.bf16 %v6022_v11, %v6019_v55 }
 0x48b   : > { %v6024_v26 = vpop.f32.mrf.mxu1 }
 0x48c   : > { %6356 = vmatprep.mubr.msk.bf16.mxu0 %vm1259_vm5, %v2442_v56  ;;  %v6025_v60 = vadd.f32 %v6024_v26, %v6023_v46 }
 0x48d   : > { %v6026_v3 = vpop.f32.mrf.mxu1 }
 0x48f   : > { %v6027_v4 = vpop.f32.mrf.mxu1 }
 0x490   : > { %v6028_v1 = vadd.f32 %v6027_v4, %v6026_v3 }
 0x491   : > { %v6029_v54 = vpop.f32.mrf.mxu1 }
 0x492   : > { %v2443_v48 = vpack.c.bf16 %v6028_v1, %v6025_v60 }
 0x493   : > { %v6030_v22 = vpop.f32.mrf.mxu1 }
 0x494   : > { %6357 = vmatmul.mubr.msk.bf16.vlgmr.msra.gmra.mxu0 %vm1259_vm5, %v2443_v48  ;;  %v6031_v2 = vadd.f32 %v6030_v22, %v6029_v54 }
 0x495   : > { %6365 = vmatpush3.bf16.msra.mxu0 %v2684_v24  ;;  %v6032_v40 = vpop.f32.mrf.mxu1 }
 0x496   : > { %6091 = vmatprep.subr.bf16.mxu0 %v7355_v0 }
 0x497   : > { %v6033_v27 = vpop.f32.mrf.mxu1 }
 0x498   : > { %v6034_v18 = vadd.f32 %v6033_v27, %v6032_v40 }
 0x499   : > { %v6035_v21 = vpop.f32.mrf.mxu1 }
 0x49a   : > { %v2444_v34 = vpack.c.bf16 %v6034_v18, %v6031_v2 }
 0x49b   : > { %v6036_v38 = vpop.f32.mrf.mxu1 }
 0x49c   : > { %6360 = vmatprep.mubr.msk.bf16.mxu0 %vm1259_vm5, %v2444_v34  ;;  %v6037_v55 = vadd.f32 %v6036_v38, %v6035_v21 }
 0x49d   : > { %v6038_v53 = vpop.f32.mrf.mxu1 }
 0x49f   : > { %v6039_v25 = vpop.f32.mrf.mxu1 }
 0x4a0   : > { %v6040_v11 = vadd.f32 %v6039_v25, %v6038_v53 }
 0x4a1   : > { %v6062_v19 = vpop.f32.mrf.mxu1 }
 0x4a2   : > { %v2445_v46 = vpack.c.bf16 %v6040_v11, %v6037_v55 }
 0x4a3   : > { %v6063_v56 = vpop.f32.mrf.mxu1 }
 0x4a4   : > { %6361 = vmatmul.mubr.msk.bf16.gmra.mxu0 %vm1259_vm5, %v2445_v46  ;;  %v6064_v0 = vadd.f32 %v6063_v56, %v6062_v19  ;;  %v2764_v46 = vpop.permute.xlu0 %2763 }
 0x4a5   : > { %v6065_v26 = vpop.f32.mrf.mxu1  ;;  %vm2786_vm4 = vcmp.eq.s32.totalorder %v7174_v37, %v2764_v46  ;;  %vm2785_vm8 = vcmp.eq.s32.totalorder %v7169_v35, %v2764_v46 }
 0x4a7   : > { %v6066_v3 = vpop.f32.mrf.mxu1 }
 0x4a8   : > { %v6067_v4 = vadd.f32 %v6066_v3, %v6065_v26  ;;  %v8049_v26 = vld [vmem:[%s8733_s1 + $0x28] sm:$0xff]  ;;  %v8056_v3 = vld [vmem:[%s8733_s1 + $0x30] sm:$0xff] }
 0x4a9   : > { %v6068_v60 = vpop.f32.mrf.mxu1 }
 0x4aa   : > { %v2665_v1 = vpack.c.bf16 %v6067_v4, %v6064_v0  ;;  %v8061_v0 = vld [vmem:[%s8733_s1 + $0x38] sm:$0xff]  ;;  %v8755_v4 = vmov 0  }
 0x4ab   : > { %v6069_v54 = vpop.f32.mrf.mxu1 }
 0x4ac   : > { %6366 = vmatprep.mubr.msk.bf16.mxu0 %vm1259_vm5, %v2665_v1  ;;  %v6070_v22 = vadd.f32 %v6069_v54, %v6068_v60  ;;  %v8756_v54 = vmov 2  }
 0x4ad   : > { %v6071_v48 = vpop.f32.mrf.mxu1 }
 0x4af   : > { %v6072_v24 = vpop.f32.mrf.mxu1 }
 0x4b0   : > { %v6073_v40 = vadd.f32 %v6072_v24, %v6071_v48 }
 0x4b1   : > { %v6074_v27 = vpop.f32.mrf.mxu1 }
 0x4b2   : > { %v2666_v2 = vpack.c.bf16 %v6073_v40, %v6070_v22 }
 0x4b3   : > { %v6075_v18 = vpop.f32.mrf.mxu1 }
 0x4b4   : > { %6367 = vmatmul.mubr.msk.bf16.vlgmr.msra.gmra.mxu0 %vm1259_vm5, %v2666_v2  ;;  %v6076_v38 = vadd.f32 %v6075_v18, %v6074_v27 }
 0x4b5   : > { %6092 = vmatpush3.bf16.msra.mxu0 %v7358_v7  ;;  %v6077_v21 = vpop.f32.mrf.mxu1  ;;  %v2761_v7 = vpop.permute.xlu1 %2760 }
 0x4b6   : > { %6093 = vmatprep.subr.bf16.mxu0 %v7362_v51  ;;  %vm2784_vm3 = vcmp.eq.s32.totalorder %v7174_v37, %v2761_v7  ;;  %vm2783_vm7 = vcmp.eq.s32.totalorder %v7169_v35, %v2761_v7 }
 0x4b7   : > { %v6078_v34 = vpop.f32.mrf.mxu1  ;;  %vm5559_vm6 = vmpackc.low %vm2786_vm4, %vm2784_vm3 }
 0x4b8   : > { %v6079_v53 = vadd.f32 %v6078_v34, %v6077_v21  ;;  %vm5561_vm12 = vmpackc.low %vm2785_vm8, %vm2783_vm7 }
 0x4b9   : > { %6094 = vmatpush3.bf16.msra.mxu0 %v7372_v12  ;;  %v6080_v25 = vpop.f32.mrf.mxu1 }
 0x4ba   : > { %v2667_v55 = vpack.c.bf16 %v6079_v53, %v6076_v38  ;;  %6095 = vmatprep.subr.bf16.mxu0 %v7374_v59 }
 0x4bb   : > { %v6081_v11 = vpop.f32.mrf.mxu1 }
 0x4bc   : > { %6370 = vmatprep.mubr.msk.bf16.mxu0 %vm1259_vm5, %v2667_v55  ;;  %v6082_v12 = vadd.f32 %v6081_v11, %v6080_v25 }
 0x4bd   : > { %6096 = vmatpush3.bf16.msra.mxu0 %v7382_v39  ;;  %v6083_v19 = vpop.f32.mrf.mxu1  ;;  %v2767_v39 = vpop.permute.xlu1 %2766 }
 0x4be   : > { %6097 = vmatprep.subr.bf16.mxu0 %v7386_v33  ;;  %vm2788_vm9 = vcmp.eq.s32.totalorder %v7174_v37, %v2767_v39  ;;  %vm2787_vm14 = vcmp.eq.s32.totalorder %v7169_v35, %v2767_v39 }
 0x4bf   : > { %v6084_v51 = vpop.f32.mrf.mxu1 }
 0x4c0   : > { %v6085_v56 = vadd.f32 %v6084_v51, %v6083_v19 }
 0x4c1   : > { %6098 = vmatpush3.bf16.msra.mxu0 %v7392_v23  ;;  %v2770_v33 = vpop.permute.xlu1 %2769 }
 0x4c2   : > { %v2668_v59 = vpack.c.bf16 %v6085_v56, %v6082_v12  ;;  %6099 = vmatprep.subr.bf16.mxu0 %v7394_v45  ;;  %vm2790_vm11 = vcmp.eq.s32.totalorder %v7174_v37, %v2770_v33  ;;  %vm2789_vm15 = vcmp.eq.s32.totalorder %v7169_v35, %v2770_v33  ;;  %v8758_v56 = vmov 5  }
 0x4c3   : > { %vm5563_vm13 = vmpackc.low %vm2790_vm11, %vm2788_vm9 }
 0x4c4   : > { %6371 = vmatmul.mubr.msk.bf16.gmra.mxu0 %vm1259_vm5, %v2668_v59  ;;  %vm5565_vm2 = vmpackc.low %vm2789_vm15, %vm2787_vm14 }
 0x4c5   : > { %6100 = vmatpush3.bf16.msra.mxu0 %v7240_v52  ;;  %5560 = vmatprep.mubr.msk.bf16.mxu0 %vm5559_vm6, %v6974_v41  ;;  %v2773_v52 = vpop.permute.xlu0 %2772 }
 0x4c6   : > { %6101 = vmatprep.subr.bf16.mxu0 %v7402_v31  ;;  %vm2792_vm1 = vcmp.eq.s32.totalorder %v7174_v37, %v2773_v52  ;;  %vm2791_vm6 = vcmp.eq.s32.totalorder %v7169_v35, %v2773_v52  ;;  %v5575_v31 = vld [vmem:[%s8737_s5 + $0x20] sm:$0xf] }
 0x4c7   : > { %6636 = vmatprep.subr.msk.bf16.mxu1 %vm1272_vm10, %v5575_v31 }
 0x4c9   : > { %6102 = vmatpush3.bf16.msra.mxu0 %v7408_v9  ;;  %v2779_v45 = vpop.permute.xlu0 %2778  ;;  %v8020_v9 = vld [vmem:[%s8733_s1 + $0x8] sm:$0xff] }
 0x4ca   : > { %6103 = vmatprep.subr.bf16.mxu0 %v7410_v32  ;;  %vm2796_vm8 = vcmp.eq.s32.totalorder %v7174_v37, %v2779_v45  ;;  %v8025_v32 = vld [vmem:[%s8733_s1] sm:$0xff]  ;;  %3197 = vperm.xlu1 %6676, %v8020_v9  }
 0x4cb   : > { %3194 = vperm.xlu0 %6675, %v8025_v32  }
 0x4cd   : > { %6104 = vmatpush3.bf16.msra.mxu0 %v7203_v20  ;;  %v2776_v20 = vpop.permute.xlu1 %2775 }
 0x4ce   : > { %6105 = vmatprep.subr.bf16.mxu0 %v7417_v47  ;;  %vm2794_vm0 = vcmp.eq.s32.totalorder %v7174_v37, %v2776_v20  ;;  %vm2793_vm4 = vcmp.eq.s32.totalorder %v7169_v35, %v2776_v20  ;;  %v8037_v47 = vld [vmem:[%s8733_s1 + $0x18] sm:$0xff] }
 0x4cf   : > { %vm5567_vm3 = vmpackc.low %vm2794_vm0, %vm2792_vm1  ;;  %3203 = vperm.xlu0 %6675, %v8037_v47  }
 0x4d0   : > { %vm5569_vm9 = vmpackc.low %vm2793_vm4, %vm2791_vm6 }
 0x4d1   : > { %6106 = vmatpush3.bf16.msra.mxu0 %v7422_v58  ;;  %v2782_v23 = vpop.permute.xlu1 %2781  ;;  %v8044_v58 = vld [vmem:[%s8733_s1 + $0x20] sm:$0xff] }
 0x4d2   : > { %vm2798_vm7 = vcmp.eq.s32.totalorder %v7174_v37, %v2782_v23  ;;  %v2907_v37 = vsel %vm1272_vm10, %v5575_v31, 0 }
 0x4d3   : > { %vm5571_vm11 = vmpackc.low %vm2798_vm7, %vm2796_vm8  ;;  %6375 = vmatpush3.bf16.msra.mxu1 %v2907_v37  ;;  %3209 = vperm.xlu0 %6675, %v8049_v26   ;;  %vm3109_vm8 = vcmask 523264  }
 0x4d4   : > { %5562 = vmatmul.mubr.msk.bf16.vlgmr.msra.gmra.mxu0 %vm5561_vm12, %v6974_v41  ;;  %vm2797_vm12 = vcmp.eq.s32.totalorder %v7169_v35, %v2782_v23 }
 0x4d5   : > { %5564 = vmatprep.mubr.msk.bf16.mxu0 %vm5563_vm13, %v6974_v41  ;;  %vm2795_vm13 = vcmp.eq.s32.totalorder %v7169_v35, %v2779_v45 }
 0x4d6   : > { %vm5573_vm14 = vmpackc.low %vm2797_vm12, %vm2795_vm13 }
 0x4d7   : > { %3215 = vperm.xlu0 %6675, %v8061_v0  }
 0x4db   : > { %6678 = vset.pattern.permute.xlu0 %v8755_v4 }
 0x4dc   : > { %5566 = vmatmul.mubr.msk.bf16.gmra.mxu0 %vm5565_vm2, %v6974_v41  ;;  %3069 = vperm.xlu0 %6678, %v8020_v9  }
 0x4dd   : > { %5568 = vmatprep.mubr.msk.bf16.mxu0 %vm5567_vm3, %v6974_v41 }
 0x4e0   : > { %3078 = vperm.xlu0 %6678, %v8044_v58  }
 0x4e4   : > { %5570 = vmatmul.mubr.msk.bf16.gmra.mxu0 %vm5569_vm9, %v6974_v41  ;;  %3084 = vperm.xlu0 %6678, %v8056_v3  }
 0x4e5   : > { %5572 = vmatprep.mubr.msk.bf16.mxu0 %vm5571_vm11, %v6974_v41 }
 0x4e8   : > { %6679 = vset.pattern.permute.xlu0 %v8756_v54 }
 0x4e9   : > { %3489 = vperm.xlu0 %6679, %v8025_v32  }
 0x4ec   : > { %5574 = vmatmul.mubr.msk.bf16.gmra.mxu0 %vm5573_vm14, %v6974_v41  ;;  %v8032_v41 = vld [vmem:[%s8733_s1 + $0x10] sm:$0xff] }
 0x4ed   : > { %3200 = vperm.xlu1 %6676, %v8032_v41   ;;  %3498 = vperm.xlu0 %6679, %v8037_v47  }
 0x4f1   : > { %3206 = vperm.xlu1 %6676, %v8044_v58   ;;  %3504 = vperm.xlu0 %6679, %v8049_v26  }
 0x4f5   : > { %3212 = vperm.xlu1 %6676, %v8056_v3   ;;  %3510 = vperm.xlu0 %6679, %v8061_v0  }
 0x4f9   : > { %6677 = vset.pattern.permute.xlu1 %v8755_v4 }
 0x4fa   : > { %3066 = vperm.xlu1 %6677, %v8025_v32  }
 0x4fe   : > { %3072 = vperm.xlu1 %6677, %v8032_v41  }
 0x502   : > { %3075 = vperm.xlu1 %6677, %v8037_v47  }
 0x506   : > { %3081 = vperm.xlu1 %6677, %v8049_v26  }
 0x50a   : > { %3087 = vperm.xlu1 %6677, %v8061_v0  }
 0x50e   : > { %6680 = vset.pattern.permute.xlu1 %v8756_v54 }
 0x50f   : > { %3492 = vperm.xlu1 %6680, %v8020_v9  }
 0x513   : > { %3495 = vperm.xlu1 %6680, %v8032_v41  }
 0x517   : > { %3501 = vperm.xlu1 %6680, %v8044_v58  }
 0x51b   : > { %3507 = vperm.xlu1 %6680, %v8056_v3  }
 0x554   : > { %v6358_v60 = vpop.f32.mrf.mxu0 }
 0x555   : > { %v2530_v1 = vadd.f32 %v6358_v60, %v7947_v8 }
 0x556   : > { %v2497_v48 = vpop.f32.mrf.mxu0 }
 0x557   : > { %v2528_v24 = vadd.f32 %v2497_v48, %v7949_v17 }
 0x558   : > { %v6359_v22 = vpop.f32.mrf.mxu0 }
 0x559   : > { %v2531_v40 = vadd.f32 %v6359_v22, %v7951_v6  ;;  %v8757_v6 = vmov 3  }
 0x55a   : > { %v2500_v8 = vpop.f32.mrf.mxu0  ;;  %6682 = vset.pattern.permute.xlu0 %v8757_v6  ;;  %6681 = vset.pattern.permute.xlu1 %v8757_v6 }
 0x55b   : > { %3711 = vperm.xlu0 %6682, %v8020_v9   ;;  %3708 = vperm.xlu1 %6681, %v8025_v32  }
 0x55f   : > { %3720 = vperm.xlu0 %6682, %v8044_v58   ;;  %3714 = vperm.xlu1 %6681, %v8032_v41  }
 0x563   : > { %3726 = vperm.xlu0 %6682, %v8056_v3   ;;  %3717 = vperm.xlu1 %6681, %v8037_v47  }
 0x564   : > { %v6362_v27 = vpop.f32.mrf.mxu0 }
 0x565   : > { %v2534_v17 = vadd.f32 %v6362_v27, %v7955_v15  ;;  %v1394_v15 = vadd.f32 %v7786_v44, %v7782_v13 }
 0x566   : > { %v2513_v2 = vpop.f32.mrf.mxu0 }
 0x567   : > { %v2532_v18 = vadd.f32 %v2513_v2, %v7957_v62  ;;  %v1637_v62 = vadd.f32 %v7790_v50, %v1394_v15  ;;  %6683 = vset.pattern.permute.xlu0 %v6975_v43  ;;  %3723 = vperm.xlu1 %6681, %v8049_v26  }
 0x568   : > { %v6363_v21 = vpop.f32.mrf.mxu0  ;;  %3927 = vperm.xlu0 %6683, %v8025_v32  }
 0x569   : > { %v2535_v34 = vadd.f32 %v6363_v21, %v7959_v10  ;;  %v1860_v53 = vadd.f32 %v7800_v28, %v1637_v62 }
 0x56a   : > { %v2516_v38 = vpop.f32.mrf.mxu0 }
 0x56b   : > { %v2083_v25 = vadd.f32 %v7940_v63, %v1860_v53  ;;  %v1410_v63 = vadd.f32 %v7788_v30, %v7784_v36  ;;  %3729 = vperm.xlu1 %6681, %v8061_v0  }
 0x56c   : > { %3936 = vperm.xlu0 %6683, %v8037_v47  }
 0x56d   : > { %v2306_v44 = vadd.f32 %v7953_v57, %v2083_v25  ;;  %v1641_v57 = vadd.f32 %v7792_v14, %v1410_v63  ;;  %v3195_v25 = vpop.permute.xlu0 %3194 }
 0x56e   : > { %vm3217_vm0 = vcmp.eq.s32.totalorder %v7169_v35, %v3195_v25 }
 0x56f   : > { %v2529_v28 = vadd.f32 %v2500_v8, %v2306_v44  ;;  %v1864_v51 = vadd.f32 %v7808_v16, %v1641_v57  ;;  %6684 = vset.pattern.permute.xlu1 %v6975_v43 }
 0x570   : > { %3942 = vperm.xlu0 %6683, %v8049_v26   ;;  %3930 = vperm.xlu1 %6684, %v8020_v9  }
 0x571   : > { %v2087_v59 = vadd.f32 %v7945_v29, %v1864_v51  ;;  %v3204_v44 = vpop.permute.xlu0 %3203 }
 0x572   : > { %vm3220_vm1 = vcmp.eq.s32.totalorder %v7169_v35, %v3204_v44 }
 0x573   : > { %v2310_v30 = vadd.f32 %v7961_v49, %v2087_v59 }
 0x574   : > { %v6368_v10 = vpop.f32.mrf.mxu0  ;;  %3948 = vperm.xlu0 %6683, %v8061_v0   ;;  %3933 = vperm.xlu1 %6684, %v8032_v41  }
 0x575   : > { %v8105_v55 = vadd.f32 %v6368_v10, %v2530_v1  ;;  %v2533_v43 = vadd.f32 %v2516_v38, %v2310_v30 }
 0x576   : > { %v2720_v13 = vpop.f32.mrf.mxu0 }
 0x577   : > { %v8108_v11 = vadd.f32 %v2720_v13, %v2528_v24 }
 0x578   : > { %v6369_v50 = vpop.f32.mrf.mxu0  ;;  %6686 = vset.pattern.permute.xlu0 %v8758_v56  ;;  %3939 = vperm.xlu1 %6684, %v8044_v58  }
 0x579   : > { %v8112_v19 = vadd.f32 %v6369_v50, %v2531_v40  ;;  %4149 = vperm.xlu0 %6686, %v8020_v9  }
 0x57a   : > { %v2723_v7 = vpop.f32.mrf.mxu0 }
 0x57b   : > { %v8114_v46 = vadd.f32 %v2723_v7, %v2529_v28 }
 0x57c   : > { %3945 = vperm.xlu1 %6684, %v8056_v3  }
 0x57d   : > { %4158 = vperm.xlu0 %6686, %v8044_v58  }
 0x580   : > { %6685 = vset.pattern.permute.xlu1 %v8758_v56 }
 0x581   : > { %4164 = vperm.xlu0 %6686, %v8056_v3   ;;  %4146 = vperm.xlu1 %6685, %v8025_v32  }
 0x584   : > { %v6372_v12 = vpop.f32.mrf.mxu0 }
 0x585   : > { %v8128_v39 = vadd.f32 %v6372_v12, %v2534_v17  ;;  %6687 = vset.pattern.permute.xlu0 %v6977_v5  ;;  %4152 = vperm.xlu1 %6685, %v8032_v41  }
 0x586   : > { %v2736_v36 = vpop.f32.mrf.mxu0  ;;  %4365 = vperm.xlu0 %6687, %v8025_v32  }
 0x587   : > { %v8132_v33 = vadd.f32 %v2736_v36, %v2532_v18 }
 0x588   : > { %v6373_v14 = vpop.f32.mrf.mxu0 }
 0x589   : > { %v8135_v16 = vadd.f32 %v6373_v14, %v2535_v34  ;;  %4155 = vperm.xlu1 %6685, %v8037_v47  }
 0x58a   : > { %v2739_v20 = vpop.f32.mrf.mxu0  ;;  %4374 = vperm.xlu0 %6687, %v8037_v47  }
 0x58b   : > { %v8138_v52 = vadd.f32 %v2739_v20, %v2533_v43 }
 0x58d   : > { %4161 = vperm.xlu1 %6685, %v8049_v26  }
 0x58e   : > { %4380 = vperm.xlu0 %6687, %v8049_v26  }
 0x591   : > { %4167 = vperm.xlu1 %6685, %v8061_v0  }
 0x592   : > { %4386 = vperm.xlu0 %6687, %v8061_v0  }
 0x594   : > { %v6107_v29 = vpop.f32.mrf.mxu0 }
 0x595   : > { %6688 = vset.pattern.permute.xlu1 %v6977_v5 }
 0x596   : > { %v6108_v49 = vpop.f32.mrf.mxu0  ;;  %6690 = vset.pattern.permute.xlu0 %v6978_v42  ;;  %4368 = vperm.xlu1 %6688, %v8020_v9  }
 0x597   : > { %v6109_v31 = vadd.f32 %v6108_v49, %v6107_v29  ;;  %4587 = vperm.xlu0 %6690, %v8020_v9  }
 0x598   : > { %v6110_v23 = vpop.f32.mrf.mxu0 }
 0x59a   : > { %v6111_v45 = vpop.f32.mrf.mxu0  ;;  %4371 = vperm.xlu1 %6688, %v8032_v41  }
 0x59b   : > { %v6112_v37 = vadd.f32 %v6111_v45, %v6110_v23  ;;  %4596 = vperm.xlu0 %6690, %v8044_v58  }
 0x59c   : > { %v6113_v4 = vpop.f32.mrf.mxu0 }
 0x59d   : > { %v2888_v60 = vpack.c.bf16 %v6112_v37, %v6109_v31  ;;  %v5580_v37 = vld [vmem:[%s8738_s6] ss:$0 sm:$0xff] }
 0x59e   : > { %v6114_v1 = vpop.f32.mrf.mxu0  ;;  %4377 = vperm.xlu1 %6688, %v8044_v58  }
 0x59f   : > { %6376 = vmatprep.mubr.msk.bf16.mxu1 %vm1259_vm5, %v2888_v60  ;;  %v6115_v24 = vadd.f32 %v6114_v1, %v6113_v4  ;;  %4602 = vperm.xlu0 %6690, %v8056_v3  }
 0x5a0   : > { %v6116_v54 = vpop.f32.mrf.mxu0 }
 0x5a2   : > { %v6117_v48 = vpop.f32.mrf.mxu0  ;;  %4383 = vperm.xlu1 %6688, %v8056_v3  }
 0x5a3   : > { %v6118_v22 = vadd.f32 %v6117_v48, %v6116_v54  ;;  %6691 = vset.pattern.permute.xlu0 %v6979_v61 }
 0x5a4   : > { %v6119_v40 = vpop.f32.mrf.mxu0  ;;  %4803 = vperm.xlu0 %6691, %v8025_v32  }
 0x5a5   : > { %v2889_v8 = vpack.c.bf16 %v6118_v22, %v6115_v24 }
 0x5a6   : > { %v6120_v27 = vpop.f32.mrf.mxu0  ;;  %6689 = vset.pattern.permute.xlu1 %v6978_v42  ;;  %v3198_v42 = vpop.permute.xlu1 %3197 }
 0x5a7   : > { %6377 = vmatmul.mubr.msk.bf16.vlgmr.msra.gmra.mxu1 %vm1259_vm5, %v2889_v8  ;;  %v6121_v6 = vadd.f32 %v6120_v27, %v6119_v40  ;;  %4584 = vperm.xlu1 %6689, %v8025_v32   ;;  %vm3218_vm15 = vcmp.eq.s32.totalorder %v7169_v35, %v3198_v42 }
 0x5a8   : > { %v6122_v17 = vpop.f32.mrf.mxu0  ;;  %4812 = vperm.xlu0 %6691, %v8037_v47  }
 0x5aa   : > { %v6123_v2 = vpop.f32.mrf.mxu0  ;;  %v3201_v32 = vpop.permute.xlu1 %3200 }
 0x5ab   : > { %v6124_v18 = vadd.f32 %v6123_v2, %v6122_v17  ;;  %4590 = vperm.xlu1 %6689, %v8032_v41   ;;  %vm3219_vm10 = vcmp.eq.s32.totalorder %v7169_v35, %v3201_v32 }
 0x5ac   : > { %v6125_v21 = vpop.f32.mrf.mxu0  ;;  %4818 = vperm.xlu0 %6691, %v8049_v26  }
 0x5ad   : > { %v2890_v34 = vpack.c.bf16 %v6124_v18, %v6121_v6 }
 0x5ae   : > { %v6126_v15 = vpop.f32.mrf.mxu0  ;;  %v3207_v13 = vpop.permute.xlu1 %3206 }
 0x5af   : > { %6380 = vmatprep.mubr.msk.bf16.mxu1 %vm1259_vm5, %v2890_v34  ;;  %v6127_v38 = vadd.f32 %v6126_v15, %v6125_v21  ;;  %4593 = vperm.xlu1 %6689, %v8037_v47  }
 0x5b0   : > { %v6128_v62 = vpop.f32.mrf.mxu0  ;;  %4824 = vperm.xlu0 %6691, %v8061_v0  }
 0x5b2   : > { %v6129_v5 = vpop.f32.mrf.mxu0  ;;  %v3213_v47 = vpop.permute.xlu1 %3212 }
 0x5b3   : > { %v6130_v53 = vadd.f32 %v6129_v5, %v6128_v62  ;;  %4599 = vperm.xlu1 %6689, %v8049_v26   ;;  %v6980_v26 = vmov 0.0   ;;  %vm3223_vm2 = vcmp.eq.s32.totalorder %v7169_v35, %v3213_v47 }
 0x5b4   : > { %v3226_v50 = vsel %vm3218_vm15, 1.0, %v6980_v26  ;;  %v3225_v28 = vsel %vm3217_vm0, 1.0, %v6980_v26  ;;  %v8209_v63 = vsel %vm3223_vm2, 1.0, %v6980_v26 }
 0x5b5   : > { %v2891_v10 = vpack.c.bf16 %v6130_v53, %v6127_v38  ;;  %v3233_v12 = vpack.c.bf16 %v3226_v50, %v3225_v28 }
 0x5b6   : > { %v3067_v57 = vpop.permute.xlu1 %3066 }
 0x5b7   : > { %6381 = vmatmul.mubr.msk.bf16.gmra.mxu1 %vm1259_vm5, %v2891_v10  ;;  %4605 = vperm.xlu1 %6689, %v8061_v0   ;;  %v8185_v0 = vsel %vm3219_vm10, 1.0, %v6980_v26  ;;  %vm3221_vm5 = vcmp.eq.s32.totalorder %v7169_v35, %v3207_v13  ;;  %vm3089_vm4 = vcmp.eq.s32.totalorder %v7169_v35, %v3067_v57 }
 0x5b8   : > { %v3097_v36 = vsel %vm3089_vm4, 1.0, %v6980_v26  ;;  %6408 = vmatprep.mubr.msk.bf16.mxu0 %vm3109_vm8, %v3233_v12 }
 0x5bb   : > { %6692 = vset.pattern.permute.xlu1 %v6979_v61  ;;  %v8191_v61 = vsel %vm3221_vm5, 1.0, %v6980_v26  ;;  %vm3327_vm5 = vcmask 130048  }
 0x5bc   : > { %4806 = vperm.xlu1 %6692, %v8020_v9   ;;  %v3210_v9 = vpop.permute.xlu0 %3209 }
 0x5bd   : > { %vm3222_vm3 = vcmp.eq.s32.totalorder %v7169_v35, %v3210_v9 }
 0x5c0   : > { %4809 = vperm.xlu1 %6692, %v8032_v41   ;;  %v8195_v41 = vsel %vm3220_vm1, 1.0, %v6980_v26  ;;  %v3216_v51 = vpop.permute.xlu0 %3215 }
 0x5c1   : > { %vm3224_vm6 = vcmp.eq.s32.totalorder %v7169_v35, %v3216_v51 }
 0x5c2   : > { %v8214_v56 = vsel %vm3224_vm6, 1.0, %v6980_v26 }
 0x5c3   : > { %v3236_v59 = vpack.c.bf16 %v8214_v56, %v8209_v63 }
 0x5c4   : > { %4815 = vperm.xlu1 %6692, %v8044_v58   ;;  %v3234_v58 = vpack.c.bf16 %v8195_v41, %v8185_v0  ;;  %v3070_v30 = vpop.permute.xlu0 %3069  ;;  %v6712_v0 = vld [vmem:[%s8739_s7] sm:$0xff]  }
 0x5c5   : > { %vm3090_vm7 = vcmp.eq.s32.totalorder %v7169_v35, %v3070_v30  ;;  %v3073_v30 = vpop.permute.xlu1 %3072 }
 0x5c6   : > { %v3098_v14 = vsel %vm3090_vm7, 1.0, %v6980_v26  ;;  %vm3091_vm9 = vcmp.eq.s32.totalorder %v7169_v35, %v3073_v30 }
 0x5c7   : > { %v3105_v43 = vpack.c.bf16 %v3098_v14, %v3097_v36 }
 0x5c8   : > { %4821 = vperm.xlu1 %6692, %v8056_v3   ;;  %v8202_v3 = vsel %vm3222_vm3, 1.0, %v6980_v26 }
 0x5c9   : > { %v3235_v7 = vpack.c.bf16 %v8202_v3, %v8191_v61  ;;  %6392 = vmatprep.mubr.msk.bf16.mxu1 %vm3109_vm8, %v3105_v43 }
 0x667   : > { %v6378_v20 = vpop.f32.mrf.mxu1 }
 0x668   : > { %v2976_v31 = vadd.f32 %v6378_v20, %v8105_v55 }
 0x669   : > { %v2943_v29 = vpop.f32.mrf.mxu1 }
 0x66a   : > { %v8232_v24 = vadd.f32 %v5580_v37, %v2976_v31  ;;  %v2974_v40 = vadd.f32 %v2943_v29, %v8108_v11 }
 0x66b   : > { %v6379_v49 = vpop.f32.mrf.mxu1 }
 0x66c   : > { %v2977_v23 = vadd.f32 %v6379_v49, %v8112_v19  ;;  %v8241_v34 = vadd.f32 %v5580_v37, %v2974_v40 }
 0x66d   : > { %v2946_v45 = vpop.f32.mrf.mxu1 }
 0x66e   : > { %v8228_v4 = vadd.f32 %v5580_v37, %v2977_v23  ;;  %v2975_v1 = vadd.f32 %v2946_v45, %v8114_v46  ;;  %v5581_v5 = vmul.f32 -1.442695, %v8241_v34 }
 0x670   : > { %v5584_v55 = vmul.f32 -1.442695, %v8228_v4  ;;  %v8237_v27 = vadd.f32 %v5580_v37, %v2975_v1  ;;  %v3076_v1 = vpop.permute.xlu1 %3075 }
 0x671   : > { %vm3092_vm11 = vcmp.eq.s32.totalorder %v7169_v35, %v3076_v1 }
 0x672   : > { %v5582_v11 = vmul.f32 -1.442695, %v8237_v27 }
 0x677   : > { %v6382_v60 = vpop.f32.mrf.mxu1 }
 0x678   : > { %v2980_v54 = vadd.f32 %v6382_v60, %v8128_v39  ;;  %v5583_v39 = vmul.f32 -1.442695, %v8232_v24 }
 0x679   : > { %v2959_v48 = vpop.f32.mrf.mxu1 }
 0x67a   : > { %v2995_v22 = vadd.f32 %v5580_v37, %v2980_v54  ;;  %v2978_v19 = vadd.f32 %v2959_v48, %v8132_v33 }
 0x67b   : > { %v6383_v8 = vpop.f32.mrf.mxu1 }
 0x67c   : > { %v5587_v17 = vmul.f32 -1.442695, %v2995_v22  ;;  %v2993_v2 = vadd.f32 %v5580_v37, %v2978_v19  ;;  %v2981_v6 = vadd.f32 %v6383_v8, %v8135_v16  ;;  %v3082_v8 = vpop.permute.xlu1 %3081 }
 0x67d   : > { %v2962_v46 = vpop.f32.mrf.mxu1  ;;  %vm3094_vm12 = vcmp.eq.s32.totalorder %v7169_v35, %v3082_v8 }
 0x67e   : > { %v5585_v18 = vmul.f32 -1.442695, %v2993_v2  ;;  %v2996_v21 = vadd.f32 %v5580_v37, %v2981_v6  ;;  %6849 = vpow2.f32 %v5587_v17  ;;  %v2979_v33 = vadd.f32 %v2962_v46, %v8138_v52  ;;  %v3079_v17 = vpop.permute.xlu0 %3078 }
 0x67f   : > { %6851 = vpow2.f32 %v5584_v55  ;;  %vm3093_vm13 = vcmp.eq.s32.totalorder %v7169_v35, %v3079_v17  ;;  %v3100_v6 = vsel %vm3092_vm11, 1.0, %v6980_v26  ;;  %v3102_v46 = vsel %vm3094_vm12, 1.0, %v6980_v26 }
 0x680   : > { %v5588_v15 = vmul.f32 -1.442695, %v2996_v21  ;;  %6853 = vpow2.f32 %v5585_v18  ;;  %v2994_v62 = vadd.f32 %v5580_v37, %v2979_v33  ;;  %v6711_v18 = vld [vmem:[%s8739_s7 + $0x8] sm:$0xff]  }
 0x681   : > { %6855 = vpow2.f32 %v5583_v39  ;;  %v3101_v39 = vsel %vm3093_vm13, 1.0, %v6980_v26 }
 0x682   : > { %6857 = vpow2.f32 %v5588_v15  ;;  %v5586_v16 = vmul.f32 -1.442695, %v2994_v62 }
 0x683   : > { %6859 = vpow2.f32 %v5582_v11  ;;  %v3107_v11 = vpack.c.bf16 %v3102_v46, %v3101_v39 }
 0x684   : > { %6861 = vpow2.f32 %v5586_v16 }
 0x685   : > { %6863 = vpow2.f32 %v5581_v5 }
 0x68b   : > { %v6850_v38 = vpop.eup %6849 }
 0x68c   : > { %v6852_v53 = vpop.eup %6851  ;;  %v3027_v10 = vadd.f32 1.0, %v6850_v38 }
 0x68d   : > { %v6854_v42 = vpop.eup %6853  ;;  %v3024_v13 = vadd.f32 1.0, %v6852_v53 }
 0x68e   : > { %v6856_v32 = vpop.eup %6855  ;;  %v3025_v52 = vadd.f32 1.0, %v6854_v42  ;;  %6865 = vrcp.f32 %v3027_v10 }
 0x68f   : > { %v6858_v25 = vpop.eup %6857  ;;  %v3023_v50 = vadd.f32 1.0, %v6856_v32 }
 0x690   : > { %v6860_v44 = vpop.eup %6859  ;;  %v3028_v47 = vadd.f32 1.0, %v6858_v25  ;;  %6867 = vrcp.f32 %v3025_v52 }
 0x691   : > { %v6862_v9 = vpop.eup %6861  ;;  %v3022_v51 = vadd.f32 1.0, %v6860_v44 }
 0x692   : > { %6869 = vrcp.f32 %v3028_v47  ;;  %v3026_v28 = vadd.f32 1.0, %v6862_v9  ;;  %v6864_v57 = vpop.eup %6863 }
 0x693   : > { %6871 = vrcp.f32 %v3024_v13  ;;  %v3021_v12 = vadd.f32 1.0, %v6864_v57 }
 0x694   : > { %6873 = vrcp.f32 %v3026_v28 }
 0x695   : > { %6875 = vrcp.f32 %v3023_v50 }
 0x696   : > { %6877 = vrcp.f32 %v3022_v51 }
 0x697   : > { %6879 = vrcp.f32 %v3021_v12 }
 0x69b   : > { %v6866_v36 = vpop.eup %6865 }
 0x69c   : > { %v8246_v29 = vmul.f32 %v6866_v36, %v2995_v22 }
 0x69d   : > { %v6868_v14 = vpop.eup %6867 }
 0x69e   : > { %v8250_v45 = vmul.f32 %v6868_v14, %v2993_v2  ;;  %v3099_v2 = vsel %vm3091_vm9, 1.0, %v6980_v26 }
 0x69f   : > { %v6870_v43 = vpop.eup %6869  ;;  %v3106_v33 = vpack.c.bf16 %v3100_v6, %v3099_v2 }
 0x6a0   : > { %v6872_v20 = vpop.eup %6871  ;;  %v8248_v49 = vmul.f32 %v6870_v43, %v2996_v21  ;;  %v3088_v21 = vpop.permute.xlu1 %3087 }
 0x6a1   : > { %v6874_v23 = vpop.eup %6873  ;;  %v8259_v54 = vmul.f32 %v6872_v20, %v8228_v4  ;;  %vm3096_vm14 = vcmp.eq.s32.totalorder %v7169_v35, %v3088_v21 }
 0x6a2   : > { %v8254_v31 = vpack.c.bf16 %v8248_v49, %v8246_v29  ;;  %v8256_v37 = vmul.f32 %v6874_v23, %v2994_v62  ;;  %v6876_v60 = vpop.eup %6875  ;;  %v3104_v15 = vsel %vm3096_vm14, 1.0, %v6980_v26 }
 0x6a3   : > { %v6878_v22 = vpop.eup %6877  ;;  %v8270_v19 = vmul.f32 %v6876_v60, %v8232_v24 }
 0x6a4   : > { %v8263_v48 = vpack.c.bf16 %v8256_v37, %v8250_v45  ;;  %6384 = vmatprep.subr.bf16.mxu1 %v8254_v31  ;;  %6400 = vmatprep.subr.bf16.mxu0 %v8254_v31  ;;  %v6880_v4 = vpop.eup %6879  ;;  %v8279_v55 = vmul.f32 %v6878_v22, %v8237_v27  ;;  %v3493_v41 = vpop.permute.xlu1 %3492 }
 0x6a5   : > { %6385 = vmatpush3.bf16.msra.mxu1 %v8254_v31  ;;  %6401 = vmatpush3.bf16.msra.mxu0 %v8254_v31  ;;  %v8276_v40 = vpack.c.bf16 %v8259_v54, %v8270_v19  ;;  %v8284_v24 = vmul.f32 %v6880_v4, %v8241_v34  ;;  %v3085_v34 = vpop.permute.xlu0 %3084  ;;  %vm3513_vm15 = vcmp.eq.s32.totalorder %v7169_v35, %v3493_v41 }
 0x6a6   : > { %6386 = vmatprep.subr.bf16.mxu1 %v8263_v48  ;;  %6402 = vmatprep.subr.bf16.mxu0 %v8263_v48  ;;  %vm3095_vm10 = vcmp.eq.s32.totalorder %v7169_v35, %v3085_v34  ;;  %v3521_v8 = vsel %vm3513_vm15, 1.0, %v6980_v26 }
 0x6a7   : > { %v8294_v27 = vpack.c.bf16 %v8279_v55, %v8284_v24  ;;  %v3103_v62 = vsel %vm3095_vm10, 1.0, %v6980_v26 }
 0x6a8   : > { %v3108_v5 = vpack.c.bf16 %v3104_v15, %v3103_v62 }
 0x6a9   : > { %6387 = vmatpush3.bf16.msra.mxu1 %v8263_v48  ;;  %6403 = vmatpush3.bf16.msra.mxu0 %v8263_v48  ;;  %v3490_v56 = vpop.permute.xlu0 %3489 }
 0x6aa   : > { %6388 = vmatprep.subr.bf16.mxu1 %v8276_v40  ;;  %6404 = vmatprep.subr.bf16.mxu0 %v8276_v40  ;;  %vm3512_vm0 = vcmp.eq.s32.totalorder %v7169_v35, %v3490_v56 }
 0x6ab   : > { %v3520_v17 = vsel %vm3512_vm0, 1.0, %v6980_v26 }
 0x6ad   : > { %6389 = vmatpush3.bf16.msra.mxu1 %v8276_v40  ;;  %6405 = vmatpush3.bf16.msra.mxu0 %v8276_v40  ;;  %v3499_v38 = vpop.permute.xlu0 %3498 }
 0x6ae   : > { %6390 = vmatprep.subr.bf16.mxu1 %v8294_v27  ;;  %6406 = vmatprep.subr.bf16.mxu0 %v8294_v27  ;;  %vm3515_vm2 = vcmp.eq.s32.totalorder %v7169_v35, %v3499_v38 }
 0x6af   : > { %v3523_v62 = vsel %vm3515_vm2, 1.0, %v6980_v26 }
 0x6b1   : > { %6391 = vmatpush3.bf16.msra.mxu1 %v8294_v27  ;;  %6407 = vmatpush3.bf16.msra.mxu0 %v8294_v27  ;;  %v3505_v42 = vpop.permute.xlu0 %3504 }
 0x6b2   : > { %6416 = vmatprep.subr.bf16.mxu1 %v6711_v18  ;;  %6426 = vmatprep.subr.bf16.mxu0 %v6712_v0  ;;  %vm3517_vm4 = vcmp.eq.s32.totalorder %v7169_v35, %v3505_v42 }
 0x6b4   : > { %6393 = vmatmul.mubr.msk.bf16.vlgmr.msra.gmra.mxu1 %vm3109_vm8, %v3106_v33  ;;  %6409 = vmatmul.mubr.msk.bf16.vlgmr.msra.gmra.mxu0 %vm3109_vm8, %v3234_v58  ;;  %v8332_v58 = vpop.permute.xlu1 %3495 }
 0x6b5   : > { %6417 = vmatpush3.bf16.msra.mxu1 %v6711_v18  ;;  %6396 = vmatprep.mubr.msk.bf16.mxu1 %vm3109_vm8, %v3107_v11  ;;  %v8352_v50 = vpop.permute.xlu0 %3510  ;;  %v3528_v11 = vpack.c.bf16 %v3521_v8, %v3520_v17  ;;  %vm3514_vm1 = vcmp.eq.s32.totalorder %v7169_v35, %v8332_v58  ;;  %v3525_v58 = vsel %vm3517_vm4, 1.0, %v6980_v26 }
 0x6b6   : > { %6436 = vmatprep.subr.bf16.mxu1 %v8254_v31  ;;  %6412 = vmatprep.mubr.msk.bf16.mxu0 %vm3109_vm8, %v3235_v7  ;;  %v3522_v15 = vsel %vm3514_vm1, 1.0, %v6980_v26  ;;  %vm3519_vm7 = vcmp.eq.s32.totalorder %v7169_v35, %v8352_v50 }
 0x6b7   : > { %6427 = vmatpush3.bf16.msra.mxu0 %v6712_v0 }
 0x6b8   : > { %v8334_v61 = vpop.permute.xlu1 %3501 }
 0x6b9   : > { %v3712_v20 = vpop.permute.xlu0 %3711  ;;  %vm3516_vm3 = vcmp.eq.s32.totalorder %v7169_v35, %v8334_v61  ;;  %v3529_v61 = vpack.c.bf16 %v3523_v62, %v3522_v15 }
 0x6ba   : > { %v3524_v41 = vsel %vm3516_vm3, 1.0, %v6980_v26  ;;  %vm3732_vm11 = vcmp.eq.s32.totalorder %v7169_v35, %v3712_v20 }
 0x6bb   : > { %v3530_v56 = vpack.c.bf16 %v3525_v58, %v3524_v41 }
 0x6bc   : > { %6397 = vmatmul.mubr.msk.bf16.gmra.mxu1 %vm3109_vm8, %v3108_v5  ;;  %6413 = vmatmul.mubr.msk.bf16.gmra.mxu0 %vm3109_vm8, %v3236_v59  ;;  %v8336_v3 = vpop.permute.xlu1 %3507 }
 0x6bd   : > { %v3721_v21 = vpop.permute.xlu0 %3720  ;;  %vm3518_vm6 = vcmp.eq.s32.totalorder %v7169_v35, %v8336_v3 }
 0x6be   : > { %v3526_v3 = vsel %vm3518_vm6, 1.0, %v6980_v26  ;;  %vm3735_vm10 = vcmp.eq.s32.totalorder %v7169_v35, %v3721_v21 }
 0x6c0   : > { %v8338_v7 = vpop.permute.xlu1 %3708 }
 0x6c1   : > { %v3727_v5 = vpop.permute.xlu0 %3726  ;;  %vm3731_vm9 = vcmp.eq.s32.totalorder %v7169_v35, %v8338_v7 }
 0x6c2   : > { %vm3737_vm0 = vcmp.eq.s32.totalorder %v7169_v35, %v3727_v5 }
 0x6c4   : > { %v8340_v16 = vpop.permute.xlu1 %3714 }
 0x6c5   : > { %v3928_v38 = vpop.permute.xlu0 %3927  ;;  %vm3733_vm12 = vcmp.eq.s32.totalorder %v7169_v35, %v8340_v16 }
 0x6c6   : > { %v3741_v50 = vsel %vm3733_vm12, 1.0, %v6980_v26  ;;  %vm3950_vm2 = vcmp.eq.s32.totalorder %v7169_v35, %v3928_v38 }
 0x6c7   : > { %v3958_v20 = vsel %vm3950_vm2, 1.0, %v6980_v26 }
 0x6c8   : > { %v8342_v63 = vpop.permute.xlu1 %3717 }
 0x6c9   : > { %v3937_v7 = vpop.permute.xlu0 %3936  ;;  %vm3734_vm13 = vcmp.eq.s32.totalorder %v7169_v35, %v8342_v63 }
 0x6ca   : > { %v3742_v16 = vsel %vm3734_vm13, 1.0, %v6980_v26  ;;  %vm3953_vm4 = vcmp.eq.s32.totalorder %v7169_v35, %v3937_v7 }
 0x6cb   : > { %v3961_v8 = vsel %vm3953_vm4, 1.0, %v6980_v26 }
 0x6cc   : > { %v8344_v59 = vpop.permute.xlu1 %3723 }
 0x6cd   : > { %vm3736_vm14 = vcmp.eq.s32.totalorder %v7169_v35, %v8344_v59 }
 0x6ce   : > { %v3744_v63 = vsel %vm3736_vm14, 1.0, %v6980_v26 }
 0x6d0   : > { %v8346_v53 = vpop.permute.xlu1 %3729 }
 0x6d1   : > { %vm3738_vm15 = vcmp.eq.s32.totalorder %v7169_v35, %v8346_v53  ;;  %v3745_v53 = vsel %vm3737_vm0, 1.0, %v6980_v26 }
 0x6d4   : > { %v8348_v10 = vpop.permute.xlu1 %3930 }
 0x6d5   : > { %vm3951_vm1 = vcmp.eq.s32.totalorder %v7169_v35, %v8348_v10 }
 0x6d8   : > { %v8350_v44 = vpop.permute.xlu1 %3933 }
 0x6d9   : > { %vm3952_vm3 = vcmp.eq.s32.totalorder %v7169_v35, %v8350_v44 }
 0x6dc   : > { %v8356_v23 = vpop.permute.xlu1 %3939 }
 0x6dd   : > { %vm3954_vm6 = vcmp.eq.s32.totalorder %v7169_v35, %v8356_v23 }
 0x6de   : > { %v3962_v17 = vsel %vm3954_vm6, 1.0, %v6980_v26 }
 0x6e0   : > { %v8367_v34 = vpop.permute.xlu1 %3945 }
 0x6e4   : > { %v8385_v0 = vpop.permute.xlu1 %4146 }
 0x6e5   : > { %vm4169_vm12 = vcmp.eq.s32.totalorder %v7169_v35, %v8385_v0 }
 0x6e8   : > { %v8401_v42 = vpop.permute.xlu1 %4152 }
 0x6e9   : > { %vm4171_vm14 = vcmp.eq.s32.totalorder %v7169_v35, %v8401_v42 }
 0x6ea   : > { %v4179_v41 = vsel %vm4171_vm14, 1.0, %v6980_v26 }
 0x774   : > { %v6394_v32 = vpop.f32.mrf.mxu1  ;;  %v6410_v52 = vpop.f32.mrf.mxu0 }
 0x776   : > { %v3156_v25 = vpop.f32.mrf.mxu1  ;;  %v3283_v13 = vpop.f32.mrf.mxu0 }
 0x778   : > { %v6395_v47 = vpop.f32.mrf.mxu1  ;;  %v6411_v9 = vpop.f32.mrf.mxu0 }
 0x779   : > { %v3188_v28 = vpack.c.bf16 %v6395_v47, %v6394_v32  ;;  %v3315_v30 = vpack.c.bf16 %v6411_v9, %v6410_v52  ;;  %v3527_v32 = vsel %vm3519_vm7, 1.0, %v6980_v26  ;;  %v3739_v52 = vsel %vm3731_vm9, 1.0, %v6980_v26  ;;  %v8410_v9 = vpop.permute.xlu1 %4155 }
 0x77a   : > { %v3159_v57 = vpop.f32.mrf.mxu1  ;;  %v3286_v51 = vpop.f32.mrf.mxu0  ;;  %vm3956_vm9 = vcmp.eq.s32.totalorder %v7169_v35, %v8367_v34 }
 0x77b   : > { %v3187_v12 = vpack.c.bf16 %v3159_v57, %v3156_v25  ;;  %v3314_v36 = vpack.c.bf16 %v3286_v51, %v3283_v13  ;;  %v3740_v25 = vsel %vm3732_vm11, 1.0, %v6980_v26  ;;  %v3531_v13 = vpack.c.bf16 %v3527_v32, %v3526_v3 }
 0x77c   : > { %v6398_v14 = vpop.f32.mrf.mxu1  ;;  %v6414_v43 = vpop.f32.mrf.mxu0  ;;  %v3747_v47 = vpack.c.bf16 %v3740_v25, %v3739_v52  ;;  %v3743_v57 = vsel %vm3735_vm10, 1.0, %v6980_v26  ;;  %v3748_v51 = vpack.c.bf16 %v3742_v16, %v3741_v50  ;;  %vm4172_vm10 = vcmp.eq.s32.totalorder %v7169_v35, %v8410_v9 }
 0x77d   : > { %6418 = vmatprep.mubr.msk.bf16.mxu1 %vm3327_vm5, %v3314_v36  ;;  %6428 = vmatprep.mubr.msk.bf16.mxu0 %vm3327_vm5, %v3187_v12  ;;  %v8428_v59 = vpop.permute.xlu1 %4161  ;;  %v3749_v12 = vpack.c.bf16 %v3744_v63, %v3743_v57  ;;  %v4180_v58 = vsel %vm4172_vm10, 1.0, %v6980_v26 }
 0x77e   : > { %v3172_v60 = vpop.f32.mrf.mxu1  ;;  %v3299_v1 = vpop.f32.mrf.mxu0  ;;  %6419 = vmatmul.mubr.msk.bf16.vlgmr.msra.gmra.mxu1 %vm3327_vm5, %v3315_v30  ;;  %6429 = vmatmul.mubr.msk.bf16.vlgmr.msra.gmra.mxu0 %vm3327_vm5, %v3188_v28  ;;  %v3746_v30 = vsel %vm3738_vm15, 1.0, %v6980_v26  ;;  %vm4174_vm15 = vcmp.eq.s32.totalorder %v7169_v35, %v8428_v59  ;;  %v4186_v42 = vpack.c.bf16 %v4180_v58, %v4179_v41 }
 0x77f   : > { %6437 = vmatpush3.bf16.msra.mxu1 %v8254_v31  ;;  %v3943_v28 = vpop.permute.xlu0 %3942 }
 0x780   : > { %6438 = vmatprep.subr.bf16.mxu1 %v8263_v48  ;;  %v6399_v22 = vpop.f32.mrf.mxu1  ;;  %v6415_v4 = vpop.f32.mrf.mxu0  ;;  %vm3955_vm7 = vcmp.eq.s32.totalorder %v7169_v35, %v3943_v28 }
 0x781   : > { %v3190_v2 = vpack.c.bf16 %v6399_v22, %v6398_v14  ;;  %v3317_v33 = vpack.c.bf16 %v6415_v4, %v6414_v43  ;;  %v8443_v14 = vpop.permute.xlu1 %4167  ;;  %v3959_v43 = vsel %vm3951_vm1, 1.0, %v6980_v26  ;;  %v3960_v4 = vsel %vm3952_vm3, 1.0, %v6980_v26 }
 0x782   : > { %v3175_v6 = vpop.f32.mrf.mxu1  ;;  %v3302_v46 = vpop.f32.mrf.mxu0  ;;  %vm4176_vm1 = vcmp.eq.s32.totalorder %v7169_v35, %v8443_v14 }
 0x783   : > { %v3189_v39 = vpack.c.bf16 %v3175_v6, %v3172_v60  ;;  %v3316_v18 = vpack.c.bf16 %v3302_v46, %v3299_v1  ;;  %6439 = vmatpush3.bf16.msra.mxu1 %v8263_v48  ;;  %v3949_v36 = vpop.permute.xlu0 %3948  ;;  %v3750_v60 = vpack.c.bf16 %v3746_v30, %v3745_v53  ;;  %v3966_v1 = vpack.c.bf16 %v3959_v43, %v3958_v20 }
 0x784   : > { %6440 = vmatprep.subr.bf16.mxu1 %v8276_v40  ;;  %v3967_v6 = vpack.c.bf16 %v3961_v8, %v3960_v4  ;;  %vm3957_vm11 = vcmp.eq.s32.totalorder %v7169_v35, %v3949_v36  ;;  %v4184_v25 = vsel %vm4176_vm1, 1.0, %v6980_v26 }
 0x785   : > { %6422 = vmatprep.mubr.msk.bf16.mxu1 %vm3327_vm5, %v3316_v18  ;;  %6432 = vmatprep.mubr.msk.bf16.mxu0 %vm3327_vm5, %v3189_v39  ;;  %v8449_v22 = vpop.permute.xlu1 %4368  ;;  %v3964_v18 = vsel %vm3956_vm9, 1.0, %v6980_v26  ;;  %v3965_v21 = vsel %vm3957_vm11, 1.0, %v6980_v26 }
 0x786   : > { %6423 = vmatmul.mubr.msk.bf16.gmra.mxu1 %vm3327_vm5, %v3317_v33  ;;  %6433 = vmatmul.mubr.msk.bf16.gmra.mxu0 %vm3327_vm5, %v3190_v2  ;;  %v3963_v2 = vsel %vm3955_vm7, 1.0, %v6980_v26  ;;  %v4177_v33 = vsel %vm4169_vm12, 1.0, %v6980_v26  ;;  %v3969_v62 = vpack.c.bf16 %v3965_v21, %v3964_v18  ;;  %vm4389_vm3 = vcmp.eq.s32.totalorder %v7169_v35, %v8449_v22  ;;  %v6713_v22 = vld [vmem:[%s8739_s7 + $0x10] sm:$0xff]  }
 0x787   : > { %6441 = vmatpush3.bf16.msra.mxu1 %v8276_v40  ;;  %6444 = vmatprep.mubr.msk.bf16.mxu1 %vm3109_vm8, %v3528_v11  ;;  %v4150_v10 = vpop.permute.xlu0 %4149  ;;  %v3968_v46 = vpack.c.bf16 %v3963_v2, %v3962_v17 }
 0x788   : > { %6442 = vmatprep.subr.bf16.mxu1 %v8294_v27  ;;  %vm4170_vm13 = vcmp.eq.s32.totalorder %v7169_v35, %v4150_v10  ;;  %6452 = vmatprep.subr.bf16.mxu0 %v6713_v22 }
 0x789   : > { %v8466_v23 = vpop.permute.xlu1 %4371  ;;  %v4178_v11 = vsel %vm4170_vm13, 1.0, %v6980_v26  ;;  %6453 = vmatpush3.bf16.msra.mxu0 %v6713_v22 }
 0x78a   : > { %v4185_v5 = vpack.c.bf16 %v4178_v11, %v4177_v33  ;;  %vm4390_vm6 = vcmp.eq.s32.totalorder %v7169_v35, %v8466_v23 }
 0x78b   : > { %6443 = vmatpush3.bf16.msra.mxu1 %v8294_v27  ;;  %v4159_v44 = vpop.permute.xlu0 %4158  ;;  %v4398_v63 = vsel %vm4390_vm6, 1.0, %v6980_v26 }
 0x78c   : > { %6462 = vmatprep.subr.bf16.mxu1 %v8254_v31  ;;  %vm4173_vm0 = vcmp.eq.s32.totalorder %v7169_v35, %v4159_v44 }
 0x78d   : > { %v4378_v34 = vpop.permute.xlu1 %4377  ;;  %v4181_v38 = vsel %vm4173_vm0, 1.0, %v6980_v26 }
 0x78e   : > { %6445 = vmatmul.mubr.msk.bf16.vlgmr.msra.gmra.mxu1 %vm3109_vm8, %v3529_v61  ;;  %vm4392_vm9 = vcmp.eq.s32.totalorder %v7169_v35, %v4378_v34 }
 0x78f   : > { %6463 = vmatpush3.bf16.msra.mxu1 %v8254_v31  ;;  %6448 = vmatprep.mubr.msk.bf16.mxu1 %vm3109_vm8, %v3530_v56  ;;  %v4165_v39 = vpop.permute.xlu0 %4164  ;;  %v4182_v56 = vsel %vm4174_vm15, 1.0, %v6980_v26 }
 0x790   : > { %6464 = vmatprep.subr.bf16.mxu1 %v8263_v48  ;;  %v4187_v3 = vpack.c.bf16 %v4182_v56, %v4181_v38  ;;  %vm4175_vm2 = vcmp.eq.s32.totalorder %v7169_v35, %v4165_v39 }
 0x791   : > { %v4384_v0 = vpop.permute.xlu1 %4383  ;;  %v4183_v7 = vsel %vm4175_vm2, 1.0, %v6980_v26 }
 0x792   : > { %v4188_v50 = vpack.c.bf16 %v4184_v25, %v4183_v7  ;;  %vm4394_vm12 = vcmp.eq.s32.totalorder %v7169_v35, %v4384_v0 }
 0x793   : > { %6465 = vmatpush3.bf16.msra.mxu1 %v8263_v48  ;;  %v4366_v15 = vpop.permute.xlu0 %4365  ;;  %v4402_v20 = vsel %vm4394_vm12, 1.0, %v6980_v26 }
 0x794   : > { %6466 = vmatprep.subr.bf16.mxu1 %v8276_v40  ;;  %vm4388_vm4 = vcmp.eq.s32.totalorder %v7169_v35, %v4366_v15 }
 0x795   : > { %v4585_v32 = vpop.permute.xlu1 %4584 }
 0x796   : > { %6449 = vmatmul.mubr.msk.bf16.gmra.mxu1 %vm3109_vm8, %v3531_v13  ;;  %v4397_v13 = vsel %vm4389_vm3, 1.0, %v6980_v26  ;;  %vm4607_vm14 = vcmp.eq.s32.totalorder %v7169_v35, %v4585_v32 }
 0x797   : > { %6467 = vmatpush3.bf16.msra.mxu1 %v8276_v40  ;;  %6470 = vmatprep.mubr.msk.bf16.mxu1 %vm3109_vm8, %v3747_v47  ;;  %v4375_v61 = vpop.permute.xlu0 %4374  ;;  %v4396_v47 = vsel %vm4388_vm4, 1.0, %v6980_v26 }
 0x798   : > { %6468 = vmatprep.subr.bf16.mxu1 %v8294_v27  ;;  %v4404_v16 = vpack.c.bf16 %v4397_v13, %v4396_v47  ;;  %vm4391_vm7 = vcmp.eq.s32.totalorder %v7169_v35, %v4375_v61 }
 0x799   : > { %v4591_v9 = vpop.permute.xlu1 %4590  ;;  %v4399_v57 = vsel %vm4391_vm7, 1.0, %v6980_v26 }
 0x79a   : > { %v4405_v30 = vpack.c.bf16 %v4399_v57, %v4398_v63  ;;  %vm4609_vm15 = vcmp.eq.s32.totalorder %v7169_v35, %v4591_v9 }
 0x79b   : > { %6469 = vmatpush3.bf16.msra.mxu1 %v8294_v27  ;;  %v4381_v52 = vpop.permute.xlu0 %4380  ;;  %v4617_v2 = vsel %vm4609_vm15, 1.0, %v6980_v26 }
 0x79c   : > { %6488 = vmatprep.subr.bf16.mxu1 %v8254_v31  ;;  %vm4393_vm11 = vcmp.eq.s32.totalorder %v7169_v35, %v4381_v52 }
 0x79d   : > { %v4401_v36 = vsel %vm4393_vm11, 1.0, %v6980_v26 }
 0x79e   : > { %6471 = vmatmul.mubr.msk.bf16.vlgmr.msra.gmra.mxu1 %vm3109_vm8, %v3748_v51  ;;  %v4594_v51 = vpop.permute.xlu1 %4593 }
 0x79f   : > { %6489 = vmatpush3.bf16.msra.mxu1 %v8254_v31  ;;  %6474 = vmatprep.mubr.msk.bf16.mxu1 %vm3109_vm8, %v3749_v12  ;;  %v4387_v28 = vpop.permute.xlu0 %4386  ;;  %v4400_v12 = vsel %vm4392_vm9, 1.0, %v6980_v26  ;;  %vm4610_vm0 = vcmp.eq.s32.totalorder %v7169_v35, %v4594_v51 }
 0x7a0   : > { %6490 = vmatprep.subr.bf16.mxu1 %v8263_v48  ;;  %v4406_v53 = vpack.c.bf16 %v4401_v36, %v4400_v12  ;;  %vm4395_vm13 = vcmp.eq.s32.totalorder %v7169_v35, %v4387_v28  ;;  %v4618_v23 = vsel %vm4610_vm0, 1.0, %v6980_v26 }
 0x7a1   : > { %v4403_v10 = vsel %vm4395_vm13, 1.0, %v6980_v26  ;;  %v4624_v21 = vpack.c.bf16 %v4618_v23, %v4617_v2 }
 0x7a2   : > { %v4600_v14 = vpop.permute.xlu1 %4599  ;;  %v4407_v4 = vpack.c.bf16 %v4403_v10, %v4402_v20 }
 0x7a3   : > { %6491 = vmatpush3.bf16.msra.mxu1 %v8263_v48  ;;  %v4588_v59 = vpop.permute.xlu0 %4587  ;;  %vm4612_vm1 = vcmp.eq.s32.totalorder %v7169_v35, %v4600_v14 }
 0x7a4   : > { %6492 = vmatprep.subr.bf16.mxu1 %v8276_v40  ;;  %vm4608_vm10 = vcmp.eq.s32.totalorder %v7169_v35, %v4588_v59  ;;  %v4620_v39 = vsel %vm4612_vm1, 1.0, %v6980_v26 }
 0x7a6   : > { %6475 = vmatmul.mubr.msk.bf16.gmra.mxu1 %vm3109_vm8, %v3750_v60  ;;  %v4615_v60 = vsel %vm4607_vm14, 1.0, %v6980_v26  ;;  %v4606_v44 = vpop.permute.xlu1 %4605 }
 0x7a7   : > { %6493 = vmatpush3.bf16.msra.mxu1 %v8276_v40  ;;  %6496 = vmatprep.mubr.msk.bf16.mxu1 %vm3109_vm8, %v3966_v1  ;;  %v4597_v43 = vpop.permute.xlu0 %4596  ;;  %v4616_v1 = vsel %vm4608_vm10, 1.0, %v6980_v26  ;;  %vm4614_vm6 = vcmp.eq.s32.totalorder %v7169_v35, %v4606_v44 }
 0x7a8   : > { %6494 = vmatprep.subr.bf16.mxu1 %v8294_v27  ;;  %v4623_v8 = vpack.c.bf16 %v4616_v1, %v4615_v60  ;;  %vm4611_vm2 = vcmp.eq.s32.totalorder %v7169_v35, %v4597_v43 }
 0x7a9   : > { %v4619_v18 = vsel %vm4611_vm2, 1.0, %v6980_v26 }
 0x7aa   : > { %v4625_v34 = vpack.c.bf16 %v4620_v39, %v4619_v18  ;;  %v6715_v39 = vld [vmem:[%s8739_s7 + $0x20] sm:$0xff]  }
 0x7ab   : > { %6495 = vmatpush3.bf16.msra.mxu1 %v8294_v27  ;;  %v4603_v17 = vpop.permute.xlu0 %4602 }
 0x7ac   : > { %6514 = vmatprep.subr.bf16.mxu1 %v8254_v31  ;;  %vm4613_vm7 = vcmp.eq.s32.totalorder %v7169_v35, %v4603_v17 }
 0x7ad   : > { %v4621_v0 = vsel %vm4613_vm7, 1.0, %v6980_v26 }
 0x7ae   : > { %6497 = vmatmul.mubr.msk.bf16.vlgmr.msra.gmra.mxu1 %vm3109_vm8, %v3967_v6  ;;  %v4807_v6 = vpop.permute.xlu1 %4806 }
 0x7af   : > { %6515 = vmatpush3.bf16.msra.mxu1 %v8254_v31  ;;  %6500 = vmatprep.mubr.msk.bf16.mxu1 %vm3109_vm8, %v3968_v46  ;;  %v4804_v46 = vpop.permute.xlu0 %4803  ;;  %vm4827_vm3 = vcmp.eq.s32.totalorder %v7169_v35, %v4807_v6 }
 0x7b0   : > { %6516 = vmatprep.subr.bf16.mxu1 %v8263_v48  ;;  %vm4826_vm4 = vcmp.eq.s32.totalorder %v7169_v35, %v4804_v46  ;;  %v4835_v15 = vsel %vm4827_vm3, 1.0, %v6980_v26 }
 0x7b2   : > { %v4810_v33 = vpop.permute.xlu1 %4809 }
 0x7b3   : > { %6517 = vmatpush3.bf16.msra.mxu1 %v8263_v48  ;;  %v4813_v11 = vpop.permute.xlu0 %4812  ;;  %vm4828_vm9 = vcmp.eq.s32.totalorder %v7169_v35, %v4810_v33 }
 0x7b4   : > { %6518 = vmatprep.subr.bf16.mxu1 %v8276_v40  ;;  %vm4829_vm11 = vcmp.eq.s32.totalorder %v7169_v35, %v4813_v11 }
 0x7b5   : > { %v4837_v38 = vsel %vm4829_vm11, 1.0, %v6980_v26 }
 0x7b6   : > { %6501 = vmatmul.mubr.msk.bf16.gmra.mxu1 %vm3109_vm8, %v3969_v62  ;;  %v4834_v62 = vsel %vm4826_vm4, 1.0, %v6980_v26  ;;  %v4816_v61 = vpop.permute.xlu1 %4815 }
 0x7b7   : > { %6519 = vmatpush3.bf16.msra.mxu1 %v8276_v40  ;;  %6522 = vmatprep.mubr.msk.bf16.mxu1 %vm3109_vm8, %v4185_v5  ;;  %v4622_v5 = vsel %vm4614_vm6, 1.0, %v6980_v26  ;;  %v4842_v41 = vpack.c.bf16 %v4835_v15, %v4834_v62  ;;  %v4819_v56 = vpop.permute.xlu0 %4818  ;;  %vm4830_vm12 = vcmp.eq.s32.totalorder %v7169_v35, %v4816_v61 }
 0x7b8   : > { %6520 = vmatprep.subr.bf16.mxu1 %v8294_v27  ;;  %v4626_v58 = vpack.c.bf16 %v4622_v5, %v4621_v0  ;;  %vm4831_vm13 = vcmp.eq.s32.totalorder %v7169_v35, %v4819_v56 }
 0x7ba   : > { %v4822_v32 = vpop.permute.xlu1 %4821 }
 0x7bb   : > { %6521 = vmatpush3.bf16.msra.mxu1 %v8294_v27  ;;  %vm4832_vm14 = vcmp.eq.s32.totalorder %v7169_v35, %v4822_v32 }
 0x7bc   : > { %6540 = vmatprep.subr.bf16.mxu1 %v8254_v31  ;;  %v4840_v7 = vsel %vm4832_vm14, 1.0, %v6980_v26 }
 0x7be   : > { %6523 = vmatmul.mubr.msk.bf16.vlgmr.msra.gmra.mxu1 %vm3109_vm8, %v4186_v42  ;;  %v4838_v42 = vsel %vm4830_vm12, 1.0, %v6980_v26 }
 0x7bf   : > { %6541 = vmatpush3.bf16.msra.mxu1 %v8254_v31  ;;  %6526 = vmatprep.mubr.msk.bf16.mxu1 %vm3109_vm8, %v4187_v3  ;;  %v4839_v3 = vsel %vm4831_vm13, 1.0, %v6980_v26 }
 0x7c0   : > { %6542 = vmatprep.subr.bf16.mxu1 %v8263_v48  ;;  %v4844_v25 = vpack.c.bf16 %v4839_v3, %v4838_v42 }
 0x7c3   : > { %6543 = vmatpush3.bf16.msra.mxu1 %v8263_v48 }
 0x7c4   : > { %6544 = vmatprep.subr.bf16.mxu1 %v8276_v40 }
 0x7c6   : > { %6527 = vmatmul.mubr.msk.bf16.gmra.mxu1 %vm3109_vm8, %v4188_v50 }
 0x7c7   : > { %6545 = vmatpush3.bf16.msra.mxu1 %v8276_v40  ;;  %6548 = vmatprep.mubr.msk.bf16.mxu1 %vm3109_vm8, %v4404_v16 }
 0x7c8   : > { %6546 = vmatprep.subr.bf16.mxu1 %v8294_v27 }
 0x7cb   : > { %6547 = vmatpush3.bf16.msra.mxu1 %v8294_v27 }
 0x7cc   : > { %6566 = vmatprep.subr.bf16.mxu1 %v8254_v31 }
 0x7ce   : > { %6549 = vmatmul.mubr.msk.bf16.vlgmr.msra.gmra.mxu1 %vm3109_vm8, %v4405_v30 }
 0x7cf   : > { %6567 = vmatpush3.bf16.msra.mxu1 %v8254_v31  ;;  %6552 = vmatprep.mubr.msk.bf16.mxu1 %vm3109_vm8, %v4406_v53 }
 0x7d0   : > { %6568 = vmatprep.subr.bf16.mxu1 %v8263_v48 }
 0x7d3   : > { %6569 = vmatpush3.bf16.msra.mxu1 %v8263_v48 }
 0x7d4   : > { %6570 = vmatprep.subr.bf16.mxu1 %v8276_v40 }
 0x7d6   : > { %6553 = vmatmul.mubr.msk.bf16.gmra.mxu1 %vm3109_vm8, %v4407_v4 }
 0x7d7   : > { %6571 = vmatpush3.bf16.msra.mxu1 %v8276_v40  ;;  %6574 = vmatprep.mubr.msk.bf16.mxu1 %vm3109_vm8, %v4623_v8 }
 0x7d8   : > { %6572 = vmatprep.subr.bf16.mxu1 %v8294_v27 }
 0x7db   : > { %6573 = vmatpush3.bf16.msra.mxu1 %v8294_v27 }
 0x7dc   : > { %6592 = vmatprep.subr.bf16.mxu1 %v8254_v31 }
 0x7de   : > { %6575 = vmatmul.mubr.msk.bf16.vlgmr.msra.gmra.mxu1 %vm3109_vm8, %v4624_v21 }
 0x7df   : > { %6593 = vmatpush3.bf16.msra.mxu1 %v8254_v31  ;;  %6578 = vmatprep.mubr.msk.bf16.mxu1 %vm3109_vm8, %v4625_v34  ;;  %v8580_v31 = vld [vmem:[%s8739_s7 + $0x18] sm:$0xff]  }
 0x7e0   : > { %6594 = vmatprep.subr.bf16.mxu1 %v8263_v48  ;;  %6478 = vmatprep.subr.bf16.mxu0 %v8580_v31 }
 0x7e3   : > { %6595 = vmatpush3.bf16.msra.mxu1 %v8263_v48  ;;  %v4836_v48 = vsel %vm4828_vm9, 1.0, %v6980_v26 }
 0x7e4   : > { %6596 = vmatprep.subr.bf16.mxu1 %v8276_v40  ;;  %v4843_v52 = vpack.c.bf16 %v4837_v38, %v4836_v48 }
 0x7e6   : > { %6579 = vmatmul.mubr.msk.bf16.gmra.mxu1 %vm3109_vm8, %v4626_v58 }
 0x7e7   : > { %6597 = vmatpush3.bf16.msra.mxu1 %v8276_v40  ;;  %6600 = vmatprep.mubr.msk.bf16.mxu1 %vm3109_vm8, %v4842_v41  ;;  %v4825_v40 = vpop.permute.xlu0 %4824 }
 0x7e8   : > { %6598 = vmatprep.subr.bf16.mxu1 %v8294_v27  ;;  %vm4833_vm10 = vcmp.eq.s32.totalorder %v7169_v35, %v4825_v40 }
 0x7e9   : > { %v4841_v13 = vsel %vm4833_vm10, 1.0, %v6980_v26 }
 0x7ea   : > { %v4845_v47 = vpack.c.bf16 %v4841_v13, %v4840_v7 }
 0x7eb   : > { %6599 = vmatpush3.bf16.msra.mxu1 %v8294_v27 }
 0x7ee   : > { %6601 = vmatmul.mubr.msk.bf16.vlgmr.msra.gmra.mxu1 %vm3109_vm8, %v4843_v52 }
 0x7ef   : > { %6604 = vmatprep.mubr.msk.bf16.mxu1 %vm3109_vm8, %v4844_v25 }
 0x7f6   : > { %6605 = vmatmul.mubr.msk.bf16.gmra.mxu1 %vm3109_vm8, %v4845_v47  ;;  %vm5196_vm8 = vcmp.lt.s32.totalorder %v7169_v35, 4 }
 0x83e   : > { %v6420_v27 = vpop.f32.mrf.mxu1  ;;  %v6430_v9 = vpop.f32.mrf.mxu0 }
 0x83f   : > { %v8604_v50 = vadd.f32 %v6430_v9, %v6420_v27  ;;  %v6717_v27 = vld [vmem:[%s8739_s7 + $0x30] sm:$0xff]  }
 0x840   : > { %v3374_v16 = vpop.f32.mrf.mxu1  ;;  %v3457_v28 = vpop.f32.mrf.mxu0 }
 0x841   : > { %v8606_v63 = vadd.f32 %v3457_v28, %v3374_v16 }
 0x842   : > { %v6421_v57 = vpop.f32.mrf.mxu1  ;;  %v6431_v59 = vpop.f32.mrf.mxu0 }
 0x843   : > { %v8608_v51 = vadd.f32 %v6431_v59, %v6421_v57 }
 0x844   : > { %v3377_v12 = vpop.f32.mrf.mxu1  ;;  %v3460_v36 = vpop.f32.mrf.mxu0 }
 0x845   : > { %v8610_v30 = vadd.f32 %v3460_v36, %v3377_v12 }
 0x846   : > { %v6424_v26 = vpop.f32.mrf.mxu1  ;;  %v6434_v53 = vpop.f32.mrf.mxu0 }
 0x847   : > { %v8612_v14 = vadd.f32 %v6434_v53, %v6424_v26 }
 0x848   : > { %v3390_v43 = vpop.f32.mrf.mxu1  ;;  %v3473_v20 = vpop.f32.mrf.mxu0 }
 0x849   : > { %v8614_v10 = vadd.f32 %v3473_v20, %v3390_v43 }
 0x84a   : > { %v6425_v60 = vpop.f32.mrf.mxu1  ;;  %v6435_v1 = vpop.f32.mrf.mxu0 }
 0x84b   : > { %v8616_v22 = vadd.f32 %v6435_v1, %v6425_v60  ;;  %v6718_v1 = vld [vmem:[%s8739_s7 + $0x38] sm:$0xff]  }
 0x84c   : > { %v8618_v4 = vpop.f32.mrf.mxu1 }
 0x84e   : > { %v6446_v8 = vpop.f32.mrf.mxu1 }
 0x850   : > { %v3578_v44 = vpop.f32.mrf.mxu1 }
 0x852   : > { %v6447_v17 = vpop.f32.mrf.mxu1 }
 0x853   : > { %v3610_v6 = vpack.c.bf16 %v6447_v17, %v6446_v8 }
 0x854   : > { %v3581_v2 = vpop.f32.mrf.mxu1 }
 0x855   : > { %v3609_v23 = vpack.c.bf16 %v3581_v2, %v3578_v44 }
 0x856   : > { %v6450_v46 = vpop.f32.mrf.mxu1 }
 0x857   : > { %6454 = vmatprep.mubr.msk.bf16.mxu0 %vm3327_vm5, %v3609_v23 }
 0x858   : > { %v3594_v18 = vpop.f32.mrf.mxu1  ;;  %6455 = vmatmul.mubr.msk.bf16.vlgmr.msra.gmra.mxu0 %vm3327_vm5, %v3610_v6 }
 0x859   : > { %6479 = vmatpush3.bf16.msra.mxu0 %v8580_v31  ;;  %v6716_v31 = vld [vmem:[%s8739_s7 + $0x28] sm:$0xff]  }
 0x85a   : > { %v6451_v21 = vpop.f32.mrf.mxu1  ;;  %6504 = vmatprep.subr.bf16.mxu0 %v6715_v39 }
 0x85b   : > { %v3612_v11 = vpack.c.bf16 %v6451_v21, %v6450_v46 }
 0x85c   : > { %v3597_v34 = vpop.f32.mrf.mxu1 }
 0x85d   : > { %v3611_v33 = vpack.c.bf16 %v3597_v34, %v3594_v18 }
 0x85e   : > { %v6472_v15 = vpop.f32.mrf.mxu1 }
 0x85f   : > { %6458 = vmatprep.mubr.msk.bf16.mxu0 %vm3327_vm5, %v3611_v33 }
 0x860   : > { %6459 = vmatmul.mubr.msk.bf16.gmra.mxu0 %vm3327_vm5, %v3612_v11  ;;  %v3797_v62 = vpop.f32.mrf.mxu1  ;;  %v6719_v11 = vld [vmem:[%s8739_s7 + $0x40] sm:$0xff]  }
 0x862   : > { %v6473_v5 = vpop.f32.mrf.mxu1 }
 0x863   : > { %v3829_v58 = vpack.c.bf16 %v6473_v5, %v6472_v15 }
 0x864   : > { %v3800_v0 = vpop.f32.mrf.mxu1 }
 0x865   : > { %v3828_v41 = vpack.c.bf16 %v3800_v0, %v3797_v62 }
 0x866   : > { %v6476_v61 = vpop.f32.mrf.mxu1 }
 0x867   : > { %6480 = vmatprep.mubr.msk.bf16.mxu0 %vm3327_vm5, %v3828_v41 }
 0x868   : > { %v3813_v56 = vpop.f32.mrf.mxu1  ;;  %6481 = vmatmul.mubr.msk.bf16.vlgmr.msra.gmra.mxu0 %vm3327_vm5, %v3829_v58 }
 0x869   : > { %6505 = vmatpush3.bf16.msra.mxu0 %v6715_v39 }
 0x86a   : > { %v6477_v48 = vpop.f32.mrf.mxu1  ;;  %6530 = vmatprep.subr.bf16.mxu0 %v6716_v31 }
 0x86b   : > { %v3831_v3 = vpack.c.bf16 %v6477_v48, %v6476_v61 }
 0x86c   : > { %v3816_v38 = vpop.f32.mrf.mxu1 }
 0x86d   : > { %v3830_v42 = vpack.c.bf16 %v3816_v38, %v3813_v56 }
 0x86e   : > { %v6498_v32 = vpop.f32.mrf.mxu1 }
 0x86f   : > { %6484 = vmatprep.mubr.msk.bf16.mxu0 %vm3327_vm5, %v3830_v42 }
 0x870   : > { %6485 = vmatmul.mubr.msk.bf16.gmra.mxu0 %vm3327_vm5, %v3831_v3  ;;  %v4016_v40 = vpop.f32.mrf.mxu1 }
 0x872   : > { %v6499_v52 = vpop.f32.mrf.mxu1 }
 0x873   : > { %v4048_v13 = vpack.c.bf16 %v6499_v52, %v6498_v32 }
 0x874   : > { %v4019_v25 = vpop.f32.mrf.mxu1 }
 0x875   : > { %v4047_v7 = vpack.c.bf16 %v4019_v25, %v4016_v40 }
 0x876   : > { %v6502_v47 = vpop.f32.mrf.mxu1 }
 0x877   : > { %6506 = vmatprep.mubr.msk.bf16.mxu0 %vm3327_vm5, %v4047_v7 }
 0x878   : > { %v4032_v9 = vpop.f32.mrf.mxu1  ;;  %6507 = vmatmul.mubr.msk.bf16.vlgmr.msra.gmra.mxu0 %vm3327_vm5, %v4048_v13 }
 0x879   : > { %6531 = vmatpush3.bf16.msra.mxu0 %v6716_v31 }
 0x87a   : > { %v6503_v16 = vpop.f32.mrf.mxu1  ;;  %6556 = vmatprep.subr.bf16.mxu0 %v6717_v27 }
 0x87b   : > { %v4050_v59 = vpack.c.bf16 %v6503_v16, %v6502_v47 }
 0x87c   : > { %v4035_v28 = vpop.f32.mrf.mxu1 }
 0x87d   : > { %v4049_v57 = vpack.c.bf16 %v4035_v28, %v4032_v9 }
 0x87e   : > { %v6524_v12 = vpop.f32.mrf.mxu1 }
 0x87f   : > { %6510 = vmatprep.mubr.msk.bf16.mxu0 %vm3327_vm5, %v4049_v57 }
 0x880   : > { %6511 = vmatmul.mubr.msk.bf16.gmra.mxu0 %vm3327_vm5, %v4050_v59  ;;  %v4235_v36 = vpop.f32.mrf.mxu1 }
 0x882   : > { %v6525_v26 = vpop.f32.mrf.mxu1 }
 0x883   : > { %v4267_v20 = vpack.c.bf16 %v6525_v26, %v6524_v12 }
 0x884   : > { %v4238_v53 = vpop.f32.mrf.mxu1 }
 0x885   : > { %v4266_v43 = vpack.c.bf16 %v4238_v53, %v4235_v36  ;;  %v3476_v53 = vpop.f32.mrf.mxu0 }
 0x886   : > { %v6528_v60 = vpop.f32.mrf.mxu1 }
 0x887   : > { %6532 = vmatprep.mubr.msk.bf16.mxu0 %vm3327_vm5, %v4266_v43 }
 0x888   : > { %v4251_v8 = vpop.f32.mrf.mxu1  ;;  %6533 = vmatmul.mubr.msk.bf16.vlgmr.msra.gmra.mxu0 %vm3327_vm5, %v4267_v20 }
 0x889   : > { %6557 = vmatpush3.bf16.msra.mxu0 %v6717_v27 }
 0x88a   : > { %v6529_v44 = vpop.f32.mrf.mxu1  ;;  %6582 = vmatprep.subr.bf16.mxu0 %v6718_v1 }
 0x88b   : > { %v4269_v23 = vpack.c.bf16 %v6529_v44, %v6528_v60 }
 0x88c   : > { %v4254_v17 = vpop.f32.mrf.mxu1 }
 0x88d   : > { %v4268_v2 = vpack.c.bf16 %v4254_v17, %v4251_v8 }
 0x88e   : > { %v6550_v6 = vpop.f32.mrf.mxu1 }
 0x88f   : > { %6536 = vmatprep.mubr.msk.bf16.mxu0 %vm3327_vm5, %v4268_v2 }
 0x890   : > { %6537 = vmatmul.mubr.msk.bf16.gmra.mxu0 %vm3327_vm5, %v4269_v23  ;;  %v4454_v46 = vpop.f32.mrf.mxu1 }
 0x892   : > { %v6551_v39 = vpop.f32.mrf.mxu1 }
 0x893   : > { %v4486_v34 = vpack.c.bf16 %v6551_v39, %v6550_v6 }
 0x894   : > { %v4457_v18 = vpop.f32.mrf.mxu1 }
 0x895   : > { %v4485_v21 = vpack.c.bf16 %v4457_v18, %v4454_v46 }
 0x896   : > { %v6554_v33 = vpop.f32.mrf.mxu1 }
 0x897   : > { %6558 = vmatprep.mubr.msk.bf16.mxu0 %vm3327_vm5, %v4485_v21  ;;  %v3477_v21 = vadd.f32 %v3476_v53, %v8618_v4 }
 0x898   : > { %v4470_v15 = vpop.f32.mrf.mxu1  ;;  %6559 = vmatmul.mubr.msk.bf16.vlgmr.msra.gmra.mxu0 %vm3327_vm5, %v4486_v34 }
 0x899   : > { %6583 = vmatpush3.bf16.msra.mxu0 %v6718_v1 }
 0x89a   : > { %v6555_v62 = vpop.f32.mrf.mxu1  ;;  %6608 = vmatprep.subr.bf16.mxu0 %v6719_v11 }
 0x89b   : > { %v4488_v41 = vpack.c.bf16 %v6555_v62, %v6554_v33 }
 0x89c   : > { %v4473_v5 = vpop.f32.mrf.mxu1 }
 0x89d   : > { %v4487_v0 = vpack.c.bf16 %v4473_v5, %v4470_v15 }
 0x89e   : > { %v6576_v58 = vpop.f32.mrf.mxu1 }
 0x89f   : > { %6562 = vmatprep.mubr.msk.bf16.mxu0 %vm3327_vm5, %v4487_v0 }
 0x8a0   : > { %6563 = vmatmul.mubr.msk.bf16.gmra.mxu0 %vm3327_vm5, %v4488_v41  ;;  %v4673_v61 = vpop.f32.mrf.mxu1 }
 0x8a2   : > { %v6577_v31 = vpop.f32.mrf.mxu1 }
 0x8a3   : > { %v4705_v38 = vpack.c.bf16 %v6577_v31, %v6576_v58 }
 0x8a4   : > { %v4676_v56 = vpop.f32.mrf.mxu1 }
 0x8a5   : > { %v4704_v48 = vpack.c.bf16 %v4676_v56, %v4673_v61 }
 0x8a6   : > { %v6580_v42 = vpop.f32.mrf.mxu1 }
 0x8a7   : > { %6584 = vmatprep.mubr.msk.bf16.mxu0 %vm3327_vm5, %v4704_v48 }
 0x8a8   : > { %v4689_v3 = vpop.f32.mrf.mxu1  ;;  %6585 = vmatmul.mubr.msk.bf16.vlgmr.msra.gmra.mxu0 %vm3327_vm5, %v4705_v38 }
 0x8a9   : > { %6609 = vmatpush3.bf16.msra.mxu0 %v6719_v11 }
 0x8aa   : > { %v6581_v32 = vpop.f32.mrf.mxu1 }
 0x8ab   : > { %v4707_v25 = vpack.c.bf16 %v6581_v32, %v6580_v42 }
 0x8ac   : > { %v4692_v40 = vpop.f32.mrf.mxu1 }
 0x8ad   : > { %v4706_v52 = vpack.c.bf16 %v4692_v40, %v4689_v3 }
 0x8ae   : > { %v6602_v7 = vpop.f32.mrf.mxu1 }
 0x8af   : > { %6588 = vmatprep.mubr.msk.bf16.mxu0 %vm3327_vm5, %v4706_v52 }
 0x8b0   : > { %6589 = vmatmul.mubr.msk.bf16.gmra.mxu0 %vm3327_vm5, %v4707_v25  ;;  %v4892_v13 = vpop.f32.mrf.mxu1 }
 0x8b2   : > { %v6603_v47 = vpop.f32.mrf.mxu1 }
 0x8b3   : > { %v4924_v16 = vpack.c.bf16 %v6603_v47, %v6602_v7 }
 0x8b4   : > { %v4895_v27 = vpop.f32.mrf.mxu1 }
 0x8b5   : > { %v4923_v9 = vpack.c.bf16 %v4895_v27, %v4892_v13 }
 0x8b6   : > { %v6606_v28 = vpop.f32.mrf.mxu1 }
 0x8b7   : > { %6610 = vmatprep.mubr.msk.bf16.mxu0 %vm3327_vm5, %v4923_v9 }
 0x8b8   : > { %v4908_v57 = vpop.f32.mrf.mxu1  ;;  %6611 = vmatmul.mubr.msk.bf16.vlgmr.msra.gmra.mxu0 %vm3327_vm5, %v4924_v16 }
 0x8ba   : > { %v6607_v59 = vpop.f32.mrf.mxu1 }
 0x8bb   : > { %v4926_v26 = vpack.c.bf16 %v6607_v59, %v6606_v28 }
 0x8bc   : > { %v4911_v12 = vpop.f32.mrf.mxu1 }
 0x8bd   : > { %v4925_v36 = vpack.c.bf16 %v4911_v12, %v4908_v57 }
 0x8bf   : > { %6614 = vmatprep.mubr.msk.bf16.mxu0 %vm3327_vm5, %v4925_v36 }
 0x8c0   : > { %6615 = vmatmul.mubr.msk.bf16.gmra.mxu0 %vm3327_vm5, %v4926_v26 }
 0x918   : > { %v6456_v43 = vpop.f32.mrf.mxu0 }
 0x919   : > { %v3701_v20 = vadd.f32 %v6456_v43, %v8604_v50 }
 0x91a   : > { %v3668_v60 = vpop.f32.mrf.mxu0 }
 0x91b   : > { %v3699_v1 = vadd.f32 %v3668_v60, %v8606_v63  ;;  %v6720_v63 = vld [vmem:[%s8741_s9] sm:$0xff]  }
 0x91c   : > { %v6457_v8 = vpop.f32.mrf.mxu0  ;;  %6618 = vmatprep.subr.bf16.mxu1 %v6720_v63 }
 0x91d   : > { %v3702_v44 = vadd.f32 %v6457_v8, %v8608_v51  ;;  %6619 = vmatpush3.bf16.msra.mxu1 %v6720_v63 }
 0x91e   : > { %v3671_v17 = vpop.f32.mrf.mxu0 }
 0x91f   : > { %v3700_v2 = vadd.f32 %v3671_v17, %v8610_v30 }
 0x920   : > { %v6460_v23 = vpop.f32.mrf.mxu0 }
 0x921   : > { %v3705_v6 = vadd.f32 %v6460_v23, %v8612_v14 }
 0x922   : > { %v3684_v46 = vpop.f32.mrf.mxu0 }
 0x923   : > { %v3703_v39 = vadd.f32 %v3684_v46, %v8614_v10 }
 0x924   : > { %v6461_v18 = vpop.f32.mrf.mxu0 }
 0x925   : > { %v3706_v50 = vadd.f32 %v6461_v18, %v8616_v22 }
 0x926   : > { %v3687_v34 = vpop.f32.mrf.mxu0 }
 0x927   : > { %v3704_v51 = vadd.f32 %v3687_v34, %v3477_v21 }
 0x928   : > { %v6482_v33 = vpop.f32.mrf.mxu0 }
 0x929   : > { %v3920_v30 = vadd.f32 %v6482_v33, %v3701_v20 }
 0x92a   : > { %v3887_v11 = vpop.f32.mrf.mxu0 }
 0x92b   : > { %v3918_v14 = vadd.f32 %v3887_v11, %v3699_v1 }
 0x92c   : > { %v6483_v15 = vpop.f32.mrf.mxu0 }
 0x92d   : > { %v3921_v62 = vadd.f32 %v6483_v15, %v3702_v44 }
 0x92e   : > { %v3890_v10 = vpop.f32.mrf.mxu0 }
 0x92f   : > { %v3919_v5 = vadd.f32 %v3890_v10, %v3700_v2 }
 0x930   : > { %v6486_v0 = vpop.f32.mrf.mxu0 }
 0x931   : > { %v3924_v4 = vadd.f32 %v6486_v0, %v3705_v6 }
 0x932   : > { %v3903_v41 = vpop.f32.mrf.mxu0 }
 0x933   : > { %v3922_v22 = vadd.f32 %v3903_v41, %v3703_v39  ;;  %v5686_v41 = vld [vmem:[%s8740_s8] ss:$0 sm:$0xff] }
 0x934   : > { %v6487_v58 = vpop.f32.mrf.mxu0 }
 0x935   : > { %v3925_v61 = vadd.f32 %v6487_v58, %v3706_v50 }
 0x936   : > { %v3906_v31 = vpop.f32.mrf.mxu0 }
 0x937   : > { %v8675_v56 = vadd.f32 %v3906_v31, %v3704_v51 }
 0x938   : > { %v6508_v48 = vpop.f32.mrf.mxu0 }
 0x939   : > { %v4139_v23 = vadd.f32 %v6508_v48, %v3920_v30 }
 0x93a   : > { %v4106_v38 = vpop.f32.mrf.mxu0 }
 0x93b   : > { %v4137_v46 = vadd.f32 %v4106_v38, %v3918_v14 }
 0x93c   : > { %v6509_v42 = vpop.f32.mrf.mxu0 }
 0x93d   : > { %v4140_v21 = vadd.f32 %v6509_v42, %v3921_v62 }
 0x93e   : > { %v4109_v3 = vpop.f32.mrf.mxu0 }
 0x93f   : > { %v4138_v51 = vadd.f32 %v4109_v3, %v3919_v5 }
 0x940   : > { %v6512_v32 = vpop.f32.mrf.mxu0 }
 0x941   : > { %v4143_v10 = vadd.f32 %v6512_v32, %v3924_v4 }
 0x942   : > { %v4122_v40 = vpop.f32.mrf.mxu0 }
 0x943   : > { %v4141_v48 = vadd.f32 %v4122_v40, %v3922_v22 }
 0x944   : > { %v6513_v52 = vpop.f32.mrf.mxu0 }
 0x945   : > { %v4144_v3 = vadd.f32 %v6513_v52, %v3925_v61 }
 0x946   : > { %v4125_v25 = vpop.f32.mrf.mxu0 }
 0x948   : > { %v6534_v7 = vpop.f32.mrf.mxu0 }
 0x949   : > { %v4358_v39 = vadd.f32 %v6534_v7, %v4139_v23 }
 0x94a   : > { %v4325_v13 = vpop.f32.mrf.mxu0 }
 0x94b   : > { %v4356_v50 = vadd.f32 %v4325_v13, %v4137_v46 }
 0x94c   : > { %v6535_v47 = vpop.f32.mrf.mxu0 }
 0x94d   : > { %v4359_v33 = vadd.f32 %v6535_v47, %v4140_v21 }
 0x94e   : > { %v4328_v27 = vpop.f32.mrf.mxu0 }
 0x94f   : > { %v4357_v58 = vadd.f32 %v4328_v27, %v4138_v51 }
 0x950   : > { %v6538_v9 = vpop.f32.mrf.mxu0 }
 0x951   : > { %v4362_v38 = vadd.f32 %v6538_v9, %v4143_v10 }
 0x952   : > { %v4341_v16 = vpop.f32.mrf.mxu0 }
 0x953   : > { %v4360_v47 = vadd.f32 %v4341_v16, %v4141_v48 }
 0x954   : > { %v6539_v28 = vpop.f32.mrf.mxu0 }
 0x955   : > { %v4363_v22 = vadd.f32 %v6539_v28, %v4144_v3 }
 0x956   : > { %v4344_v57 = vpop.f32.mrf.mxu0 }
 0x958   : > { %v6560_v59 = vpop.f32.mrf.mxu0 }
 0x959   : > { %v4577_v63 = vadd.f32 %v6560_v59, %v4358_v39 }
 0x95a   : > { %v4544_v12 = vpop.f32.mrf.mxu0 }
 0x95b   : > { %v4575_v11 = vadd.f32 %v4544_v12, %v4356_v50 }
 0x95c   : > { %v6561_v36 = vpop.f32.mrf.mxu0 }
 0x95d   : > { %v4578_v30 = vadd.f32 %v6561_v36, %v4359_v33  ;;  %v4142_v36 = vadd.f32 %v4125_v25, %v8675_v56 }
 0x95e   : > { %v4547_v26 = vpop.f32.mrf.mxu0 }
 0x95f   : > { %v4576_v42 = vadd.f32 %v4547_v26, %v4357_v58  ;;  %v4361_v52 = vadd.f32 %v4344_v57, %v4142_v36 }
 0x960   : > { %v6564_v53 = vpop.f32.mrf.mxu0 }
 0x961   : > { %v4581_v4 = vadd.f32 %v6564_v53, %v4362_v38 }
 0x962   : > { %v4560_v43 = vpop.f32.mrf.mxu0 }
 0x963   : > { %v4579_v40 = vadd.f32 %v4560_v43, %v4360_v47 }
 0x964   : > { %v6565_v20 = vpop.f32.mrf.mxu0 }
 0x965   : > { %v4582_v16 = vadd.f32 %v6565_v20, %v4363_v22 }
 0x966   : > { %v4563_v60 = vpop.f32.mrf.mxu0 }
 0x967   : > { %v4580_v56 = vadd.f32 %v4563_v60, %v4361_v52 }
 0x968   : > { %v6586_v1 = vpop.f32.mrf.mxu0 }
 0x969   : > { %v4796_v15 = vadd.f32 %v6586_v1, %v4577_v63 }
 0x96a   : > { %v4763_v8 = vpop.f32.mrf.mxu0 }
 0x96b   : > { %v4794_v31 = vadd.f32 %v4763_v8, %v4575_v11 }
 0x96c   : > { %v6587_v44 = vpop.f32.mrf.mxu0 }
 0x96d   : > { %v4797_v7 = vadd.f32 %v6587_v44, %v4578_v30 }
 0x96e   : > { %v4766_v17 = vpop.f32.mrf.mxu0 }
 0x96f   : > { %v4795_v59 = vadd.f32 %v4766_v17, %v4576_v42 }
 0x970   : > { %v6590_v2 = vpop.f32.mrf.mxu0 }
 0x971   : > { %v4800_v9 = vadd.f32 %v6590_v2, %v4581_v4 }
 0x972   : > { %v4779_v6 = vpop.f32.mrf.mxu0 }
 0x973   : > { %v4798_v53 = vadd.f32 %v4779_v6, %v4579_v40 }
 0x974   : > { %v6591_v18 = vpop.f32.mrf.mxu0 }
 0x975   : > { %v4801_v25 = vadd.f32 %v6591_v18, %v4582_v16 }
 0x976   : > { %v4782_v34 = vpop.f32.mrf.mxu0 }
 0x977   : > { %v4799_v50 = vadd.f32 %v4782_v34, %v4580_v56 }
 0x978   : > { %v6612_v0 = vpop.f32.mrf.mxu0 }
 0x979   : > { %v5015_v14 = vadd.f32 %v6612_v0, %v4796_v15 }
 0x97a   : > { %v4982_v62 = vpop.f32.mrf.mxu0 }
 0x97b   : > { %v8680_v13 = vadd.f32 %v5686_v41, %v5015_v14  ;;  %v5013_v5 = vadd.f32 %v4982_v62, %v4794_v31 }
 0x97c   : > { %v6613_v32 = vpop.f32.mrf.mxu0 }
 0x97d   : > { %v5689_v12 = vmul.f32 -1.442695, %v8680_v13  ;;  %v8683_v1 = vadd.f32 %v5686_v41, %v5013_v5  ;;  %v5016_v27 = vadd.f32 %v6613_v32, %v4797_v7 }
 0x97e   : > { %v4985_v26 = vpop.f32.mrf.mxu0 }
 0x97f   : > { %6881 = vpow2.f32 %v5689_v12  ;;  %v5687_v8 = vmul.f32 -1.442695, %v8683_v1  ;;  %v8687_v44 = vadd.f32 %v5686_v41, %v5016_v27  ;;  %v5014_v61 = vadd.f32 %v4985_v26, %v4795_v59 }
 0x980   : > { %v6616_v17 = vpop.f32.mrf.mxu0 }
 0x981   : > { %6883 = vpow2.f32 %v5687_v8  ;;  %v5690_v23 = vmul.f32 -1.442695, %v8687_v44  ;;  %v5029_v46 = vadd.f32 %v5686_v41, %v5014_v61  ;;  %v5019_v39 = vadd.f32 %v6616_v17, %v4800_v9 }
 0x982   : > { %v4998_v28 = vpop.f32.mrf.mxu0 }
 0x983   : > { %6885 = vpow2.f32 %v5690_v23  ;;  %v5688_v43 = vmul.f32 -1.442695, %v5029_v46  ;;  %v5034_v2 = vadd.f32 %v5686_v41, %v5019_v39  ;;  %v5017_v21 = vadd.f32 %v4998_v28, %v4798_v53 }
 0x984   : > { %v6617_v63 = vpop.f32.mrf.mxu0 }
 0x985   : > { %6887 = vpow2.f32 %v5688_v43  ;;  %v5693_v51 = vmul.f32 -1.442695, %v5034_v2  ;;  %v5032_v57 = vadd.f32 %v5686_v41, %v5017_v21  ;;  %v5020_v20 = vadd.f32 %v6617_v63, %v4801_v25  ;;  %v5695_v43 = vld [vmem:[%s8742_s10] ss:$0 sm:$0xff] }
 0x986   : > { %v5001_v6 = vpop.f32.mrf.mxu0 }
 0x987   : > { %6889 = vpow2.f32 %v5693_v51  ;;  %v5691_v33 = vmul.f32 -1.442695, %v5032_v57  ;;  %v5035_v11 = vadd.f32 %v5686_v41, %v5020_v20  ;;  %v5018_v15 = vadd.f32 %v5001_v6, %v4799_v50 }
 0x989   : > { %6891 = vpow2.f32 %v5691_v33  ;;  %v5694_v10 = vmul.f32 -1.442695, %v5035_v11  ;;  %v5033_v60 = vadd.f32 %v5686_v41, %v5018_v15 }
 0x98b   : > { %6893 = vpow2.f32 %v5694_v10  ;;  %v5692_v18 = vmul.f32 -1.442695, %v5033_v60 }
 0x98c   : > { %v6882_v0 = vpop.eup %6881 }
 0x98d   : > { %v5062_v58 = vadd.f32 1.0, %v6882_v0  ;;  %6895 = vpow2.f32 %v5692_v18 }
 0x98e   : > { %v6884_v30 = vpop.eup %6883 }
 0x98f   : > { %6897 = vrcp.f32 %v5062_v58  ;;  %v5060_v34 = vadd.f32 1.0, %v6884_v30 }
 0x990   : > { %v6886_v31 = vpop.eup %6885 }
 0x991   : > { %6899 = vrcp.f32 %v5060_v34  ;;  %v5063_v14 = vadd.f32 1.0, %v6886_v31 }
 0x992   : > { %v6888_v48 = vpop.eup %6887 }
 0x993   : > { %6901 = vrcp.f32 %v5063_v14  ;;  %v5061_v38 = vadd.f32 1.0, %v6888_v48 }
 0x994   : > { %v6890_v62 = vpop.eup %6889 }
 0x995   : > { %6903 = vrcp.f32 %v5061_v38  ;;  %v5066_v42 = vadd.f32 1.0, %v6890_v62 }
 0x996   : > { %v6892_v7 = vpop.eup %6891 }
 0x997   : > { %6905 = vrcp.f32 %v5066_v42  ;;  %v5064_v41 = vadd.f32 1.0, %v6892_v7 }
 0x998   : > { %v6894_v5 = vpop.eup %6893 }
 0x999   : > { %6907 = vrcp.f32 %v5064_v41  ;;  %v5067_v3 = vadd.f32 1.0, %v6894_v5 }
 0x99a   : > { %v6896_v47 = vpop.eup %6895 }
 0x99b   : > { %6909 = vrcp.f32 %v5067_v3  ;;  %v5065_v4 = vadd.f32 1.0, %v6896_v47 }
 0x99c   : > { %v6898_v32 = vpop.eup %6897 }
 0x99d   : > { %6911 = vrcp.f32 %v5065_v4  ;;  %v5086_v12 = vmul.f32 %v6898_v32, %v8680_v13 }
 0x99e   : > { %v6900_v59 = vpop.eup %6899 }
 0x99f   : > { %v5084_v36 = vmul.f32 %v6900_v59, %v8683_v1  ;;  %v5094_v9 = vadd.f32 %v5086_v12, %v8270_v19 }
 0x9a0   : > { %v6902_v27 = vpop.eup %6901 }
 0x9a1   : > { %v5087_v22 = vmul.f32 %v6902_v27, %v8687_v44  ;;  %v5092_v52 = vadd.f32 %v5084_v36, %v8284_v24 }
 0x9a2   : > { %v6904_v40 = vpop.eup %6903 }
 0x9a3   : > { %v5095_v26 = vadd.f32 %v5087_v22, %v8259_v54  ;;  %v5085_v8 = vmul.f32 %v6904_v40, %v5029_v46 }
 0x9a4   : > { %v6906_v61 = vpop.eup %6905 }
 0x9a5   : > { %v5101_v16 = vpack.c.bf16 %v5095_v26, %v5094_v9  ;;  %v5093_v53 = vadd.f32 %v5085_v8, %v8279_v55  ;;  %v5090_v23 = vmul.f32 %v6906_v61, %v5034_v2 }
 0x9a6   : > { %v6908_v17 = vpop.eup %6907 }
 0x9a7   : > { %v5100_v13 = vpack.c.bf16 %v5093_v53, %v5092_v52  ;;  %v5088_v56 = vmul.f32 %v6908_v17, %v5032_v57  ;;  %v5098_v54 = vadd.f32 %v5090_v23, %v8246_v29 }
 0x9a8   : > { %v6910_v39 = vpop.eup %6909 }
 0x9a9   : > { %v5091_v1 = vmul.f32 %v6910_v39, %v5035_v11  ;;  %6620 = vmatprep.mubr.msk.bf16.mxu1 %vm3327_vm5, %v5100_v13  ;;  %v5096_v24 = vadd.f32 %v5088_v56, %v8250_v45 }
 0x9aa   : > { %v6912_v44 = vpop.eup %6911  ;;  %6621 = vmatmul.mubr.msk.bf16.vlgmr.msra.gmra.mxu1 %vm3327_vm5, %v5101_v16 }
 0x9ab   : > { %v5099_v19 = vadd.f32 %v5091_v1, %v8248_v49  ;;  %v5089_v46 = vmul.f32 %v6912_v44, %v5033_v60 }
 0x9ad   : > { %v5103_v25 = vpack.c.bf16 %v5099_v19, %v5098_v54  ;;  %v5097_v55 = vadd.f32 %v5089_v46, %v8256_v37 }
 0x9af   : > { %v5102_v28 = vpack.c.bf16 %v5097_v55, %v5096_v24 }
 0x9b1   : > { %6624 = vmatprep.mubr.msk.bf16.mxu1 %vm3327_vm5, %v5102_v28 }
 0x9b2   : > { %6625 = vmatmul.mubr.msk.bf16.gmra.mxu1 %vm3327_vm5, %v5103_v25 }
 0xa6a   : > { %v6622_v2 = vpop.f32.mrf.mxu1 }
 0xa6b   : > { %v5174_v21 = vadd.f32 %v6622_v2, %v5695_v43 }
 0xa6c   : > { %v5165_v29 = vpop.f32.mrf.mxu1 }
 0xa6d   : > { %v5703_v50 = vmul.f32 -1.442695, %v5174_v21  ;;  %v5166_v49 = vadd.f32 %v5695_v43, %v5165_v29 }
 0xa6e   : > { %v6623_v63 = vpop.f32.mrf.mxu1 }
 0xa6f   : > { %6913 = vpow2.f32 %v5703_v50  ;;  %v5701_v45 = vmul.f32 -1.442695, %v5166_v49  ;;  %v5177_v51 = vadd.f32 %v6623_v63, %v5695_v43 }
 0xa70   : > { %v5168_v57 = vpop.f32.mrf.mxu1 }
 0xa71   : > { %6915 = vpow2.f32 %v5701_v45  ;;  %v5704_v37 = vmul.f32 -1.442695, %v5177_v51  ;;  %v5169_v20 = vadd.f32 %v5695_v43, %v5168_v57 }
 0xa72   : > { %v6626_v6 = vpop.f32.mrf.mxu1 }
 0xa73   : > { %6917 = vpow2.f32 %v5704_v37  ;;  %v5702_v33 = vmul.f32 -1.442695, %v5169_v20  ;;  %v5190_v11 = vadd.f32 %v6626_v6, %v5695_v43 }
 0xa74   : > { %v5181_v15 = vpop.f32.mrf.mxu1 }
 0xa75   : > { %6919 = vpow2.f32 %v5702_v33  ;;  %v5707_v10 = vmul.f32 -1.442695, %v5190_v11  ;;  %v5182_v60 = vadd.f32 %v5695_v43, %v5181_v15 }
 0xa76   : > { %v6627_v18 = vpop.f32.mrf.mxu1 }
 0xa77   : > { %6921 = vpow2.f32 %v5707_v10  ;;  %v5705_v0 = vmul.f32 -1.442695, %v5182_v60  ;;  %v5193_v58 = vadd.f32 %v6627_v18, %v5695_v43 }
 0xa78   : > { %v5184_v30 = vpop.f32.mrf.mxu1 }
 0xa79   : > { %6923 = vpow2.f32 %v5705_v0  ;;  %v5708_v34 = vmul.f32 -1.442695, %v5193_v58  ;;  %v5185_v31 = vadd.f32 %v5695_v43, %v5184_v30 }
 0xa7b   : > { %6925 = vpow2.f32 %v5708_v34  ;;  %v5706_v14 = vmul.f32 -1.442695, %v5185_v31 }
 0xa7c   : > { %v6914_v48 = vpop.eup %6913 }
 0xa7d   : > { %v5223_v38 = vadd.f32 1.0, %v6914_v48  ;;  %6927 = vpow2.f32 %v5706_v14 }
 0xa7e   : > { %v6916_v62 = vpop.eup %6915 }
 0xa7f   : > { %6929 = vrcp.f32 %v5223_v38  ;;  %v5221_v42 = vadd.f32 1.0, %v6916_v62 }
 0xa80   : > { %v6918_v7 = vpop.eup %6917 }
 0xa81   : > { %6931 = vrcp.f32 %v5221_v42  ;;  %v5224_v41 = vadd.f32 1.0, %v6918_v7 }
 0xa82   : > { %v6920_v5 = vpop.eup %6919 }
 0xa83   : > { %6933 = vrcp.f32 %v5224_v41  ;;  %v5222_v3 = vadd.f32 1.0, %v6920_v5 }
 0xa84   : > { %v6922_v47 = vpop.eup %6921 }
 0xa85   : > { %6935 = vrcp.f32 %v5222_v3  ;;  %v5227_v4 = vadd.f32 1.0, %v6922_v47 }
 0xa86   : > { %v6924_v32 = vpop.eup %6923 }
 0xa87   : > { %6937 = vrcp.f32 %v5227_v4  ;;  %v5225_v59 = vadd.f32 1.0, %v6924_v32 }
 0xa88   : > { %v6926_v12 = vpop.eup %6925 }
 0xa89   : > { %6939 = vrcp.f32 %v5225_v59  ;;  %v5228_v27 = vadd.f32 1.0, %v6926_v12 }
 0xa8a   : > { %v6928_v36 = vpop.eup %6927 }
 0xa8b   : > { %6941 = vrcp.f32 %v5228_v27  ;;  %v5226_v22 = vadd.f32 1.0, %v6928_v36 }
 0xa8c   : > { %v6930_v40 = vpop.eup %6929 }
 0xa8d   : > { %v5247_v9 = vsel %vm5196_vm8, %v5174_v21, %v6930_v40  ;;  %6943 = vrcp.f32 %v5226_v22 }
 0xa8e   : > { %v6932_v26 = vpop.eup %6931  ;;  %5255 = vst [vmem:[%s386_s21 + $0x10] sm:$0xff] %v5247_v9 }
 0xa8f   : > { %v5245_v8 = vsel %vm5196_vm8, %v5166_v49, %v6932_v26 }
 0xa90   : > { %v6934_v61 = vpop.eup %6933  ;;  %5253 = vst [vmem:[%s386_s21] sm:$0xff] %v5245_v8 }
 0xa91   : > { %v5248_v52 = vsel %vm5196_vm8, %v5177_v51, %v6934_v61 }
 0xa92   : > { %v6936_v16 = vpop.eup %6935  ;;  %5256 = vst [vmem:[%s386_s21 + $0x18] sm:$0xff] %v5248_v52 }
 0xa93   : > { %v5246_v53 = vsel %vm5196_vm8, %v5169_v20, %v6936_v16 }
 0xa94   : > { %v6938_v17 = vpop.eup %6937  ;;  %5254 = vst [vmem:[%s386_s21 + $0x8] sm:$0xff] %v5246_v53 }
 0xa95   : > { %v5251_v23 = vsel %vm5196_vm8, %v5190_v11, %v6938_v17 }
 0xa96   : > { %v6940_v13 = vpop.eup %6939  ;;  %5259 = vst [vmem:[%s386_s21 + $0x30] sm:$0xff] %v5251_v23 }
 0xa97   : > { %v5249_v39 = vsel %vm5196_vm8, %v5182_v60, %v6940_v13 }
 0xa98   : > { %v6942_v56 = vpop.eup %6941  ;;  %5257 = vst [vmem:[%s386_s21 + $0x20] sm:$0xff] %v5249_v39 }
 0xa99   : > { %v5252_v1 = vsel %vm5196_vm8, %v5193_v58, %v6942_v56 }
 0xa9a   : > { %v6944_v44 = vpop.eup %6943  ;;  %5260 = vst [vmem:[%s386_s21 + $0x38] sm:$0xff] %v5252_v1 }
 0xa9b   : > { %v5250_v54 = vsel %vm5196_vm8, %v5185_v31, %v6944_v44 }
 0xa9c   : > { %5258 = vst [vmem:[%s386_s21 + $0x28] sm:$0xff] %v5250_v54 }
 0xa9d PF: > { %s21_s17 = sadd.s32 1, %s6967_s17  }
 0xa9e   : > { %p18_p4 = scmp.ge.s32.totalorder %s21_s17, 4  }
 0xaa0   :  { %20 = sbr.rel (!%p18_p4) target bundleno = 1 (0x1), region = 110 }

</bundles_post_ra>
